<compile_context>
chip_gen: v5e
topology: v5e:2x2
jax: 0.10.0
libtpu: 0.0.40
codegen_flags: <defaults>
</compile_context>

<pallas_src>
import functools

import jax
import jax.numpy as jnp
from jax.experimental import pallas as pl
from jax.experimental.pallas import tpu as pltpu

K = 5      # conv kernel size
PAD = 2    # 'same' padding for 5x5
C1 = 16    # conv1 output channels
C2 = 3     # conv2 output channels


def _round_up(x, m):
    return (x + m - 1) // m * m


def _conv_net_kernel(x_ref, mask_ref, w1_ref, b1_ref, w2_ref, b2_ref, o_ref,
                     p1_ref, h1s_ref, *, Wp, NB, Lin, LM):
    # x_ref:    (1, 1, N + RIN) flat padded images, one segment of length Lin
    #           per batch element, zero-extended on the right.
    # mask_ref: (1, N) 1.0 where the flat column maps to a valid HxW pixel.
    # w1_ref:   (16, 25)   conv1 weights, tap-major (kh*5+kw).
    # b1_ref:   (16, 1)
    # w2_ref:   (25, 3, 16) conv2 weights, [tap, cout, cin].
    # b2_ref:   (3, 1)
    # o_ref:    (1, 3, N)  lane-dense output (valid pixels extracted in wrapper)
    # p1_ref:   VMEM (25, N)        conv1 im2col patch matrix
    # h1s_ref:  VMEM (16, LM+N+RM)  masked conv1 activations with zero margins
    N = NB * Lin
    RM = h1s_ref.shape[1] - LM - N

    # ---- Conv1: build (25, N) patch matrix with static flat shifts ----------
    for kh in range(K):
        for kw in range(K):
            t = kh * K + kw
            off = kh * Wp + kw                       # non-negative flat shift
            p1_ref[t:t + 1, :] = x_ref[0, :, off:off + N]

    # One MXU matmul replaces 25 broadcast FMAs: (16,25) @ (25,N)
    h1 = jnp.dot(w1_ref[...], p1_ref[...], preferred_element_type=jnp.float32)
    h1 = jnp.maximum(h1 + b1_ref[...], 0.0)
    h1 = h1 * mask_ref[...]          # zero columns outside the valid HxW image

    # ---- Stage masked activations with zero halo margins (aligned stores) ---
    h1s_ref[:, :LM] = jnp.zeros((C1, LM), jnp.float32)
    h1s_ref[:, LM + N:] = jnp.zeros((C1, RM), jnp.float32)
    h1s_ref[:, LM:LM + N] = h1                         # lane-aligned (LM % 128 == 0)

    # ---- Conv2: 25 per-tap MXU matmuls contracting the 16-channel axis ------
    acc = jnp.zeros((C2, N), jnp.float32)
    for kh in range(K):
        for kw in range(K):
            t = kh * K + kw
            off = LM + (kh - PAD) * Wp + (kw - PAD)    # signed flat shift, >= 0 here
            win = h1s_ref[:, off:off + N]              # (16, N)
            acc = acc + jnp.dot(w2_ref[t], win,
                                preferred_element_type=jnp.float32)

    out = jnp.clip(acc + b2_ref[...], -1.0, 1.0) * mask_ref[...]
    o_ref[...] = out[None]


def net_forward(x, w1, b1, w2, b2, *, block_b=8):
    """x: (B, 1, H, W) float32 NCHW. Returns (B, 3, H, W) float32."""
    B, cin, H, W = x.shape
    assert cin == 1
    Hp, Wp = H + 2 * PAD, W + 2 * PAD

    NB = min(block_b, B)                 # batch elements per grid step
    nblk = pl.cdiv(B, NB)
    Bpad = nblk * NB

    Lin = _round_up(Hp * Wp, 128)        # per-image flat segment (lane) length
    N = NB * Lin                         # lane width per grid step
    LM = _round_up(2 * Wp + 2, 128)      # left halo margin for conv2 reads
    RM = _round_up(2 * Wp + 2, 128)      # right halo margin for conv2 reads
    RIN = _round_up(4 * Wp + 4, 128)     # right margin for conv1 reads
    NTOT = N + RIN
    LTOT = LM + N + RM

    # ---- glue: zero-pad spatially, flatten to padded-row flat segments ------
    xp = jnp.pad(x[:, 0].astype(jnp.float32),
                 ((0, Bpad - B), (PAD, PAD), (PAD, PAD)))        # (Bpad, Hp, Wp)
    xf = xp.reshape(Bpad, Hp * Wp)
    xf = jnp.pad(xf, ((0, 0), (0, Lin - Hp * Wp)))                # (Bpad, Lin)
    xf = xf.reshape(nblk, 1, N)
    xf = jnp.pad(xf, ((0, 0), (0, 0), (0, RIN)))                  # (nblk, 1, NTOT)

    # validity mask for one grid step (same for every batch block)
    p = jnp.arange(Lin)
    valid = ((p // Wp) < H) & ((p % Wp) < W)
    mask = jnp.tile(valid.astype(jnp.float32), NB).reshape(1, N)  # (1, N)

    # weights: tap-major layouts
    w1r = w1.reshape(C1, K * K).astype(jnp.float32)                          # (16, 25)
    w2r = jnp.transpose(w2, (2, 3, 0, 1)).reshape(K * K, C2, C1).astype(jnp.float32)
    b1r = b1.reshape(C1, 1).astype(jnp.float32)
    b2r = b2.reshape(C2, 1).astype(jnp.float32)

    kernel = functools.partial(_conv_net_kernel, Wp=Wp, NB=NB, Lin=Lin, LM=LM)

    out = pl.pallas_call(
        kernel,
        out_shape=jax.ShapeDtypeStruct((nblk, C2, N), jnp.float32),
        grid_spec=pltpu.PrefetchScalarGridSpec(
            num_scalar_prefetch=0,
            grid=(nblk,),
            in_specs=[
                pl.BlockSpec((1, 1, NTOT), lambda g: (g, 0, 0)),
                pl.BlockSpec((1, N), lambda g: (0, 0)),
                pl.BlockSpec((C1, K * K), lambda g: (0, 0)),
                pl.BlockSpec((C1, 1), lambda g: (0, 0)),
                pl.BlockSpec((K * K, C2, C1), lambda g: (0, 0, 0)),
                pl.BlockSpec((C2, 1), lambda g: (0, 0)),
            ],
            out_specs=pl.BlockSpec((1, C2, N), lambda g: (g, 0, 0)),
            scratch_shapes=[
                pltpu.VMEM((K * K, N), jnp.float32),   # conv1 patch matrix
                pltpu.VMEM((C1, LTOT), jnp.float32),   # masked h1 + zero margins
            ],
        ),
        compiler_params=pltpu.CompilerParams(
            dimension_semantics=("parallel",)),
    )(xf, mask, w1r, b1r, w2r, b2r)

    # ---- glue: lane-dense (nblk, 3, NB*Lin) -> NCHW (B, 3, H, W) -------------
    out = out.reshape(nblk, C2, NB, Lin).transpose(0, 2, 1, 3).reshape(Bpad, C2, Lin)
    out = out[:B, :, :Hp * Wp].reshape(B, C2, Hp, Wp)[:, :, :H, :W]
    return out


def _ref_forward(x, w1, b1, w2, b2):
    dn = ("NCHW", "OIHW", "NCHW")
    y = jax.lax.conv_general_dilated(
        x, w1, (1, 1), [(PAD, PAD), (PAD, PAD)], dimension_numbers=dn,
        precision=jax.lax.Precision.HIGHEST)
    y = jnp.maximum(y + b1[None, :, None, None], 0.0)
    y = jax.lax.conv_general_dilated(
        y, w2, (1, 1), [(PAD, PAD), (PAD, PAD)], dimension_numbers=dn,
        precision=jax.lax.Precision.HIGHEST)
    y = y + b2[None, :, None, None]
    return jnp.clip(y, -1.0, 1.0)


def _init_params(key):
    # PyTorch-style uniform(-1/sqrt(fan_in), 1/sqrt(fan_in))
    k1, k2, k3, k4 = jax.random.split(key, 4)
    fan1 = 1 * K * K
    fan2 = C1 * K * K
    b1lim = 1.0 / jnp.sqrt(fan1)
    b2lim = 1.0 / jnp.sqrt(fan2)
    w1 = jax.random.uniform(k1, (C1, 1, K, K), jnp.float32, -b1lim, b1lim)
    b1 = jax.random.uniform(k2, (C1,), jnp.float32, -b1lim, b1lim)
    w2 = jax.random.uniform(k3, (C2, C1, K, K), jnp.float32, -b2lim, b2lim)
    b2 = jax.random.uniform(k4, (C2,), jnp.float32, -b2lim, b2lim)
    return w1, b1, w2, b2


if __name__ == "__main__":
    key = jax.random.PRNGKey(0)
    kx, kp = jax.random.split(key)
    B, H, W = 2, 16, 16
    x = jax.random.normal(kx, (B, 1, H, W), jnp.float32)
    w1, b1, w2, b2 = _init_params(kp)

    out = net_forward(x, w1, b1, w2, b2)
    out = jax.block_until_ready(out)

    ref = jax.block_until_ready(_ref_forward(x, w1, b1, w2, b2))
    err = float(jnp.max(jnp.abs(out - ref)))
    assert out.shape == (B, C2, H, W), out.shape
    assert err < 1e-2, f"max abs error {err}"
    print("KERNEL_OK")
</pallas_src>

<mosaic_0001>
module attributes {stable_mosaic.version = 11 : i64} {
  func.func @_conv_net_kernel(%arg0: i32, %arg1: memref<1x1x1152xf32, #tpu.memory_space<vmem>>, %arg2: memref<1x1024xf32, #tpu.memory_space<vmem>>, %arg3: memref<16x25xf32, #tpu.memory_space<vmem>>, %arg4: memref<16x1xf32, #tpu.memory_space<vmem>>, %arg5: memref<25x3x16xf32, #tpu.memory_space<vmem>>, %arg6: memref<3x1xf32, #tpu.memory_space<vmem>>, %arg7: memref<1x3x1024xf32, #tpu.memory_space<vmem>>, %arg8: memref<25x1024xf32, #tpu.memory_space<vmem>>, %arg9: memref<16x1280xf32, #tpu.memory_space<vmem>>) attributes {dimension_semantics = [#tpu.dimension_semantics<parallel>], iteration_bounds = array<i64: 1>, scalar_prefetch = 0 : i64, scratch_operands = 2 : i64, tpu.core_type = #tpu.core_type<tc>, window_params = [{transform_indices = @transform_0, window_bounds = array<i64: 1, 1, 1152>}, {pipeline_mode = #tpu.pipeline_mode<synchronous>, transform_indices = @transform_1, window_bounds = array<i64: 1, 1024>}, {pipeline_mode = #tpu.pipeline_mode<synchronous>, transform_indices = @transform_2, window_bounds = array<i64: 16, 25>}, {pipeline_mode = #tpu.pipeline_mode<synchronous>, transform_indices = @transform_3, window_bounds = array<i64: 16, 1>}, {pipeline_mode = #tpu.pipeline_mode<synchronous>, transform_indices = @transform_4, window_bounds = array<i64: 25, 3, 16>}, {pipeline_mode = #tpu.pipeline_mode<synchronous>, transform_indices = @transform_5, window_bounds = array<i64: 3, 1>}, {transform_indices = @transform_6, window_bounds = array<i64: 1, 3, 1024>}]} {
    %c0 = arith.constant 0 : index
    %c0_0 = arith.constant 0 : index
    %c0_1 = arith.constant 0 : index
    %0 = vector.load %arg1[%c0, %c0_0, %c0_1] : memref<1x1x1152xf32, #tpu.memory_space<vmem>>, vector<1x1x1024xf32>
    %1 = vector.shape_cast %0 : vector<1x1x1024xf32> to vector<1x1024xf32>
    %c0_2 = arith.constant 0 : index
    %c0_3 = arith.constant 0 : index
    %2 = vector.load %arg8[%c0_2, %c0_3] : memref<25x1024xf32, #tpu.memory_space<vmem>>, vector<1x1024xf32>
    tpu.vector_store %arg8[%c0_2, %c0_3], %1 {strides = array<i32>} : memref<25x1024xf32, #tpu.memory_space<vmem>>, vector<1x1024xf32>,
    %c0_4 = arith.constant 0 : index
    %c0_5 = arith.constant 0 : index
    %c1 = arith.constant 1 : index
    %3 = vector.load %arg1[%c0_4, %c0_5, %c1] : memref<1x1x1152xf32, #tpu.memory_space<vmem>>, vector<1x1x1024xf32>
    %4 = vector.shape_cast %3 : vector<1x1x1024xf32> to vector<1x1024xf32>
    %c1_6 = arith.constant 1 : index
    %c0_7 = arith.constant 0 : index
    %5 = vector.load %arg8[%c1_6, %c0_7] : memref<25x1024xf32, #tpu.memory_space<vmem>>, vector<1x1024xf32>
    tpu.vector_store %arg8[%c1_6, %c0_7], %4 {strides = array<i32>} : memref<25x1024xf32, #tpu.memory_space<vmem>>, vector<1x1024xf32>,
    %c0_8 = arith.constant 0 : index
    %c0_9 = arith.constant 0 : index
    %c2 = arith.constant 2 : index
    %6 = vector.load %arg1[%c0_8, %c0_9, %c2] : memref<1x1x1152xf32, #tpu.memory_space<vmem>>, vector<1x1x1024xf32>
    %7 = vector.shape_cast %6 : vector<1x1x1024xf32> to vector<1x1024xf32>
    %c2_10 = arith.constant 2 : index
    %c0_11 = arith.constant 0 : index
    %8 = vector.load %arg8[%c2_10, %c0_11] : memref<25x1024xf32, #tpu.memory_space<vmem>>, vector<1x1024xf32>
    tpu.vector_store %arg8[%c2_10, %c0_11], %7 {strides = array<i32>} : memref<25x1024xf32, #tpu.memory_space<vmem>>, vector<1x1024xf32>,
    %c0_12 = arith.constant 0 : index
    %c0_13 = arith.constant 0 : index
    %c3 = arith.constant 3 : index
    %9 = vector.load %arg1[%c0_12, %c0_13, %c3] : memref<1x1x1152xf32, #tpu.memory_space<vmem>>, vector<1x1x1024xf32>
    %10 = vector.shape_cast %9 : vector<1x1x1024xf32> to vector<1x1024xf32>
    %c3_14 = arith.constant 3 : index
    %c0_15 = arith.constant 0 : index
    %11 = vector.load %arg8[%c3_14, %c0_15] : memref<25x1024xf32, #tpu.memory_space<vmem>>, vector<1x1024xf32>
    tpu.vector_store %arg8[%c3_14, %c0_15], %10 {strides = array<i32>} : memref<25x1024xf32, #tpu.memory_space<vmem>>, vector<1x1024xf32>,
    %c0_16 = arith.constant 0 : index
    %c0_17 = arith.constant 0 : index
    %c4 = arith.constant 4 : index
    %12 = vector.load %arg1[%c0_16, %c0_17, %c4] : memref<1x1x1152xf32, #tpu.memory_space<vmem>>, vector<1x1x1024xf32>
    %13 = vector.shape_cast %12 : vector<1x1x1024xf32> to vector<1x1024xf32>
    %c4_18 = arith.constant 4 : index
    %c0_19 = arith.constant 0 : index
    %14 = vector.load %arg8[%c4_18, %c0_19] : memref<25x1024xf32, #tpu.memory_space<vmem>>, vector<1x1024xf32>
    tpu.vector_store %arg8[%c4_18, %c0_19], %13 {strides = array<i32>} : memref<25x1024xf32, #tpu.memory_space<vmem>>, vector<1x1024xf32>,
    %c0_20 = arith.constant 0 : index
    %c0_21 = arith.constant 0 : index
    %c20 = arith.constant 20 : index
    %15 = vector.load %arg1[%c0_20, %c0_21, %c20] : memref<1x1x1152xf32, #tpu.memory_space<vmem>>, vector<1x1x1024xf32>
    %16 = vector.shape_cast %15 : vector<1x1x1024xf32> to vector<1x1024xf32>
    %c5 = arith.constant 5 : index
    %c0_22 = arith.constant 0 : index
    %17 = vector.load %arg8[%c5, %c0_22] : memref<25x1024xf32, #tpu.memory_space<vmem>>, vector<1x1024xf32>
    tpu.vector_store %arg8[%c5, %c0_22], %16 {strides = array<i32>} : memref<25x1024xf32, #tpu.memory_space<vmem>>, vector<1x1024xf32>,
    %c0_23 = arith.constant 0 : index
    %c0_24 = arith.constant 0 : index
    %c21 = arith.constant 21 : index
    %18 = vector.load %arg1[%c0_23, %c0_24, %c21] : memref<1x1x1152xf32, #tpu.memory_space<vmem>>, vector<1x1x1024xf32>
    %19 = vector.shape_cast %18 : vector<1x1x1024xf32> to vector<1x1024xf32>
    %c6 = arith.constant 6 : index
    %c0_25 = arith.constant 0 : index
    %20 = vector.load %arg8[%c6, %c0_25] : memref<25x1024xf32, #tpu.memory_space<vmem>>, vector<1x1024xf32>
    tpu.vector_store %arg8[%c6, %c0_25], %19 {strides = array<i32>} : memref<25x1024xf32, #tpu.memory_space<vmem>>, vector<1x1024xf32>,
    %c0_26 = arith.constant 0 : index
    %c0_27 = arith.constant 0 : index
    %c22 = arith.constant 22 : index
    %21 = vector.load %arg1[%c0_26, %c0_27, %c22] : memref<1x1x1152xf32, #tpu.memory_space<vmem>>, vector<1x1x1024xf32>
    %22 = vector.shape_cast %21 : vector<1x1x1024xf32> to vector<1x1024xf32>
    %c7 = arith.constant 7 : index
    %c0_28 = arith.constant 0 : index
    %23 = vector.load %arg8[%c7, %c0_28] : memref<25x1024xf32, #tpu.memory_space<vmem>>, vector<1x1024xf32>
    tpu.vector_store %arg8[%c7, %c0_28], %22 {strides = array<i32>} : memref<25x1024xf32, #tpu.memory_space<vmem>>, vector<1x1024xf32>,
    %c0_29 = arith.constant 0 : index
    %c0_30 = arith.constant 0 : index
    %c23 = arith.constant 23 : index
    %24 = vector.load %arg1[%c0_29, %c0_30, %c23] : memref<1x1x1152xf32, #tpu.memory_space<vmem>>, vector<1x1x1024xf32>
    %25 = vector.shape_cast %24 : vector<1x1x1024xf32> to vector<1x1024xf32>
    %c8 = arith.constant 8 : index
    %c0_31 = arith.constant 0 : index
    %26 = vector.load %arg8[%c8, %c0_31] : memref<25x1024xf32, #tpu.memory_space<vmem>>, vector<1x1024xf32>
    tpu.vector_store %arg8[%c8, %c0_31], %25 {strides = array<i32>} : memref<25x1024xf32, #tpu.memory_space<vmem>>, vector<1x1024xf32>,
    %c0_32 = arith.constant 0 : index
    %c0_33 = arith.constant 0 : index
    %c24 = arith.constant 24 : index
    %27 = vector.load %arg1[%c0_32, %c0_33, %c24] : memref<1x1x1152xf32, #tpu.memory_space<vmem>>, vector<1x1x1024xf32>
    %28 = vector.shape_cast %27 : vector<1x1x1024xf32> to vector<1x1024xf32>
    %c9 = arith.constant 9 : index
    %c0_34 = arith.constant 0 : index
    %29 = vector.load %arg8[%c9, %c0_34] : memref<25x1024xf32, #tpu.memory_space<vmem>>, vector<1x1024xf32>
    tpu.vector_store %arg8[%c9, %c0_34], %28 {strides = array<i32>} : memref<25x1024xf32, #tpu.memory_space<vmem>>, vector<1x1024xf32>,
    %c0_35 = arith.constant 0 : index
    %c0_36 = arith.constant 0 : index
    %c40 = arith.constant 40 : index
    %30 = vector.load %arg1[%c0_35, %c0_36, %c40] : memref<1x1x1152xf32, #tpu.memory_space<vmem>>, vector<1x1x1024xf32>
    %31 = vector.shape_cast %30 : vector<1x1x1024xf32> to vector<1x1024xf32>
    %c10 = arith.constant 10 : index
    %c0_37 = arith.constant 0 : index
    %32 = vector.load %arg8[%c10, %c0_37] : memref<25x1024xf32, #tpu.memory_space<vmem>>, vector<1x1024xf32>
    tpu.vector_store %arg8[%c10, %c0_37], %31 {strides = array<i32>} : memref<25x1024xf32, #tpu.memory_space<vmem>>, vector<1x1024xf32>,
    %c0_38 = arith.constant 0 : index
    %c0_39 = arith.constant 0 : index
    %c41 = arith.constant 41 : index
    %33 = vector.load %arg1[%c0_38, %c0_39, %c41] : memref<1x1x1152xf32, #tpu.memory_space<vmem>>, vector<1x1x1024xf32>
    %34 = vector.shape_cast %33 : vector<1x1x1024xf32> to vector<1x1024xf32>
    %c11 = arith.constant 11 : index
    %c0_40 = arith.constant 0 : index
    %35 = vector.load %arg8[%c11, %c0_40] : memref<25x1024xf32, #tpu.memory_space<vmem>>, vector<1x1024xf32>
    tpu.vector_store %arg8[%c11, %c0_40], %34 {strides = array<i32>} : memref<25x1024xf32, #tpu.memory_space<vmem>>, vector<1x1024xf32>,
    %c0_41 = arith.constant 0 : index
    %c0_42 = arith.constant 0 : index
    %c42 = arith.constant 42 : index
    %36 = vector.load %arg1[%c0_41, %c0_42, %c42] : memref<1x1x1152xf32, #tpu.memory_space<vmem>>, vector<1x1x1024xf32>
    %37 = vector.shape_cast %36 : vector<1x1x1024xf32> to vector<1x1024xf32>
    %c12 = arith.constant 12 : index
    %c0_43 = arith.constant 0 : index
    %38 = vector.load %arg8[%c12, %c0_43] : memref<25x1024xf32, #tpu.memory_space<vmem>>, vector<1x1024xf32>
    tpu.vector_store %arg8[%c12, %c0_43], %37 {strides = array<i32>} : memref<25x1024xf32, #tpu.memory_space<vmem>>, vector<1x1024xf32>,
    %c0_44 = arith.constant 0 : index
    %c0_45 = arith.constant 0 : index
    %c43 = arith.constant 43 : index
    %39 = vector.load %arg1[%c0_44, %c0_45, %c43] : memref<1x1x1152xf32, #tpu.memory_space<vmem>>, vector<1x1x1024xf32>
    %40 = vector.shape_cast %39 : vector<1x1x1024xf32> to vector<1x1024xf32>
    %c13 = arith.constant 13 : index
    %c0_46 = arith.constant 0 : index
    %41 = vector.load %arg8[%c13, %c0_46] : memref<25x1024xf32, #tpu.memory_space<vmem>>, vector<1x1024xf32>
    tpu.vector_store %arg8[%c13, %c0_46], %40 {strides = array<i32>} : memref<25x1024xf32, #tpu.memory_space<vmem>>, vector<1x1024xf32>,
    %c0_47 = arith.constant 0 : index
    %c0_48 = arith.constant 0 : index
    %c44 = arith.constant 44 : index
    %42 = vector.load %arg1[%c0_47, %c0_48, %c44] : memref<1x1x1152xf32, #tpu.memory_space<vmem>>, vector<1x1x1024xf32>
    %43 = vector.shape_cast %42 : vector<1x1x1024xf32> to vector<1x1024xf32>
    %c14 = arith.constant 14 : index
    %c0_49 = arith.constant 0 : index
    %44 = vector.load %arg8[%c14, %c0_49] : memref<25x1024xf32, #tpu.memory_space<vmem>>, vector<1x1024xf32>
    tpu.vector_store %arg8[%c14, %c0_49], %43 {strides = array<i32>} : memref<25x1024xf32, #tpu.memory_space<vmem>>, vector<1x1024xf32>,
    %c0_50 = arith.constant 0 : index
    %c0_51 = arith.constant 0 : index
    %c60 = arith.constant 60 : index
    %45 = vector.load %arg1[%c0_50, %c0_51, %c60] : memref<1x1x1152xf32, #tpu.memory_space<vmem>>, vector<1x1x1024xf32>
    %46 = vector.shape_cast %45 : vector<1x1x1024xf32> to vector<1x1024xf32>
    %c15 = arith.constant 15 : index
    %c0_52 = arith.constant 0 : index
    %47 = vector.load %arg8[%c15, %c0_52] : memref<25x1024xf32, #tpu.memory_space<vmem>>, vector<1x1024xf32>
    tpu.vector_store %arg8[%c15, %c0_52], %46 {strides = array<i32>} : memref<25x1024xf32, #tpu.memory_space<vmem>>, vector<1x1024xf32>,
    %c0_53 = arith.constant 0 : index
    %c0_54 = arith.constant 0 : index
    %c61 = arith.constant 61 : index
    %48 = vector.load %arg1[%c0_53, %c0_54, %c61] : memref<1x1x1152xf32, #tpu.memory_space<vmem>>, vector<1x1x1024xf32>
    %49 = vector.shape_cast %48 : vector<1x1x1024xf32> to vector<1x1024xf32>
    %c16 = arith.constant 16 : index
    %c0_55 = arith.constant 0 : index
    %50 = vector.load %arg8[%c16, %c0_55] : memref<25x1024xf32, #tpu.memory_space<vmem>>, vector<1x1024xf32>
    tpu.vector_store %arg8[%c16, %c0_55], %49 {strides = array<i32>} : memref<25x1024xf32, #tpu.memory_space<vmem>>, vector<1x1024xf32>,
    %c0_56 = arith.constant 0 : index
    %c0_57 = arith.constant 0 : index
    %c62 = arith.constant 62 : index
    %51 = vector.load %arg1[%c0_56, %c0_57, %c62] : memref<1x1x1152xf32, #tpu.memory_space<vmem>>, vector<1x1x1024xf32>
    %52 = vector.shape_cast %51 : vector<1x1x1024xf32> to vector<1x1024xf32>
    %c17 = arith.constant 17 : index
    %c0_58 = arith.constant 0 : index
    %53 = vector.load %arg8[%c17, %c0_58] : memref<25x1024xf32, #tpu.memory_space<vmem>>, vector<1x1024xf32>
    tpu.vector_store %arg8[%c17, %c0_58], %52 {strides = array<i32>} : memref<25x1024xf32, #tpu.memory_space<vmem>>, vector<1x1024xf32>,
    %c0_59 = arith.constant 0 : index
    %c0_60 = arith.constant 0 : index
    %c63 = arith.constant 63 : index
    %54 = vector.load %arg1[%c0_59, %c0_60, %c63] : memref<1x1x1152xf32, #tpu.memory_space<vmem>>, vector<1x1x1024xf32>
    %55 = vector.shape_cast %54 : vector<1x1x1024xf32> to vector<1x1024xf32>
    %c18 = arith.constant 18 : index
    %c0_61 = arith.constant 0 : index
    %56 = vector.load %arg8[%c18, %c0_61] : memref<25x1024xf32, #tpu.memory_space<vmem>>, vector<1x1024xf32>
    tpu.vector_store %arg8[%c18, %c0_61], %55 {strides = array<i32>} : memref<25x1024xf32, #tpu.memory_space<vmem>>, vector<1x1024xf32>,
    %c0_62 = arith.constant 0 : index
    %c0_63 = arith.constant 0 : index
    %c64 = arith.constant 64 : index
    %57 = vector.load %arg1[%c0_62, %c0_63, %c64] : memref<1x1x1152xf32, #tpu.memory_space<vmem>>, vector<1x1x1024xf32>
    %58 = vector.shape_cast %57 : vector<1x1x1024xf32> to vector<1x1024xf32>
    %c19 = arith.constant 19 : index
    %c0_64 = arith.constant 0 : index
    %59 = vector.load %arg8[%c19, %c0_64] : memref<25x1024xf32, #tpu.memory_space<vmem>>, vector<1x1024xf32>
    tpu.vector_store %arg8[%c19, %c0_64], %58 {strides = array<i32>} : memref<25x1024xf32, #tpu.memory_space<vmem>>, vector<1x1024xf32>,
    %c0_65 = arith.constant 0 : index
    %c0_66 = arith.constant 0 : index
    %c80 = arith.constant 80 : index
    %60 = vector.load %arg1[%c0_65, %c0_66, %c80] : memref<1x1x1152xf32, #tpu.memory_space<vmem>>, vector<1x1x1024xf32>
    %61 = vector.shape_cast %60 : vector<1x1x1024xf32> to vector<1x1024xf32>
    %c20_67 = arith.constant 20 : index
    %c0_68 = arith.constant 0 : index
    %62 = vector.load %arg8[%c20_67, %c0_68] : memref<25x1024xf32, #tpu.memory_space<vmem>>, vector<1x1024xf32>
    tpu.vector_store %arg8[%c20_67, %c0_68], %61 {strides = array<i32>} : memref<25x1024xf32, #tpu.memory_space<vmem>>, vector<1x1024xf32>,
    %c0_69 = arith.constant 0 : index
    %c0_70 = arith.constant 0 : index
    %c81 = arith.constant 81 : index
    %63 = vector.load %arg1[%c0_69, %c0_70, %c81] : memref<1x1x1152xf32, #tpu.memory_space<vmem>>, vector<1x1x1024xf32>
    %64 = vector.shape_cast %63 : vector<1x1x1024xf32> to vector<1x1024xf32>
    %c21_71 = arith.constant 21 : index
    %c0_72 = arith.constant 0 : index
    %65 = vector.load %arg8[%c21_71, %c0_72] : memref<25x1024xf32, #tpu.memory_space<vmem>>, vector<1x1024xf32>
    tpu.vector_store %arg8[%c21_71, %c0_72], %64 {strides = array<i32>} : memref<25x1024xf32, #tpu.memory_space<vmem>>, vector<1x1024xf32>,
    %c0_73 = arith.constant 0 : index
    %c0_74 = arith.constant 0 : index
    %c82 = arith.constant 82 : index
    %66 = vector.load %arg1[%c0_73, %c0_74, %c82] : memref<1x1x1152xf32, #tpu.memory_space<vmem>>, vector<1x1x1024xf32>
    %67 = vector.shape_cast %66 : vector<1x1x1024xf32> to vector<1x1024xf32>
    %c22_75 = arith.constant 22 : index
    %c0_76 = arith.constant 0 : index
    %68 = vector.load %arg8[%c22_75, %c0_76] : memref<25x1024xf32, #tpu.memory_space<vmem>>, vector<1x1024xf32>
    tpu.vector_store %arg8[%c22_75, %c0_76], %67 {strides = array<i32>} : memref<25x1024xf32, #tpu.memory_space<vmem>>, vector<1x1024xf32>,
    %c0_77 = arith.constant 0 : index
    %c0_78 = arith.constant 0 : index
    %c83 = arith.constant 83 : index
    %69 = vector.load %arg1[%c0_77, %c0_78, %c83] : memref<1x1x1152xf32, #tpu.memory_space<vmem>>, vector<1x1x1024xf32>
    %70 = vector.shape_cast %69 : vector<1x1x1024xf32> to vector<1x1024xf32>
    %c23_79 = arith.constant 23 : index
    %c0_80 = arith.constant 0 : index
    %71 = vector.load %arg8[%c23_79, %c0_80] : memref<25x1024xf32, #tpu.memory_space<vmem>>, vector<1x1024xf32>
    tpu.vector_store %arg8[%c23_79, %c0_80], %70 {strides = array<i32>} : memref<25x1024xf32, #tpu.memory_space<vmem>>, vector<1x1024xf32>,
    %c0_81 = arith.constant 0 : index
    %c0_82 = arith.constant 0 : index
    %c84 = arith.constant 84 : index
    %72 = vector.load %arg1[%c0_81, %c0_82, %c84] : memref<1x1x1152xf32, #tpu.memory_space<vmem>>, vector<1x1x1024xf32>
    %73 = vector.shape_cast %72 : vector<1x1x1024xf32> to vector<1x1024xf32>
    %c24_83 = arith.constant 24 : index
    %c0_84 = arith.constant 0 : index
    %74 = vector.load %arg8[%c24_83, %c0_84] : memref<25x1024xf32, #tpu.memory_space<vmem>>, vector<1x1024xf32>
    tpu.vector_store %arg8[%c24_83, %c0_84], %73 {strides = array<i32>} : memref<25x1024xf32, #tpu.memory_space<vmem>>, vector<1x1024xf32>,
    %c0_85 = arith.constant 0 : index
    %c0_86 = arith.constant 0 : index
    %75 = vector.load %arg3[%c0_85, %c0_86] : memref<16x25xf32, #tpu.memory_space<vmem>>, vector<16x25xf32>
    %c0_87 = arith.constant 0 : index
    %c0_88 = arith.constant 0 : index
    %76 = vector.load %arg8[%c0_87, %c0_88] : memref<25x1024xf32, #tpu.memory_space<vmem>>, vector<25x1024xf32>
    %cst = arith.constant dense<0.000000e+00> : vector<16x1024xf32>
    %77 = tpu.matmul %75, %76, %cst {dimension_numbers = #tpu.dot_dimension_numbers<[1], [0], [0], [1], [0, 0, 1, 1], [], []>} : vector<16x25xf32>, vector<25x1024xf32>, vector<16x1024xf32> -> vector<16x1024xf32>
    %c0_89 = arith.constant 0 : index
    %c0_90 = arith.constant 0 : index
    %78 = vector.load %arg4[%c0_89, %c0_90] : memref<16x1xf32, #tpu.memory_space<vmem>>, vector<16x1xf32>
    %79 = vector.broadcast %78 : vector<16x1xf32> to vector<16x1024xf32>
    %80 = arith.addf %77, %79 : vector<16x1024xf32>
    %cst_91 = arith.constant 0.000000e+00 : f32
    %81 = vector.broadcast %cst_91 : f32 to vector<16x1024xf32>
    %82 = arith.maximumf %80, %81 : vector<16x1024xf32>
    %c0_92 = arith.constant 0 : index
    %c0_93 = arith.constant 0 : index
    %83 = vector.load %arg2[%c0_92, %c0_93] : memref<1x1024xf32, #tpu.memory_space<vmem>>, vector<1x1024xf32>
    %84 = vector.broadcast %83 : vector<1x1024xf32> to vector<16x1024xf32>
    %85 = arith.mulf %82, %84 : vector<16x1024xf32>
    %cst_94 = arith.constant 0.000000e+00 : f32
    %86 = vector.broadcast %cst_94 : f32 to vector<16x128xf32>
    %c0_95 = arith.constant 0 : index
    %c0_96 = arith.constant 0 : index
    %87 = vector.load %arg9[%c0_95, %c0_96] : memref<16x1280xf32, #tpu.memory_space<vmem>>, vector<16x128xf32>
    tpu.vector_store %arg9[%c0_95, %c0_96], %86 {strides = array<i32>} : memref<16x1280xf32, #tpu.memory_space<vmem>>, vector<16x128xf32>,
    %cst_97 = arith.constant 0.000000e+00 : f32
    %88 = vector.broadcast %cst_97 : f32 to vector<16x128xf32>
    %c0_98 = arith.constant 0 : index
    %c1152 = arith.constant 1152 : index
    %89 = vector.load %arg9[%c0_98, %c1152] : memref<16x1280xf32, #tpu.memory_space<vmem>>, vector<16x128xf32>
    tpu.vector_store %arg9[%c0_98, %c1152], %88 {strides = array<i32>} : memref<16x1280xf32, #tpu.memory_space<vmem>>, vector<16x128xf32>,
    %c0_99 = arith.constant 0 : index
    %c128 = arith.constant 128 : index
    %90 = vector.load %arg9[%c0_99, %c128] : memref<16x1280xf32, #tpu.memory_space<vmem>>, vector<16x1024xf32>
    tpu.vector_store %arg9[%c0_99, %c128], %85 {strides = array<i32>} : memref<16x1280xf32, #tpu.memory_space<vmem>>, vector<16x1024xf32>,
    %cst_100 = arith.constant 0.000000e+00 : f32
    %91 = vector.broadcast %cst_100 : f32 to vector<3x1024xf32>
    %c0_101 = arith.constant 0 : index
    %c86 = arith.constant 86 : index
    %92 = vector.load %arg9[%c0_101, %c86] : memref<16x1280xf32, #tpu.memory_space<vmem>>, vector<16x1024xf32>
    %c0_102 = arith.constant 0 : index
    %c0_103 = arith.constant 0 : index
    %c0_104 = arith.constant 0 : index
    %93 = vector.load %arg5[%c0_102, %c0_103, %c0_104] : memref<25x3x16xf32, #tpu.memory_space<vmem>>, vector<1x3x16xf32>
    %94 = vector.shape_cast %93 : vector<1x3x16xf32> to vector<3x16xf32>
    %cst_105 = arith.constant dense<0.000000e+00> : vector<3x1024xf32>
    %95 = tpu.matmul %94, %92, %cst_105 {dimension_numbers = #tpu.dot_dimension_numbers<[1], [0], [0], [1], [0, 0, 1, 1], [], []>} : vector<3x16xf32>, vector<16x1024xf32>, vector<3x1024xf32> -> vector<3x1024xf32>
    %96 = arith.addf %91, %95 : vector<3x1024xf32>
    %c0_106 = arith.constant 0 : index
    %c87 = arith.constant 87 : index
    %97 = vector.load %arg9[%c0_106, %c87] : memref<16x1280xf32, #tpu.memory_space<vmem>>, vector<16x1024xf32>
    %c1_107 = arith.constant 1 : index
    %c0_108 = arith.constant 0 : index
    %c0_109 = arith.constant 0 : index
    %98 = vector.load %arg5[%c1_107, %c0_108, %c0_109] : memref<25x3x16xf32, #tpu.memory_space<vmem>>, vector<1x3x16xf32>
    %99 = vector.shape_cast %98 : vector<1x3x16xf32> to vector<3x16xf32>
    %cst_110 = arith.constant dense<0.000000e+00> : vector<3x1024xf32>
    %100 = tpu.matmul %99, %97, %cst_110 {dimension_numbers = #tpu.dot_dimension_numbers<[1], [0], [0], [1], [0, 0, 1, 1], [], []>} : vector<3x16xf32>, vector<16x1024xf32>, vector<3x1024xf32> -> vector<3x1024xf32>
    %101 = arith.addf %96, %100 : vector<3x1024xf32>
    %c0_111 = arith.constant 0 : index
    %c88 = arith.constant 88 : index
    %102 = vector.load %arg9[%c0_111, %c88] : memref<16x1280xf32, #tpu.memory_space<vmem>>, vector<16x1024xf32>
    %c2_112 = arith.constant 2 : index
    %c0_113 = arith.constant 0 : index
    %c0_114 = arith.constant 0 : index
    %103 = vector.load %arg5[%c2_112, %c0_113, %c0_114] : memref<25x3x16xf32, #tpu.memory_space<vmem>>, vector<1x3x16xf32>
    %104 = vector.shape_cast %103 : vector<1x3x16xf32> to vector<3x16xf32>
    %cst_115 = arith.constant dense<0.000000e+00> : vector<3x1024xf32>
    %105 = tpu.matmul %104, %102, %cst_115 {dimension_numbers = #tpu.dot_dimension_numbers<[1], [0], [0], [1], [0, 0, 1, 1], [], []>} : vector<3x16xf32>, vector<16x1024xf32>, vector<3x1024xf32> -> vector<3x1024xf32>
    %106 = arith.addf %101, %105 : vector<3x1024xf32>
    %c0_116 = arith.constant 0 : index
    %c89 = arith.constant 89 : index
    %107 = vector.load %arg9[%c0_116, %c89] : memref<16x1280xf32, #tpu.memory_space<vmem>>, vector<16x1024xf32>
    %c3_117 = arith.constant 3 : index
    %c0_118 = arith.constant 0 : index
    %c0_119 = arith.constant 0 : index
    %108 = vector.load %arg5[%c3_117, %c0_118, %c0_119] : memref<25x3x16xf32, #tpu.memory_space<vmem>>, vector<1x3x16xf32>
    %109 = vector.shape_cast %108 : vector<1x3x16xf32> to vector<3x16xf32>
    %cst_120 = arith.constant dense<0.000000e+00> : vector<3x1024xf32>
    %110 = tpu.matmul %109, %107, %cst_120 {dimension_numbers = #tpu.dot_dimension_numbers<[1], [0], [0], [1], [0, 0, 1, 1], [], []>} : vector<3x16xf32>, vector<16x1024xf32>, vector<3x1024xf32> -> vector<3x1024xf32>
    %111 = arith.addf %106, %110 : vector<3x1024xf32>
    %c0_121 = arith.constant 0 : index
    %c90 = arith.constant 90 : index
    %112 = vector.load %arg9[%c0_121, %c90] : memref<16x1280xf32, #tpu.memory_space<vmem>>, vector<16x1024xf32>
    %c4_122 = arith.constant 4 : index
    %c0_123 = arith.constant 0 : index
    %c0_124 = arith.constant 0 : index
    %113 = vector.load %arg5[%c4_122, %c0_123, %c0_124] : memref<25x3x16xf32, #tpu.memory_space<vmem>>, vector<1x3x16xf32>
    %114 = vector.shape_cast %113 : vector<1x3x16xf32> to vector<3x16xf32>
    %cst_125 = arith.constant dense<0.000000e+00> : vector<3x1024xf32>
    %115 = tpu.matmul %114, %112, %cst_125 {dimension_numbers = #tpu.dot_dimension_numbers<[1], [0], [0], [1], [0, 0, 1, 1], [], []>} : vector<3x16xf32>, vector<16x1024xf32>, vector<3x1024xf32> -> vector<3x1024xf32>
    %116 = arith.addf %111, %115 : vector<3x1024xf32>
    %c0_126 = arith.constant 0 : index
    %c106 = arith.constant 106 : index
    %117 = vector.load %arg9[%c0_126, %c106] : memref<16x1280xf32, #tpu.memory_space<vmem>>, vector<16x1024xf32>
    %c5_127 = arith.constant 5 : index
    %c0_128 = arith.constant 0 : index
    %c0_129 = arith.constant 0 : index
    %118 = vector.load %arg5[%c5_127, %c0_128, %c0_129] : memref<25x3x16xf32, #tpu.memory_space<vmem>>, vector<1x3x16xf32>
    %119 = vector.shape_cast %118 : vector<1x3x16xf32> to vector<3x16xf32>
    %cst_130 = arith.constant dense<0.000000e+00> : vector<3x1024xf32>
    %120 = tpu.matmul %119, %117, %cst_130 {dimension_numbers = #tpu.dot_dimension_numbers<[1], [0], [0], [1], [0, 0, 1, 1], [], []>} : vector<3x16xf32>, vector<16x1024xf32>, vector<3x1024xf32> -> vector<3x1024xf32>
    %121 = arith.addf %116, %120 : vector<3x1024xf32>
    %c0_131 = arith.constant 0 : index
    %c107 = arith.constant 107 : index
    %122 = vector.load %arg9[%c0_131, %c107] : memref<16x1280xf32, #tpu.memory_space<vmem>>, vector<16x1024xf32>
    %c6_132 = arith.constant 6 : index
    %c0_133 = arith.constant 0 : index
    %c0_134 = arith.constant 0 : index
    %123 = vector.load %arg5[%c6_132, %c0_133, %c0_134] : memref<25x3x16xf32, #tpu.memory_space<vmem>>, vector<1x3x16xf32>
    %124 = vector.shape_cast %123 : vector<1x3x16xf32> to vector<3x16xf32>
    %cst_135 = arith.constant dense<0.000000e+00> : vector<3x1024xf32>
    %125 = tpu.matmul %124, %122, %cst_135 {dimension_numbers = #tpu.dot_dimension_numbers<[1], [0], [0], [1], [0, 0, 1, 1], [], []>} : vector<3x16xf32>, vector<16x1024xf32>, vector<3x1024xf32> -> vector<3x1024xf32>
    %126 = arith.addf %121, %125 : vector<3x1024xf32>
    %c0_136 = arith.constant 0 : index
    %c108 = arith.constant 108 : index
    %127 = vector.load %arg9[%c0_136, %c108] : memref<16x1280xf32, #tpu.memory_space<vmem>>, vector<16x1024xf32>
    %c7_137 = arith.constant 7 : index
    %c0_138 = arith.constant 0 : index
    %c0_139 = arith.constant 0 : index
    %128 = vector.load %arg5[%c7_137, %c0_138, %c0_139] : memref<25x3x16xf32, #tpu.memory_space<vmem>>, vector<1x3x16xf32>
    %129 = vector.shape_cast %128 : vector<1x3x16xf32> to vector<3x16xf32>
    %cst_140 = arith.constant dense<0.000000e+00> : vector<3x1024xf32>
    %130 = tpu.matmul %129, %127, %cst_140 {dimension_numbers = #tpu.dot_dimension_numbers<[1], [0], [0], [1], [0, 0, 1, 1], [], []>} : vector<3x16xf32>, vector<16x1024xf32>, vector<3x1024xf32> -> vector<3x1024xf32>
    %131 = arith.addf %126, %130 : vector<3x1024xf32>
    %c0_141 = arith.constant 0 : index
    %c109 = arith.constant 109 : index
    %132 = vector.load %arg9[%c0_141, %c109] : memref<16x1280xf32, #tpu.memory_space<vmem>>, vector<16x1024xf32>
    %c8_142 = arith.constant 8 : index
    %c0_143 = arith.constant 0 : index
    %c0_144 = arith.constant 0 : index
    %133 = vector.load %arg5[%c8_142, %c0_143, %c0_144] : memref<25x3x16xf32, #tpu.memory_space<vmem>>, vector<1x3x16xf32>
    %134 = vector.shape_cast %133 : vector<1x3x16xf32> to vector<3x16xf32>
    %cst_145 = arith.constant dense<0.000000e+00> : vector<3x1024xf32>
    %135 = tpu.matmul %134, %132, %cst_145 {dimension_numbers = #tpu.dot_dimension_numbers<[1], [0], [0], [1], [0, 0, 1, 1], [], []>} : vector<3x16xf32>, vector<16x1024xf32>, vector<3x1024xf32> -> vector<3x1024xf32>
    %136 = arith.addf %131, %135 : vector<3x1024xf32>
    %c0_146 = arith.constant 0 : index
    %c110 = arith.constant 110 : index
    %137 = vector.load %arg9[%c0_146, %c110] : memref<16x1280xf32, #tpu.memory_space<vmem>>, vector<16x1024xf32>
    %c9_147 = arith.constant 9 : index
    %c0_148 = arith.constant 0 : index
    %c0_149 = arith.constant 0 : index
    %138 = vector.load %arg5[%c9_147, %c0_148, %c0_149] : memref<25x3x16xf32, #tpu.memory_space<vmem>>, vector<1x3x16xf32>
    %139 = vector.shape_cast %138 : vector<1x3x16xf32> to vector<3x16xf32>
    %cst_150 = arith.constant dense<0.000000e+00> : vector<3x1024xf32>
    %140 = tpu.matmul %139, %137, %cst_150 {dimension_numbers = #tpu.dot_dimension_numbers<[1], [0], [0], [1], [0, 0, 1, 1], [], []>} : vector<3x16xf32>, vector<16x1024xf32>, vector<3x1024xf32> -> vector<3x1024xf32>
    %141 = arith.addf %136, %140 : vector<3x1024xf32>
    %c0_151 = arith.constant 0 : index
    %c126 = arith.constant 126 : index
    %142 = vector.load %arg9[%c0_151, %c126] : memref<16x1280xf32, #tpu.memory_space<vmem>>, vector<16x1024xf32>
    %c10_152 = arith.constant 10 : index
    %c0_153 = arith.constant 0 : index
    %c0_154 = arith.constant 0 : index
    %143 = vector.load %arg5[%c10_152, %c0_153, %c0_154] : memref<25x3x16xf32, #tpu.memory_space<vmem>>, vector<1x3x16xf32>
    %144 = vector.shape_cast %143 : vector<1x3x16xf32> to vector<3x16xf32>
    %cst_155 = arith.constant dense<0.000000e+00> : vector<3x1024xf32>
    %145 = tpu.matmul %144, %142, %cst_155 {dimension_numbers = #tpu.dot_dimension_numbers<[1], [0], [0], [1], [0, 0, 1, 1], [], []>} : vector<3x16xf32>, vector<16x1024xf32>, vector<3x1024xf32> -> vector<3x1024xf32>
    %146 = arith.addf %141, %145 : vector<3x1024xf32>
    %c0_156 = arith.constant 0 : index
    %c127 = arith.constant 127 : index
    %147 = vector.load %arg9[%c0_156, %c127] : memref<16x1280xf32, #tpu.memory_space<vmem>>, vector<16x1024xf32>
    %c11_157 = arith.constant 11 : index
    %c0_158 = arith.constant 0 : index
    %c0_159 = arith.constant 0 : index
    %148 = vector.load %arg5[%c11_157, %c0_158, %c0_159] : memref<25x3x16xf32, #tpu.memory_space<vmem>>, vector<1x3x16xf32>
    %149 = vector.shape_cast %148 : vector<1x3x16xf32> to vector<3x16xf32>
    %cst_160 = arith.constant dense<0.000000e+00> : vector<3x1024xf32>
    %150 = tpu.matmul %149, %147, %cst_160 {dimension_numbers = #tpu.dot_dimension_numbers<[1], [0], [0], [1], [0, 0, 1, 1], [], []>} : vector<3x16xf32>, vector<16x1024xf32>, vector<3x1024xf32> -> vector<3x1024xf32>
    %151 = arith.addf %146, %150 : vector<3x1024xf32>
    %c0_161 = arith.constant 0 : index
    %c128_162 = arith.constant 128 : index
    %152 = vector.load %arg9[%c0_161, %c128_162] : memref<16x1280xf32, #tpu.memory_space<vmem>>, vector<16x1024xf32>
    %c12_163 = arith.constant 12 : index
    %c0_164 = arith.constant 0 : index
    %c0_165 = arith.constant 0 : index
    %153 = vector.load %arg5[%c12_163, %c0_164, %c0_165] : memref<25x3x16xf32, #tpu.memory_space<vmem>>, vector<1x3x16xf32>
    %154 = vector.shape_cast %153 : vector<1x3x16xf32> to vector<3x16xf32>
    %cst_166 = arith.constant dense<0.000000e+00> : vector<3x1024xf32>
    %155 = tpu.matmul %154, %152, %cst_166 {dimension_numbers = #tpu.dot_dimension_numbers<[1], [0], [0], [1], [0, 0, 1, 1], [], []>} : vector<3x16xf32>, vector<16x1024xf32>, vector<3x1024xf32> -> vector<3x1024xf32>
    %156 = arith.addf %151, %155 : vector<3x1024xf32>
    %c0_167 = arith.constant 0 : index
    %c129 = arith.constant 129 : index
    %157 = vector.load %arg9[%c0_167, %c129] : memref<16x1280xf32, #tpu.memory_space<vmem>>, vector<16x1024xf32>
    %c13_168 = arith.constant 13 : index
    %c0_169 = arith.constant 0 : index
    %c0_170 = arith.constant 0 : index
    %158 = vector.load %arg5[%c13_168, %c0_169, %c0_170] : memref<25x3x16xf32, #tpu.memory_space<vmem>>, vector<1x3x16xf32>
    %159 = vector.shape_cast %158 : vector<1x3x16xf32> to vector<3x16xf32>
    %cst_171 = arith.constant dense<0.000000e+00> : vector<3x1024xf32>
    %160 = tpu.matmul %159, %157, %cst_171 {dimension_numbers = #tpu.dot_dimension_numbers<[1], [0], [0], [1], [0, 0, 1, 1], [], []>} : vector<3x16xf32>, vector<16x1024xf32>, vector<3x1024xf32> -> vector<3x1024xf32>
    %161 = arith.addf %156, %160 : vector<3x1024xf32>
    %c0_172 = arith.constant 0 : index
    %c130 = arith.constant 130 : index
    %162 = vector.load %arg9[%c0_172, %c130] : memref<16x1280xf32, #tpu.memory_space<vmem>>, vector<16x1024xf32>
    %c14_173 = arith.constant 14 : index
    %c0_174 = arith.constant 0 : index
    %c0_175 = arith.constant 0 : index
    %163 = vector.load %arg5[%c14_173, %c0_174, %c0_175] : memref<25x3x16xf32, #tpu.memory_space<vmem>>, vector<1x3x16xf32>
    %164 = vector.shape_cast %163 : vector<1x3x16xf32> to vector<3x16xf32>
    %cst_176 = arith.constant dense<0.000000e+00> : vector<3x1024xf32>
    %165 = tpu.matmul %164, %162, %cst_176 {dimension_numbers = #tpu.dot_dimension_numbers<[1], [0], [0], [1], [0, 0, 1, 1], [], []>} : vector<3x16xf32>, vector<16x1024xf32>, vector<3x1024xf32> -> vector<3x1024xf32>
    %166 = arith.addf %161, %165 : vector<3x1024xf32>
    %c0_177 = arith.constant 0 : index
    %c146 = arith.constant 146 : index
    %167 = vector.load %arg9[%c0_177, %c146] : memref<16x1280xf32, #tpu.memory_space<vmem>>, vector<16x1024xf32>
    %c15_178 = arith.constant 15 : index
    %c0_179 = arith.constant 0 : index
    %c0_180 = arith.constant 0 : index
    %168 = vector.load %arg5[%c15_178, %c0_179, %c0_180] : memref<25x3x16xf32, #tpu.memory_space<vmem>>, vector<1x3x16xf32>
    %169 = vector.shape_cast %168 : vector<1x3x16xf32> to vector<3x16xf32>
    %cst_181 = arith.constant dense<0.000000e+00> : vector<3x1024xf32>
    %170 = tpu.matmul %169, %167, %cst_181 {dimension_numbers = #tpu.dot_dimension_numbers<[1], [0], [0], [1], [0, 0, 1, 1], [], []>} : vector<3x16xf32>, vector<16x1024xf32>, vector<3x1024xf32> -> vector<3x1024xf32>
    %171 = arith.addf %166, %170 : vector<3x1024xf32>
    %c0_182 = arith.constant 0 : index
    %c147 = arith.constant 147 : index
    %172 = vector.load %arg9[%c0_182, %c147] : memref<16x1280xf32, #tpu.memory_space<vmem>>, vector<16x1024xf32>
    %c16_183 = arith.constant 16 : index
    %c0_184 = arith.constant 0 : index
    %c0_185 = arith.constant 0 : index
    %173 = vector.load %arg5[%c16_183, %c0_184, %c0_185] : memref<25x3x16xf32, #tpu.memory_space<vmem>>, vector<1x3x16xf32>
    %174 = vector.shape_cast %173 : vector<1x3x16xf32> to vector<3x16xf32>
    %cst_186 = arith.constant dense<0.000000e+00> : vector<3x1024xf32>
    %175 = tpu.matmul %174, %172, %cst_186 {dimension_numbers = #tpu.dot_dimension_numbers<[1], [0], [0], [1], [0, 0, 1, 1], [], []>} : vector<3x16xf32>, vector<16x1024xf32>, vector<3x1024xf32> -> vector<3x1024xf32>
    %176 = arith.addf %171, %175 : vector<3x1024xf32>
    %c0_187 = arith.constant 0 : index
    %c148 = arith.constant 148 : index
    %177 = vector.load %arg9[%c0_187, %c148] : memref<16x1280xf32, #tpu.memory_space<vmem>>, vector<16x1024xf32>
    %c17_188 = arith.constant 17 : index
    %c0_189 = arith.constant 0 : index
    %c0_190 = arith.constant 0 : index
    %178 = vector.load %arg5[%c17_188, %c0_189, %c0_190] : memref<25x3x16xf32, #tpu.memory_space<vmem>>, vector<1x3x16xf32>
    %179 = vector.shape_cast %178 : vector<1x3x16xf32> to vector<3x16xf32>
    %cst_191 = arith.constant dense<0.000000e+00> : vector<3x1024xf32>
    %180 = tpu.matmul %179, %177, %cst_191 {dimension_numbers = #tpu.dot_dimension_numbers<[1], [0], [0], [1], [0, 0, 1, 1], [], []>} : vector<3x16xf32>, vector<16x1024xf32>, vector<3x1024xf32> -> vector<3x1024xf32>
    %181 = arith.addf %176, %180 : vector<3x1024xf32>
    %c0_192 = arith.constant 0 : index
    %c149 = arith.constant 149 : index
    %182 = vector.load %arg9[%c0_192, %c149] : memref<16x1280xf32, #tpu.memory_space<vmem>>, vector<16x1024xf32>
    %c18_193 = arith.constant 18 : index
    %c0_194 = arith.constant 0 : index
    %c0_195 = arith.constant 0 : index
    %183 = vector.load %arg5[%c18_193, %c0_194, %c0_195] : memref<25x3x16xf32, #tpu.memory_space<vmem>>, vector<1x3x16xf32>
    %184 = vector.shape_cast %183 : vector<1x3x16xf32> to vector<3x16xf32>
    %cst_196 = arith.constant dense<0.000000e+00> : vector<3x1024xf32>
    %185 = tpu.matmul %184, %182, %cst_196 {dimension_numbers = #tpu.dot_dimension_numbers<[1], [0], [0], [1], [0, 0, 1, 1], [], []>} : vector<3x16xf32>, vector<16x1024xf32>, vector<3x1024xf32> -> vector<3x1024xf32>
    %186 = arith.addf %181, %185 : vector<3x1024xf32>
    %c0_197 = arith.constant 0 : index
    %c150 = arith.constant 150 : index
    %187 = vector.load %arg9[%c0_197, %c150] : memref<16x1280xf32, #tpu.memory_space<vmem>>, vector<16x1024xf32>
    %c19_198 = arith.constant 19 : index
    %c0_199 = arith.constant 0 : index
    %c0_200 = arith.constant 0 : index
    %188 = vector.load %arg5[%c19_198, %c0_199, %c0_200] : memref<25x3x16xf32, #tpu.memory_space<vmem>>, vector<1x3x16xf32>
    %189 = vector.shape_cast %188 : vector<1x3x16xf32> to vector<3x16xf32>
    %cst_201 = arith.constant dense<0.000000e+00> : vector<3x1024xf32>
    %190 = tpu.matmul %189, %187, %cst_201 {dimension_numbers = #tpu.dot_dimension_numbers<[1], [0], [0], [1], [0, 0, 1, 1], [], []>} : vector<3x16xf32>, vector<16x1024xf32>, vector<3x1024xf32> -> vector<3x1024xf32>
    %191 = arith.addf %186, %190 : vector<3x1024xf32>
    %c0_202 = arith.constant 0 : index
    %c166 = arith.constant 166 : index
    %192 = vector.load %arg9[%c0_202, %c166] : memref<16x1280xf32, #tpu.memory_space<vmem>>, vector<16x1024xf32>
    %c20_203 = arith.constant 20 : index
    %c0_204 = arith.constant 0 : index
    %c0_205 = arith.constant 0 : index
    %193 = vector.load %arg5[%c20_203, %c0_204, %c0_205] : memref<25x3x16xf32, #tpu.memory_space<vmem>>, vector<1x3x16xf32>
    %194 = vector.shape_cast %193 : vector<1x3x16xf32> to vector<3x16xf32>
    %cst_206 = arith.constant dense<0.000000e+00> : vector<3x1024xf32>
    %195 = tpu.matmul %194, %192, %cst_206 {dimension_numbers = #tpu.dot_dimension_numbers<[1], [0], [0], [1], [0, 0, 1, 1], [], []>} : vector<3x16xf32>, vector<16x1024xf32>, vector<3x1024xf32> -> vector<3x1024xf32>
    %196 = arith.addf %191, %195 : vector<3x1024xf32>
    %c0_207 = arith.constant 0 : index
    %c167 = arith.constant 167 : index
    %197 = vector.load %arg9[%c0_207, %c167] : memref<16x1280xf32, #tpu.memory_space<vmem>>, vector<16x1024xf32>
    %c21_208 = arith.constant 21 : index
    %c0_209 = arith.constant 0 : index
    %c0_210 = arith.constant 0 : index
    %198 = vector.load %arg5[%c21_208, %c0_209, %c0_210] : memref<25x3x16xf32, #tpu.memory_space<vmem>>, vector<1x3x16xf32>
    %199 = vector.shape_cast %198 : vector<1x3x16xf32> to vector<3x16xf32>
    %cst_211 = arith.constant dense<0.000000e+00> : vector<3x1024xf32>
    %200 = tpu.matmul %199, %197, %cst_211 {dimension_numbers = #tpu.dot_dimension_numbers<[1], [0], [0], [1], [0, 0, 1, 1], [], []>} : vector<3x16xf32>, vector<16x1024xf32>, vector<3x1024xf32> -> vector<3x1024xf32>
    %201 = arith.addf %196, %200 : vector<3x1024xf32>
    %c0_212 = arith.constant 0 : index
    %c168 = arith.constant 168 : index
    %202 = vector.load %arg9[%c0_212, %c168] : memref<16x1280xf32, #tpu.memory_space<vmem>>, vector<16x1024xf32>
    %c22_213 = arith.constant 22 : index
    %c0_214 = arith.constant 0 : index
    %c0_215 = arith.constant 0 : index
    %203 = vector.load %arg5[%c22_213, %c0_214, %c0_215] : memref<25x3x16xf32, #tpu.memory_space<vmem>>, vector<1x3x16xf32>
    %204 = vector.shape_cast %203 : vector<1x3x16xf32> to vector<3x16xf32>
    %cst_216 = arith.constant dense<0.000000e+00> : vector<3x1024xf32>
    %205 = tpu.matmul %204, %202, %cst_216 {dimension_numbers = #tpu.dot_dimension_numbers<[1], [0], [0], [1], [0, 0, 1, 1], [], []>} : vector<3x16xf32>, vector<16x1024xf32>, vector<3x1024xf32> -> vector<3x1024xf32>
    %206 = arith.addf %201, %205 : vector<3x1024xf32>
    %c0_217 = arith.constant 0 : index
    %c169 = arith.constant 169 : index
    %207 = vector.load %arg9[%c0_217, %c169] : memref<16x1280xf32, #tpu.memory_space<vmem>>, vector<16x1024xf32>
    %c23_218 = arith.constant 23 : index
    %c0_219 = arith.constant 0 : index
    %c0_220 = arith.constant 0 : index
    %208 = vector.load %arg5[%c23_218, %c0_219, %c0_220] : memref<25x3x16xf32, #tpu.memory_space<vmem>>, vector<1x3x16xf32>
    %209 = vector.shape_cast %208 : vector<1x3x16xf32> to vector<3x16xf32>
    %cst_221 = arith.constant dense<0.000000e+00> : vector<3x1024xf32>
    %210 = tpu.matmul %209, %207, %cst_221 {dimension_numbers = #tpu.dot_dimension_numbers<[1], [0], [0], [1], [0, 0, 1, 1], [], []>} : vector<3x16xf32>, vector<16x1024xf32>, vector<3x1024xf32> -> vector<3x1024xf32>
    %211 = arith.addf %206, %210 : vector<3x1024xf32>
    %c0_222 = arith.constant 0 : index
    %c170 = arith.constant 170 : index
    %212 = vector.load %arg9[%c0_222, %c170] : memref<16x1280xf32, #tpu.memory_space<vmem>>, vector<16x1024xf32>
    %c24_223 = arith.constant 24 : index
    %c0_224 = arith.constant 0 : index
    %c0_225 = arith.constant 0 : index
    %213 = vector.load %arg5[%c24_223, %c0_224, %c0_225] : memref<25x3x16xf32, #tpu.memory_space<vmem>>, vector<1x3x16xf32>
    %214 = vector.shape_cast %213 : vector<1x3x16xf32> to vector<3x16xf32>
    %cst_226 = arith.constant dense<0.000000e+00> : vector<3x1024xf32>
    %215 = tpu.matmul %214, %212, %cst_226 {dimension_numbers = #tpu.dot_dimension_numbers<[1], [0], [0], [1], [0, 0, 1, 1], [], []>} : vector<3x16xf32>, vector<16x1024xf32>, vector<3x1024xf32> -> vector<3x1024xf32>
    %216 = arith.addf %211, %215 : vector<3x1024xf32>
    %c0_227 = arith.constant 0 : index
    %c0_228 = arith.constant 0 : index
    %217 = vector.load %arg6[%c0_227, %c0_228] : memref<3x1xf32, #tpu.memory_space<vmem>>, vector<3x1xf32>
    %218 = vector.broadcast %217 : vector<3x1xf32> to vector<3x1024xf32>
    %219 = arith.addf %216, %218 : vector<3x1024xf32>
    %cst_229 = arith.constant -1.000000e+00 : f32
    %cst_230 = arith.constant 1.000000e+00 : f32
    %220 = vector.broadcast %cst_229 : f32 to vector<3x1024xf32>
    %221 = arith.maximumf %220, %219 : vector<3x1024xf32>
    %222 = vector.broadcast %cst_230 : f32 to vector<3x1024xf32>
    %223 = arith.minimumf %222, %221 : vector<3x1024xf32>
    %c0_231 = arith.constant 0 : index
    %c0_232 = arith.constant 0 : index
    %224 = vector.load %arg2[%c0_231, %c0_232] : memref<1x1024xf32, #tpu.memory_space<vmem>>, vector<1x1024xf32>
    %225 = vector.broadcast %224 : vector<1x1024xf32> to vector<3x1024xf32>
    %226 = arith.mulf %223, %225 : vector<3x1024xf32>
    %227 = vector.shape_cast %226 : vector<3x1024xf32> to vector<1x3x1024xf32>
    %c0_233 = arith.constant 0 : index
    %c0_234 = arith.constant 0 : index
    %c0_235 = arith.constant 0 : index
    %228 = vector.load %arg7[%c0_233, %c0_234, %c0_235] : memref<1x3x1024xf32, #tpu.memory_space<vmem>>, vector<1x3x1024xf32>
    tpu.vector_store %arg7[%c0_233, %c0_234, %c0_235], %227 {strides = array<i32>} : memref<1x3x1024xf32, #tpu.memory_space<vmem>>, vector<1x3x1024xf32>,
    return
  }
  func.func @transform_0(%arg0: i32) -> (i32, i32, i32) {
    %c0_i32 = arith.constant 0 : i32
    %c0_i32_0 = arith.constant 0 : i32
    %c0_i32_1 = arith.constant 0 : i32
    return %arg0, %c0_i32, %c0_i32_0 : i32, i32, i32
  }
  func.func @transform_1(%arg0: i32) -> (i32, i32) {
    %c0_i32 = arith.constant 0 : i32
    %c0_i32_0 = arith.constant 0 : i32
    %c0_i32_1 = arith.constant 0 : i32
    return %c0_i32, %c0_i32_0 : i32, i32
  }
  func.func @transform_2(%arg0: i32) -> (i32, i32) {
    %c0_i32 = arith.constant 0 : i32
    %c0_i32_0 = arith.constant 0 : i32
    %c0_i32_1 = arith.constant 0 : i32
    return %c0_i32, %c0_i32_0 : i32, i32
  }
  func.func @transform_3(%arg0: i32) -> (i32, i32) {
    %c0_i32 = arith.constant 0 : i32
    %c0_i32_0 = arith.constant 0 : i32
    %c0_i32_1 = arith.constant 0 : i32
    return %c0_i32, %c0_i32_0 : i32, i32
  }
  func.func @transform_4(%arg0: i32) -> (i32, i32, i32) {
    %c0_i32 = arith.constant 0 : i32
    %c0_i32_0 = arith.constant 0 : i32
    %c0_i32_1 = arith.constant 0 : i32
    %c0_i32_2 = arith.constant 0 : i32
    return %c0_i32, %c0_i32_0, %c0_i32_1 : i32, i32, i32
  }
  func.func @transform_5(%arg0: i32) -> (i32, i32) {
    %c0_i32 = arith.constant 0 : i32
    %c0_i32_0 = arith.constant 0 : i32
    %c0_i32_1 = arith.constant 0 : i32
    return %c0_i32, %c0_i32_0 : i32, i32
  }
  func.func @transform_6(%arg0: i32) -> (i32, i32, i32) {
    %c0_i32 = arith.constant 0 : i32
    %c0_i32_0 = arith.constant 0 : i32
    %c0_i32_1 = arith.constant 0 : i32
    return %arg0, %c0_i32, %c0_i32_0 : i32, i32, i32
  }
}

</mosaic_0001>

<bundles_post_ra>
// kernel: tpu_custom_call.1
= control target key start
LH: loop header
LB: loop body
LE: loop exit
PB: predicated region body
PF: predicated region fallthrough
CT: control target
= control target key end

     0   :  { %s8261_s23 = smov 126   ;;  %s8262_s24 = smov 127   ;;  %vm36_vm0 = vcmask 1046528   ;;  %vm72_vm1 = vcmask 1022976   ;;  %vm55_vm2 = vcmask 1031168   ;;  %vm38_vm3 = vcmask 1039360   ;;  %s11555_s0 = inlined_call_operand.vmem [shape: f32[1,1,1152], index: 0, kind: input, shape index: {}]   ;;  %s11556_s3 = inlined_call_operand.vmem [shape: f32[16,1], index: 3, kind: input, shape index: {}]   ;;  %s11557_s2 = inlined_call_operand.vmem [shape: f32[16,25], index: 2, kind: input, shape index: {}]   ;;  %s11558_s1 = inlined_call_operand.vmem [shape: f32[1,1024], index: 1, kind: input, shape index: {}]   ;;  %s11559_s4 = inlined_call_operand.vmem [shape: f32[25,3,16], index: 4, kind: input, shape index: {}]   ;;  %s11560_s5 = inlined_call_operand.vmem [shape: f32[3,1], index: 5, kind: input, shape index: {}]   ;;  %s11561_s6 = inlined_call_operand.vmem [shape: f32[1,3,1024], index: 6, kind: output, shape index: {}]  }
   0x1   :  { %v8341_v0 = vld [vmem:[%s11555_s0] sm:$0xff]  ;;  %s8263_s25 = smov 125   ;;  %v45_v1 = vld [vmem:[%s11555_s0 + $0x8] sm:$0x1]  ;;  %s8264_s10 = smov 124   ;;  %vm89_vm4 = vcmask 1014784  }
   0x2   :  { %48 = vrot.lane.b32.xlu1 %v8341_v0, %s8261_s23  ;;  %30 = vrot.lane.b32.xlu0 %v8341_v0, %s8262_s24  ;;  %24 = vst [vmem:[#allocation2] ss:$8 sm:$0xf] %v8341_v0  ;;  %v27_v2 = vld [vmem:[%s11555_s0 + $0x8] sm:$0x1]  ;;  %s8265_s11 = smov 108  }
   0x3   :  { %65 = vrot.lane.b32.xlu2 %v8341_v0, %s8263_s25  ;;  %25 = vst [vmem:[#allocation2] ss:$8 sm:$0xf0] %v8341_v0  ;;  %v62_v3 = vld [vmem:[%s11555_s0 + $0x8] sm:$0x1]  ;;  %s8266_s16 = smov 107  }
   0x4   :  { %v79_v4 = vld [vmem:[%s11555_s0 + $0x8] sm:$0x1]  ;;  %s8267_s19 = smov 106   ;;  %s8268_s20 = smov 105   ;;  %vm123_vm5 = vcmask 875520   ;;  %vm106_vm6 = vcmask 883712  }
   0x5   :  { %v96_v5 = vld [vmem:[%s11555_s0 + $0x8] sm:$0x1]  ;;  %s8269_s27 = smov 104   ;;  %s8270_s30 = smov 88   ;;  %vm140_vm7 = vcmask 867328   ;;  %vm174_vm8 = vcmask 850944  }
   0x6   :  { %v113_v6 = vld [vmem:[%s11555_s0 + $0x8] sm:$0x1]  ;;  %s8271_s7 = smov 87   ;;  %s8272_s13 = smov 86   ;;  %vm157_vm9 = vcmask 859136   ;;  %vm191_vm10 = vcmask 719872  }
   0x7   :  { %v130_v7 = vld [vmem:[%s11555_s0 + $0x8] sm:$0x1]  ;;  %s8273_s17 = smov 85   ;;  %s8274_s18 = smov 84   ;;  %vm225_vm11 = vcmask 703488   ;;  %vm208_vm12 = vcmask 711680  }
   0x8   :  { %v147_v8 = vld [vmem:[%s11555_s0 + $0x8] sm:$0x1]  ;;  %s8275_s26 = smov 68   ;;  %s8276_s29 = smov 67   ;;  %vm242_vm13 = vcmask 695296   ;;  %vm276_vm14 = vcmask 556032  }
   0x9   :  { %v164_v9 = vld [vmem:[%s11555_s0 + $0x8] sm:$0x1]  ;;  %s8277_s8 = smov 66   ;;  %s8278_s15 = smov 65   ;;  %vm259_vm15 = vcmask 687104  }
   0xa   :  { %50 = vrot.lane.b32.xlu1 %v45_v1, %s8261_s23  ;;  %32 = vrot.lane.b32.xlu0 %v27_v2, %s8262_s24  ;;  %v181_v10 = vld [vmem:[%s11555_s0 + $0x8] sm:$0x1]  ;;  %s8280_s21 = smov 48   ;;  %s8281_s28 = smov 47  }
   0xb   :  { %67 = vrot.lane.b32.xlu2 %v62_v3, %s8263_s25  ;;  %v198_v11 = vld [vmem:[%s11555_s0 + $0x8] sm:$0x1]  ;;  %s8282_s9 = smov 46   ;;  %s8291_s12 = smov 38  }
   0xc   :  { %v215_v12 = vld [vmem:[%s11555_s0 + $0x8] sm:$0x1]  ;;  %s8292_s14 = smov 22   ;;  %s8297_s25 = smov 2  }
   0xd   :  { %v232_v13 = vld [vmem:[%s11555_s0 + $0x8] sm:$0x1]  ;;  %s8300_s22 = smov 109  }
   0xe   :  { %v249_v14 = vld [vmem:[%s11555_s0 + $0x8] sm:$0x1] }
   0xf   :  { %v266_v15 = vld [vmem:[%s11555_s0 + $0x8] sm:$0x1] }
  0x10   :  { %v283_v16 = vld [vmem:[%s11555_s0 + $0x8] sm:$0x1] }
  0x11   :  { %v300_v17 = vld [vmem:[%s11555_s0 + $0x8] sm:$0x1] }
  0x12   :  { %84 = vrot.lane.b32.xlu1 %v79_v4, %s8264_s10  ;;  %82 = vrot.lane.b32.xlu0 %v8341_v0, %s8264_s10  ;;  %v317_v18 = vld [vmem:[%s11555_s0 + $0x8] sm:$0x1]  ;;  %s8283_s10 = smov 45  }
  0x13   :  { %99 = vrot.lane.b32.xlu2 %v8341_v0, %s8265_s11  ;;  %v334_v20 = vld [vmem:[%s11555_s0 + $0x8] sm:$0x1] }
  0x14   :  { %v351_v24 = vld [vmem:[%s11555_s0 + $0x8] sm:$0x1] }
  0x15   :  { %v368_v26 = vld [vmem:[%s11555_s0 + $0x8] sm:$0x1] }
  0x16   :  { %v385_v29 = vld [vmem:[%s11555_s0 + $0x8] sm:$0x1] }
  0x17   :  { %v402_v33 = vld [vmem:[%s11555_s0 + $0x8] sm:$0x1] }
  0x18   :  { %v419_v34 = vld [vmem:[%s11555_s0 + $0x8] sm:$0x1] }
  0x1a   :  { %116 = vrot.lane.b32.xlu1 %v8341_v0, %s8266_s16  ;;  %101 = vrot.lane.b32.xlu0 %v96_v5, %s8265_s11 }
  0x1b   :  { %118 = vrot.lane.b32.xlu2 %v113_v6, %s8266_s16 }
  0x22   :  { %135 = vrot.lane.b32.xlu1 %v130_v7, %s8267_s19  ;;  %133 = vrot.lane.b32.xlu0 %v8341_v0, %s8267_s19 }
  0x23   :  { %150 = vrot.lane.b32.xlu2 %v8341_v0, %s8268_s20 }
  0x2a   :  { %167 = vrot.lane.b32.xlu1 %v8341_v0, %s8269_s27  ;;  %152 = vrot.lane.b32.xlu0 %v147_v8, %s8268_s20  ;;  %s8279_s20 = smov 64  }
  0x2b   :  { %169 = vrot.lane.b32.xlu2 %v164_v9, %s8269_s27 }
  0x32   :  { %186 = vrot.lane.b32.xlu1 %v181_v10, %s8270_s30  ;;  %184 = vrot.lane.b32.xlu0 %v8341_v0, %s8270_s30 }
  0x33   :  { %201 = vrot.lane.b32.xlu2 %v8341_v0, %s8271_s7 }
  0x3a   :  { %218 = vrot.lane.b32.xlu1 %v8341_v0, %s8272_s13  ;;  %203 = vrot.lane.b32.xlu0 %v198_v11, %s8271_s7 }
  0x3b   :  { %220 = vrot.lane.b32.xlu2 %v215_v12, %s8272_s13 }
  0x42   :  { %237 = vrot.lane.b32.xlu1 %v232_v13, %s8273_s17  ;;  %235 = vrot.lane.b32.xlu0 %v8341_v0, %s8273_s17  ;;  %s8294_s17 = smov 20  }
  0x43   :  { %252 = vrot.lane.b32.xlu2 %v8341_v0, %s8274_s18 }
  0x4a   :  { %269 = vrot.lane.b32.xlu1 %v8341_v0, %s8275_s26  ;;  %254 = vrot.lane.b32.xlu0 %v249_v14, %s8274_s18  ;;  %s8284_s18 = smov 44  }
  0x4b   :  { %271 = vrot.lane.b32.xlu2 %v266_v15, %s8275_s26 }
  0x52   :  { %288 = vrot.lane.b32.xlu1 %v283_v16, %s8276_s29  ;;  %286 = vrot.lane.b32.xlu0 %v8341_v0, %s8276_s29  ;;  %s8287_s29 = smov 42  }
  0x53   :  { %303 = vrot.lane.b32.xlu2 %v8341_v0, %s8277_s8 }
  0x5a   :  { %320 = vrot.lane.b32.xlu1 %v8341_v0, %s8278_s15  ;;  %305 = vrot.lane.b32.xlu0 %v300_v17, %s8277_s8  ;;  %s8288_s8 = smov 41  }
  0x5b   :  { %322 = vrot.lane.b32.xlu2 %v317_v18, %s8278_s15  ;;  %s8293_s15 = smov 21  }
  0x5d   :  { %v66_v19 = vpop.permute.xlu2 %65 }
  0x5e   :  { %v69_v21 = vrot.slane %v66_v19, 1 }
  0x62   :  { %339 = vrot.lane.b32.xlu1 %v334_v20, %s8279_s20  ;;  %337 = vrot.lane.b32.xlu0 %v8341_v0, %s8279_s20  ;;  %s8295_s20 = smov 19  }
  0x63   :  { %354 = vrot.lane.b32.xlu2 %v8341_v0, %s8280_s21 }
  0x65   :  { %v68_v22 = vpop.permute.xlu2 %67 }
  0x66   :  { %v70_v23 = vrot.slane %v68_v22, 1 }
  0x68   :  { %v71_v25 = vsel %vm36_vm0, %v69_v21, %v70_v23 }
  0x69   :  { %v73_v27 = vsel %vm72_vm1, %v66_v19, %v71_v25  ;;  %vm293_vm1 = vcmask 547840  }
  0x6a   :  { %371 = vrot.lane.b32.xlu1 %v8341_v0, %s8281_s28  ;;  %356 = vrot.lane.b32.xlu0 %v351_v24, %s8280_s21  ;;  %76 = vst [vmem:[#allocation2 + $0x3] ss:$8 sm:$0xf] %v73_v27  ;;  %s8296_s21 = smov 18  }
  0x6b   :  { %77 = vst [vmem:[#allocation2 + $0x3] ss:$8 sm:$0xf0] %v73_v27  ;;  %373 = vrot.lane.b32.xlu2 %v368_v26, %s8281_s28 }
  0x6d   :  { %v100_v28 = vpop.permute.xlu2 %99 }
  0x6e   :  { %v103_v56 = vrot.slane %v100_v28, 1 }
  0x72   :  { %390 = vrot.lane.b32.xlu1 %v385_v29, %s8282_s9  ;;  %388 = vrot.lane.b32.xlu0 %v8341_v0, %s8282_s9  ;;  %s8289_s9 = smov 40  }
  0x73   :  { %405 = vrot.lane.b32.xlu2 %v8341_v0, %s8283_s10 }
  0x74   :  { %v49_v30 = vpop.permute.xlu1 %48  ;;  %v31_v31 = vpop.permute.xlu0 %30 }
  0x75   :  { %v119_v32 = vpop.permute.xlu2 %118  ;;  %v52_v37 = vrot.slane %v49_v30, 1  ;;  %v34_v38 = vrot.slane %v31_v31, 1 }
  0x76   :  { %v121_v53 = vrot.slane %v119_v32, 1 }
  0x7a   :  { %422 = vrot.lane.b32.xlu1 %v8341_v0, %s8284_s18  ;;  %407 = vrot.lane.b32.xlu0 %v402_v33, %s8283_s10  ;;  %s8290_s10 = smov 39  }
  0x7b   :  { %424 = vrot.lane.b32.xlu2 %v419_v34, %s8284_s18  ;;  %s8299_s18 = smov 110  }
  0x7c   :  { %v51_v35 = vpop.permute.xlu1 %50  ;;  %v33_v36 = vpop.permute.xlu0 %32 }
  0x7d   :  { %v53_v39 = vrot.slane %v51_v35, 1  ;;  %v35_v40 = vrot.slane %v33_v36, 1  ;;  %v151_v41 = vpop.permute.xlu2 %150 }
  0x7e   :  { %v154_v10 = vrot.slane %v151_v41, 1 }
  0x7f   :  { %v54_v42 = vsel %vm36_vm0, %v52_v37, %v53_v39  ;;  %v37_v43 = vsel %vm36_vm0, %v34_v38, %v35_v40 }
  0x80   :  { %v56_v44 = vsel %vm55_vm2, %v49_v30, %v54_v42  ;;  %v39_v45 = vsel %vm38_vm3, %v31_v31, %v37_v43 }
  0x81   :  { %59 = vst [vmem:[#allocation2 + $0x2] ss:$8 sm:$0xf] %v56_v44 }
  0x82   :  { %60 = vst [vmem:[#allocation2 + $0x2] ss:$8 sm:$0xf0] %v56_v44 }
  0x83   :  { %42 = vst [vmem:[#allocation2 + $0x1] ss:$8 sm:$0xf] %v39_v45 }
  0x84   :  { %43 = vst [vmem:[#allocation2 + $0x1] ss:$8 sm:$0xf0] %v39_v45  ;;  %v85_v46 = vpop.permute.xlu1 %84  ;;  %v83_v47 = vpop.permute.xlu0 %82 }
  0x85   :  { %v87_v48 = vrot.slane %v85_v46, 1  ;;  %v86_v49 = vrot.slane %v83_v47, 1  ;;  %v170_v50 = vpop.permute.xlu2 %169 }
  0x86   :  { %v172_v7 = vrot.slane %v170_v50, 1 }
  0x87   :  { %v88_v51 = vsel %vm36_vm0, %v86_v49, %v87_v48 }
  0x88   :  { %v90_v52 = vsel %vm89_vm4, %v83_v47, %v88_v51  ;;  %vm327_vm4 = vcmask 531456  }
  0x89   :  { %93 = vst [vmem:[#allocation2 + $0x4] ss:$8 sm:$0xf] %v90_v52 }
  0x8a   :  { %94 = vst [vmem:[#allocation2 + $0x4] ss:$8 sm:$0xf0] %v90_v52 }
  0x8c   :  { %v117_v54 = vpop.permute.xlu1 %116  ;;  %v102_v55 = vpop.permute.xlu0 %101 }
  0x8d   :  { %v120_v57 = vrot.slane %v117_v54, 1  ;;  %v104_v58 = vrot.slane %v102_v55, 1  ;;  %v202_v59 = vpop.permute.xlu2 %201 }
  0x8f   :  { %v122_v60 = vsel %vm36_vm0, %v120_v57, %v121_v53  ;;  %v105_v61 = vsel %vm36_vm0, %v103_v56, %v104_v58 }
  0x90   :  { %v124_v62 = vsel %vm123_vm5, %v117_v54, %v122_v60  ;;  %v107_v63 = vsel %vm106_vm6, %v100_v28, %v105_v61  ;;  %v205_v28 = vrot.slane %v202_v59, 1 }
  0x91   :  { %127 = vst [vmem:[#allocation2 + $0x6] ss:$8 sm:$0xf] %v124_v62 }
  0x92   :  { %128 = vst [vmem:[#allocation2 + $0x6] ss:$8 sm:$0xf0] %v124_v62 }
  0x93   :  { %110 = vst [vmem:[#allocation2 + $0x5] ss:$8 sm:$0xf] %v107_v63 }
  0x94   :  { %111 = vst [vmem:[#allocation2 + $0x5] ss:$8 sm:$0xf0] %v107_v63  ;;  %v136_v0 = vpop.permute.xlu1 %135  ;;  %v134_v1 = vpop.permute.xlu0 %133 }
  0x95   :  { %v138_v2 = vrot.slane %v136_v0, 1  ;;  %v137_v3 = vrot.slane %v134_v1, 1  ;;  %v221_v5 = vpop.permute.xlu2 %220 }
  0x96   :  { %v223_v24 = vrot.slane %v221_v5, 1 }
  0x97   :  { %v139_v4 = vsel %vm36_vm0, %v137_v3, %v138_v2 }
  0x98   :  { %v141_v6 = vsel %vm140_vm7, %v134_v1, %v139_v4 }
  0x99   :  { %144 = vst [vmem:[#allocation2 + $0x7] ss:$8 sm:$0xf] %v141_v6 }
  0x9a   :  { %145 = vst [vmem:[#allocation2 + $0x7] ss:$8 sm:$0xf0] %v141_v6 }
  0x9c   :  { %v168_v8 = vpop.permute.xlu1 %167  ;;  %v153_v9 = vpop.permute.xlu0 %152 }
  0x9d   :  { %v171_v11 = vrot.slane %v168_v8, 1  ;;  %v155_v12 = vrot.slane %v153_v9, 1  ;;  %v253_v17 = vpop.permute.xlu2 %252 }
  0x9e   :  { %v256_v45 = vrot.slane %v253_v17, 1 }
  0x9f   :  { %v173_v13 = vsel %vm36_vm0, %v171_v11, %v172_v7  ;;  %v156_v14 = vsel %vm36_vm0, %v154_v10, %v155_v12 }
  0xa0   :  { %v175_v15 = vsel %vm174_vm8, %v168_v8, %v173_v13  ;;  %v158_v16 = vsel %vm157_vm9, %v151_v41, %v156_v14  ;;  %vm310_vm8 = vcmask 539648   ;;  %vm344_vm9 = vcmask 523264  }
  0xa1   :  { %178 = vst [vmem:[#allocation2 + $0x41] ss:$8 sm:$0xf] %v175_v15 }
  0xa2   :  { %179 = vst [vmem:[#allocation2 + $0x41] ss:$8 sm:$0xf0] %v175_v15 }
  0xa3   :  { %161 = vst [vmem:[#allocation2 + $0x40] ss:$8 sm:$0xf] %v158_v16 }
  0xa4   :  { %162 = vst [vmem:[#allocation2 + $0x40] ss:$8 sm:$0xf0] %v158_v16  ;;  %v187_v18 = vpop.permute.xlu1 %186  ;;  %v185_v19 = vpop.permute.xlu0 %184 }
  0xa5   :  { %v189_v20 = vrot.slane %v187_v18, 1  ;;  %v188_v21 = vrot.slane %v185_v19, 1  ;;  %v272_v25 = vpop.permute.xlu2 %271 }
  0xa6   :  { %v274_v42 = vrot.slane %v272_v25, 1 }
  0xa7   :  { %v190_v22 = vsel %vm36_vm0, %v188_v21, %v189_v20 }
  0xa8   :  { %v192_v23 = vsel %vm191_vm10, %v185_v19, %v190_v22 }
  0xa9   :  { %195 = vst [vmem:[#allocation2 + $0x42] ss:$8 sm:$0xf] %v192_v23 }
  0xaa   :  { %196 = vst [vmem:[#allocation2 + $0x42] ss:$8 sm:$0xf0] %v192_v23 }
  0xac   :  { %v219_v26 = vpop.permute.xlu1 %218  ;;  %v204_v27 = vpop.permute.xlu0 %203 }
  0xad   :  { %v222_v29 = vrot.slane %v219_v26, 1  ;;  %v206_v30 = vrot.slane %v204_v27, 1  ;;  %v304_v39 = vpop.permute.xlu2 %303 }
  0xae   :  { %v307_v63 = vrot.slane %v304_v39, 1 }
  0xaf   :  { %v224_v31 = vsel %vm36_vm0, %v222_v29, %v223_v24  ;;  %v207_v32 = vsel %vm36_vm0, %v205_v28, %v206_v30 }
  0xb0   :  { %v226_v33 = vsel %vm225_vm11, %v219_v26, %v224_v31  ;;  %v209_v34 = vsel %vm208_vm12, %v202_v59, %v207_v32 }
  0xb1   :  { %229 = vst [vmem:[#allocation2 + $0x44] ss:$8 sm:$0xf] %v226_v33 }
  0xb2   :  { %230 = vst [vmem:[#allocation2 + $0x44] ss:$8 sm:$0xf0] %v226_v33 }
  0xb3   :  { %212 = vst [vmem:[#allocation2 + $0x43] ss:$8 sm:$0xf] %v209_v34 }
  0xb4   :  { %213 = vst [vmem:[#allocation2 + $0x43] ss:$8 sm:$0xf0] %v209_v34  ;;  %v238_v35 = vpop.permute.xlu1 %237  ;;  %v236_v36 = vpop.permute.xlu0 %235  ;;  %v469_v34 = vld [vmem:[%s11556_s3] sm:$0xff] }
  0xb5   :  { %v240_v37 = vrot.slane %v238_v35, 1  ;;  %v239_v38 = vrot.slane %v236_v36, 1  ;;  %v323_v50 = vpop.permute.xlu2 %322 }
  0xb6   :  { %v325_v60 = vrot.slane %v323_v50, 1 }
  0xb7   :  { %v241_v40 = vsel %vm36_vm0, %v239_v38, %v240_v37  ;;  %v8285_v38 = vmov 0  }
  0xb8   :  { %v243_v41 = vsel %vm242_vm13, %v236_v36, %v241_v40  ;;  %vm378_vm13 = vcmask 384000   ;;  %7179 = vset.pattern.permute.xlu0 %v8285_v38  ;;  %7180 = vset.pattern.permute.xlu1 %v8285_v38 }
  0xb9   :  { %246 = vst [vmem:[#allocation2 + $0x45] ss:$8 sm:$0xf] %v243_v41  ;;  %473 = vperm.xlu0 %7179, %v469_v34  }
  0xba   :  { %247 = vst [vmem:[#allocation2 + $0x45] ss:$8 sm:$0xf0] %v243_v41 }
  0xbc   :  { %v270_v43 = vpop.permute.xlu1 %269  ;;  %v255_v44 = vpop.permute.xlu0 %254 }
  0xbd   :  { %v273_v46 = vrot.slane %v270_v43, 1  ;;  %v257_v47 = vrot.slane %v255_v44, 1  ;;  %v355_v59 = vpop.permute.xlu2 %354 }
  0xbe   :  { %v358_v16 = vrot.slane %v355_v59, 1 }
  0xbf   :  { %v275_v48 = vsel %vm36_vm0, %v273_v46, %v274_v42  ;;  %v258_v49 = vsel %vm36_vm0, %v256_v45, %v257_v47 }
  0xc0   :  { %v277_v51 = vsel %vm276_vm14, %v270_v43, %v275_v48  ;;  %v260_v52 = vsel %vm259_vm15, %v253_v17, %v258_v49  ;;  %vm361_vm14 = vcmask 392192   ;;  %vm395_vm15 = vcmask 375808   ;;  %v470_v43 = vld [vmem:[%s11556_s3 + $0x8] sm:$0xff] }
  0xc1   :  { %280 = vst [vmem:[#allocation2 + $0x47] ss:$8 sm:$0xf] %v277_v51  ;;  %478 = vperm.xlu1 %7180, %v470_v43  }
  0xc2   :  { %281 = vst [vmem:[#allocation2 + $0x47] ss:$8 sm:$0xf0] %v277_v51 }
  0xc3   :  { %263 = vst [vmem:[#allocation2 + $0x46] ss:$8 sm:$0xf] %v260_v52 }
  0xc4   :  { %264 = vst [vmem:[#allocation2 + $0x46] ss:$8 sm:$0xf0] %v260_v52  ;;  %v289_v53 = vpop.permute.xlu1 %288  ;;  %v287_v54 = vpop.permute.xlu0 %286 }
  0xc5   :  { %v291_v55 = vrot.slane %v289_v53, 1  ;;  %v290_v56 = vrot.slane %v287_v54, 1  ;;  %v374_v6 = vpop.permute.xlu2 %373 }
  0xc6   :  { %v376_v13 = vrot.slane %v374_v6, 1 }
  0xc7   :  { %v292_v57 = vsel %vm36_vm0, %v290_v56, %v291_v55  ;;  %v437_v56 = vld [vmem:[#allocation2] sm:$0xff] }
  0xc8   :  { %v294_v58 = vsel %vm293_vm1, %v287_v54, %v292_v57  ;;  %vm429_vm1 = vcmask 359424   ;;  %v438_v57 = vld [vmem:[#allocation2 + $0x8] sm:$0xff] }
  0xc9   :  { %297 = vst [vmem:[#allocation2 + $0x80] ss:$8 sm:$0xf] %v294_v58 }
  0xca   :  { %298 = vst [vmem:[#allocation2 + $0x80] ss:$8 sm:$0xf0] %v294_v58  ;;  %v445_v52 = vld [vmem:[#allocation2 + $0x40] sm:$0xff]  ;;  %v446_v53 = vld [vmem:[#allocation2 + $0x48] sm:$0xff]  ;;  %v447_v54 = vld [vmem:[#allocation2 + $0x50] sm:$0xff] }
  0xcb   :  { %v448_v55 = vld [vmem:[#allocation2 + $0x58] sm:$0xff]  ;;  %v435_v58 = vld [vmem:[%s11557_s2] sm:$0xff]  ;;  %v450_v6 = vld [vmem:[#allocation2 + $0x68] sm:$0xff] }
  0xcc   :  { %v321_v61 = vpop.permute.xlu1 %320  ;;  %v306_v62 = vpop.permute.xlu0 %305 }
  0xcd   :  { %v324_v0 = vrot.slane %v321_v61, 1  ;;  %v308_v1 = vrot.slane %v306_v62, 1  ;;  %v406_v19 = vpop.permute.xlu2 %405 }
  0xce   :  { %v409_v35 = vrot.slane %v406_v19, 1 }
  0xcf   :  { %v326_v2 = vsel %vm36_vm0, %v324_v0, %v325_v60  ;;  %v309_v3 = vsel %vm36_vm0, %v307_v63, %v308_v1  ;;  %v440_v60 = vld [vmem:[#allocation2 + $0x18] sm:$0xff] }
  0xd0   :  { %v328_v4 = vsel %vm327_vm4, %v321_v61, %v326_v2  ;;  %v311_v5 = vsel %vm310_vm8, %v304_v39, %v309_v3  ;;  %vm412_vm4 = vcmask 367616   ;;  %vm488_vm8 = vcmask 1040384  }
  0xd1   :  { %331 = vst [vmem:[#allocation2 + $0x82] ss:$8 sm:$0xf] %v328_v4 }
  0xd2   :  { %332 = vst [vmem:[#allocation2 + $0x82] ss:$8 sm:$0xf0] %v328_v4 }
  0xd3   :  { %314 = vst [vmem:[#allocation2 + $0x81] ss:$8 sm:$0xf] %v311_v5 }
  0xd4   :  { %315 = vst [vmem:[#allocation2 + $0x81] ss:$8 sm:$0xf0] %v311_v5  ;;  %v340_v7 = vpop.permute.xlu1 %339  ;;  %v338_v8 = vpop.permute.xlu0 %337  ;;  %v449_v5 = vld [vmem:[#allocation2 + $0x60] sm:$0xff] }
  0xd5   :  { %v342_v9 = vrot.slane %v340_v7, 1  ;;  %v341_v10 = vrot.slane %v338_v8, 1  ;;  %v425_v30 = vpop.permute.xlu2 %424  ;;  %v451_v7 = vld [vmem:[#allocation2 + $0x70] sm:$0xff] }
  0xd6   :  { %v427_v31 = vrot.slane %v425_v30, 1 }
  0xd7   :  { %v343_v11 = vsel %vm36_vm0, %v341_v10, %v342_v9  ;;  %v441_v9 = vld [vmem:[#allocation2 + $0x20] sm:$0xff]  ;;  %v442_v10 = vld [vmem:[#allocation2 + $0x28] sm:$0xff] }
  0xd8   :  { %v345_v12 = vsel %vm344_vm9, %v338_v8, %v343_v11  ;;  %v452_v8 = vld [vmem:[#allocation2 + $0x78] sm:$0xff]  ;;  %v436_v11 = vld [vmem:[%s11557_s2 + $0x8] sm:$0xff]  ;;  %vm842_vm9 = vcmask 334848  }
  0xd9   :  { %348 = vst [vmem:[#allocation2 + $0x83] ss:$8 sm:$0xf] %v345_v12 }
  0xda   :  { %349 = vst [vmem:[#allocation2 + $0x83] ss:$8 sm:$0xf0] %v345_v12  ;;  %v443_v12 = vld [vmem:[#allocation2 + $0x30] sm:$0xff] }
  0xdc   :  { %v372_v14 = vpop.permute.xlu1 %371  ;;  %v357_v15 = vpop.permute.xlu0 %356 }
  0xdd   :  { %v375_v17 = vrot.slane %v372_v14, 1  ;;  %v359_v18 = vrot.slane %v357_v15, 1  ;;  %v8530_v15 = vld [vmem:[%s11558_s1] sm:$0xff] }
  0xdf   :  { %v377_v20 = vsel %vm36_vm0, %v375_v17, %v376_v13  ;;  %v360_v21 = vsel %vm36_vm0, %v358_v16, %v359_v18  ;;  %v444_v13 = vld [vmem:[#allocation2 + $0x38] sm:$0xff] }
  0xe0   :  { %v379_v22 = vsel %vm378_vm13, %v372_v14, %v377_v20  ;;  %v362_v23 = vsel %vm361_vm14, %v355_v59, %v360_v21  ;;  %v439_v59 = vld [vmem:[#allocation2 + $0x10] sm:$0xff]  ;;  %vm875_vm13 = vcmask 130048   ;;  %vm1075_vm14 = vcmask 343040  }
  0xe1   :  { %382 = vst [vmem:[#allocation2 + $0x85] ss:$8 sm:$0xf] %v379_v22 }
  0xe2   :  { %383 = vst [vmem:[#allocation2 + $0x85] ss:$8 sm:$0xf0] %v379_v22 }
  0xe3   :  { %365 = vst [vmem:[#allocation2 + $0x84] ss:$8 sm:$0xf] %v362_v23 }
  0xe4   :  { %366 = vst [vmem:[#allocation2 + $0x84] ss:$8 sm:$0xf0] %v362_v23  ;;  %v391_v24 = vpop.permute.xlu1 %390  ;;  %v389_v25 = vpop.permute.xlu0 %388 }
  0xe5   :  { %v393_v26 = vrot.slane %v391_v24, 1  ;;  %v392_v27 = vrot.slane %v389_v25, 1  ;;  %v716_v24 = vperm.slane %v8530_v15, 1 }
  0xe7   :  { %v394_v28 = vsel %vm36_vm0, %v392_v27, %v393_v26  ;;  %v11562_v26 = vmov 0.0  }
  0xe8   :  { %v396_v29 = vsel %vm395_vm15, %v389_v25, %v394_v28  ;;  %vm1309_vm15 = vcmask 326656  }
  0xe9   :  { %399 = vst [vmem:[#allocation2 + $0x86] ss:$8 sm:$0xf] %v396_v29 }
  0xea   :  { %400 = vst [vmem:[#allocation2 + $0x86] ss:$8 sm:$0xf0] %v396_v29  ;;  %v717_v29 = vperm.slane %v8530_v15, 2 }
  0xec   :  { %v423_v32 = vpop.permute.xlu1 %422  ;;  %v408_v33 = vpop.permute.xlu0 %407 }
  0xed   :  { %v426_v36 = vrot.slane %v423_v32, 1  ;;  %v410_v37 = vrot.slane %v408_v33, 1 }
  0xef   :  { %v428_v39 = vsel %vm36_vm0, %v426_v36, %v427_v31  ;;  %v411_v40 = vsel %vm36_vm0, %v409_v35, %v410_v37  ;;  %vm481_vm0 = vcmask 203776  }
  0xf0   :  { %v430_v41 = vsel %vm429_vm1, %v423_v32, %v428_v39  ;;  %v413_v42 = vsel %vm412_vm4, %v406_v19, %v411_v40  ;;  %v715_v19 = vperm.slane %v8530_v15, 0  ;;  %vm1551_vm1 = vcmask 318464  }
  0xf1   :  { %433 = vst [vmem:[#allocation2 + $0xc0] ss:$8 sm:$0xf] %v430_v41  ;;  %vm1793_vm4 = vcmask 310272  }
  0xf2   :  { %434 = vst [vmem:[#allocation2 + $0xc0] ss:$8 sm:$0xf0] %v430_v41 }
  0xf3   :  { %416 = vst [vmem:[#allocation2 + $0x87] ss:$8 sm:$0xf] %v413_v42 }
  0xf4   :  { %417 = vst [vmem:[#allocation2 + $0x87] ss:$8 sm:$0xf0] %v413_v42 }
  0xf8   :  { %v461_v44 = vld [vmem:[#allocation2 + $0xc0] sm:$0x1]  ;;  %v462_v45 = vld [vmem:[#allocation2 + $0xc8] sm:$0x1]  ;;  %v463_v46 = vld [vmem:[#allocation2 + $0xd0] sm:$0x1] }
  0xf9   :  { %6881 = vmatpush.msk.msra.mxu0 %vm488_vm8, %v461_v44  ;;  %6884 = vmatpush.msk.msra.mxu1 %vm488_vm8, %v462_v45  ;;  %v464_v47 = vld [vmem:[#allocation2 + $0xd8] sm:$0x1]  ;;  %v465_v61 = vld [vmem:[#allocation2 + $0xe0] sm:$0x1]  ;;  %v466_v62 = vld [vmem:[#allocation2 + $0xe8] sm:$0x1] }
  0xfa   :  { %6887 = vmatpush.msk.msra.mxu2 %vm488_vm8, %v463_v46  ;;  %6890 = vmatpush.msk.msra.mxu3 %vm488_vm8, %v464_v47  ;;  %v453_v48 = vld [vmem:[#allocation2 + $0x80] sm:$0xff]  ;;  %v454_v49 = vld [vmem:[#allocation2 + $0x88] sm:$0xff]  ;;  %v455_v50 = vld [vmem:[#allocation2 + $0x90] sm:$0xff] }
  0xfb   :  { %526 = vmatpush.msra.mxu0 %v453_v48  ;;  %549 = vmatpush.msra.mxu1 %v454_v49  ;;  %v456_v51 = vld [vmem:[#allocation2 + $0x98] sm:$0xff]  ;;  %v467_v63 = vld [vmem:[#allocation2 + $0xf0] sm:$0x1]  ;;  %v457_v1 = vld [vmem:[#allocation2 + $0xa0] sm:$0xff] }
  0xfc   :  { %572 = vmatpush.msra.mxu2 %v455_v50  ;;  %595 = vmatpush.msra.mxu3 %v456_v51  ;;  %v468_v0 = vld [vmem:[#allocation2 + $0xf8] sm:$0x1]  ;;  %v458_v2 = vld [vmem:[#allocation2 + $0xa8] sm:$0xff]  ;;  %v459_v3 = vld [vmem:[#allocation2 + $0xb0] sm:$0xff]  ;;  %v718_v50 = vperm.slane %v8530_v15, 3 }
  0xfd   :  { %527 = vmatpush.msra.mxu0 %v445_v52  ;;  %550 = vmatpush.msra.mxu1 %v446_v53  ;;  %v460_v4 = vld [vmem:[#allocation2 + $0xb8] sm:$0xff] }
  0xfe   :  { %573 = vmatpush.msra.mxu2 %v447_v54  ;;  %596 = vmatpush.msra.mxu3 %v448_v55 }
  0xff   :  { %528 = vmatpush.msra.mxu0 %v437_v56  ;;  %551 = vmatpush.msra.mxu1 %v438_v57 }
 0x100   :  { %574 = vmatpush.msra.mxu2 %v439_v59  ;;  %597 = vmatpush.msra.mxu3 %v440_v60  ;;  %v722_v60 = vperm.slane %v8530_v15, 7 }
 0x101   :  { %6882 = vmatmul.msk.f32.vlgmr.msra.gmra.mxu0 %vm481_vm0, %v435_v58  ;;  %6885 = vmatmul.msk.f32.vlgmr.msra.gmra.mxu1 %vm481_vm0, %v435_v58 }
 0x102   :  { %6888 = vmatmul.msk.f32.vlgmr.msra.gmra.mxu2 %vm481_vm0, %v435_v58  ;;  %6891 = vmatmul.msk.f32.vlgmr.msra.gmra.mxu3 %vm481_vm0, %v435_v58 }
 0x103   :  { %6893 = vmatpush.msk.msrb.mxu0 %vm488_vm8, %v465_v61  ;;  %6896 = vmatpush.msk.msrb.mxu1 %vm488_vm8, %v466_v62 }
 0x104   :  { %6899 = vmatpush.msk.msrb.mxu2 %vm488_vm8, %v467_v63  ;;  %6902 = vmatpush.msk.msrb.mxu3 %vm488_vm8, %v468_v0  ;;  %v719_v63 = vperm.slane %v8530_v15, 4  ;;  %vm2035_vm8 = vcmask 179200  }
 0x105   :  { %618 = vmatpush.msrb.mxu0 %v457_v1  ;;  %641 = vmatpush.msrb.mxu1 %v458_v2 }
 0x106   :  { %664 = vmatpush.msrb.mxu2 %v459_v3  ;;  %687 = vmatpush.msrb.mxu3 %v460_v4 }
 0x107   :  { %619 = vmatpush.msrb.mxu0 %v449_v5  ;;  %642 = vmatpush.msrb.mxu1 %v450_v6 }
 0x108   :  { %665 = vmatpush.msrb.mxu2 %v451_v7  ;;  %688 = vmatpush.msrb.mxu3 %v452_v8 }
 0x109   :  { %620 = vmatpush.msrb.mxu0 %v441_v9  ;;  %643 = vmatpush.msrb.mxu1 %v442_v10 }
 0x10a   :  { %666 = vmatpush.msrb.mxu2 %v443_v12  ;;  %689 = vmatpush.msrb.mxu3 %v444_v13  ;;  %v720_v13 = vperm.slane %v8530_v15, 5 }
 0x10b   :  { %6883 = vmatmul.msk.f32.gmra.mxu0 %vm481_vm0, %v436_v11  ;;  %6886 = vmatmul.msk.f32.gmra.mxu1 %vm481_vm0, %v436_v11 }
 0x10c   :  { %6889 = vmatmul.msk.f32.gmra.mxu2 %vm481_vm0, %v436_v11  ;;  %6892 = vmatmul.msk.f32.gmra.mxu3 %vm481_vm0, %v436_v11 }
 0x113   :  { %6894 = vmatmul.msk.f32.vlgmr.msrb.gmra.mxu0 %vm481_vm0, %v435_v58  ;;  %6897 = vmatmul.msk.f32.vlgmr.msrb.gmra.mxu1 %vm481_vm0, %v435_v58 }
 0x114   :  { %6900 = vmatmul.msk.f32.vlgmr.msrb.gmra.mxu2 %vm481_vm0, %v435_v58  ;;  %6903 = vmatmul.msk.f32.vlgmr.msrb.gmra.mxu3 %vm481_vm0, %v435_v58 }
 0x11b   :  { %6898 = vmatmul.msk.f32.gmra.mxu1 %vm481_vm0, %v436_v11  ;;  %6895 = vmatmul.msk.f32.gmra.mxu0 %vm481_vm0, %v436_v11 }
 0x11c   :  { %6901 = vmatmul.msk.f32.gmra.mxu2 %vm481_vm0, %v436_v11  ;;  %6904 = vmatmul.msk.f32.gmra.mxu3 %vm481_vm0, %v436_v11  ;;  %v721_v11 = vperm.slane %v8530_v15, 6  ;;  %vm2277_vm0 = vcmask 171008  }
 0x12b   :  { %v8525_v14 = vpop.permute.xlu0 %473 }
 0x133   :  { %v8544_v30 = vpop.permute.xlu1 %478 }
 0x17e   :  { %v530_v16 = vpop.f32.mrf.mxu0  ;;  %v553_v17 = vpop.f32.mrf.mxu1 }
 0x17f   :  { %v531_v18 = vadd.f32 %v530_v16, %v8525_v14  ;;  %v554_v20 = vadd.f32 %v553_v17, %v8525_v14 }
 0x181   :  { %v697_v21 = vmax.f32 %v531_v18, 0.0  ;;  %v698_v23 = vmax.f32 %v554_v20, 0.0 }
 0x183   :  { %v8535_v22 = vmul.f32 %v715_v19, %v697_v21  ;;  %v8550_v31 = vmul.f32 %v716_v24, %v698_v23 }
 0x185   :  { %11643 = vst [vmem:[#allocation4_spill] sm:$0xff] %v8535_v22  ;;  %v576_v25 = vpop.f32.mrf.mxu2  ;;  %v8540_v27 = vpack.i.bf16 %v8535_v22, %v11562_v26  ;;  %v599_v44 = vpop.f32.mrf.mxu3 }
 0x186   :  { %v577_v28 = vadd.f32 %v576_v25, %v8525_v14  ;;  %11645 = vst [vmem:[#allocation6_spill] sm:$0xff] %v8550_v31  ;;  %v600_v61 = vadd.f32 %v599_v44, %v8525_v14 }
 0x187   :  { %11644 = vst [vmem:[#allocation5_spill] sm:$0xff] %v8540_v27  ;;  %7187 = vrot.lane.b32.xlu0 %v8540_v27, %s8287_s29  ;;  %7182 = vrot.lane.b32.xlu2 %v8540_v27, %s8288_s8 }
 0x188   :  { %v699_v32 = vmax.f32 %v577_v28, 0.0  ;;  %v533_v33 = vpop.f32.mrf.mxu0  ;;  %v556_v34 = vpop.f32.mrf.mxu1  ;;  %v700_v1 = vmax.f32 %v600_v61, 0.0 }
 0x189   :  { %v534_v35 = vadd.f32 %v533_v33, %v8544_v30  ;;  %v557_v36 = vadd.f32 %v556_v34, %v8544_v30 }
 0x18a   :  { %v8554_v37 = vmul.f32 %v717_v29, %v699_v32  ;;  %v8635_v4 = vmul.f32 %v718_v50, %v700_v1 }
 0x18b   :  { %v705_v38 = vmax.f32 %v534_v35, 0.0  ;;  %v706_v39 = vmax.f32 %v557_v36, 0.0 }
 0x18c   :  { %11646 = vst [vmem:[#allocation7_spill] sm:$0xff] %v8554_v37  ;;  %v8558_v40 = vpack.i.bf16 %v8554_v37, %v8550_v31 }
 0x18d   :  { %v8560_v41 = vmul.f32 %v715_v19, %v705_v38  ;;  %v8562_v42 = vmul.f32 %v716_v24, %v706_v39  ;;  %11654 = vst [vmem:[#allocation15_spill] sm:$0xff] %v8635_v4 }
 0x18e   :  { %7217 = vrot.lane.b32.xlu1 %v8558_v40, %s8288_s8 }
 0x18f   :  { %11647 = vst [vmem:[#allocation8_spill] sm:$0xff] %v8560_v41  ;;  %7192 = vrot.lane.b32.xlu0 %v8540_v27, %s8289_s9  ;;  %v8570_v43 = vpack.i.bf16 %v8562_v42, %v8560_v41  ;;  %v579_v45 = vpop.f32.mrf.mxu2  ;;  %v602_v46 = vpop.f32.mrf.mxu3 }
 0x190   :  { %11648 = vst [vmem:[#allocation9_spill] sm:$0xff] %v8562_v42  ;;  %v603_v47 = vadd.f32 %v602_v46, %v8544_v30  ;;  %v580_v48 = vadd.f32 %v579_v45, %v8544_v30  ;;  %v622_v56 = vpop.f32.mrf.mxu0  ;;  %v645_v7 = vpop.f32.mrf.mxu1 }
 0x191   :  { %7252 = vrot.lane.b32.xlu2 %v8570_v43, %s8288_s8  ;;  %v623_v58 = vadd.f32 %v622_v56, %v8525_v14  ;;  %v646_v9 = vadd.f32 %v645_v7, %v8525_v14 }
 0x192   :  { %v708_v49 = vmax.f32 %v603_v47, 0.0  ;;  %v707_v51 = vmax.f32 %v580_v48, 0.0 }
 0x193   :  { %v701_v62 = vmax.f32 %v623_v58, 0.0  ;;  %v702_v12 = vmax.f32 %v646_v9, 0.0 }
 0x194   :  { %v8599_v52 = vmul.f32 %v718_v50, %v708_v49  ;;  %v8603_v53 = vmul.f32 %v717_v29, %v707_v51 }
 0x195   :  { %v8630_v2 = vmul.f32 %v719_v63, %v701_v62 }
 0x196   :  { %7222 = vrot.lane.b32.xlu1 %v8558_v40, %s8287_s29  ;;  %11649 = vst [vmem:[#allocation10_spill] sm:$0xff] %v8599_v52  ;;  %v8607_v55 = vpack.i.bf16 %v8599_v52, %v8603_v53 }
 0x197   :  { %7197 = vrot.lane.b32.xlu0 %v8540_v27, %s8290_s10  ;;  %11650 = vst [vmem:[#allocation11_spill] sm:$0xff] %v8603_v53  ;;  %v691_v54 = vpop.f32.mrf.mxu3  ;;  %v8643_v5 = vpack.i.bf16 %v8630_v2, %v8635_v4  ;;  %v668_v6 = vpop.f32.mrf.mxu2 }
 0x198   :  { %v692_v57 = vadd.f32 %v691_v54, %v8525_v14  ;;  %11652 = vst [vmem:[#allocation13_spill] sm:$0xff] %v8630_v2  ;;  %v669_v8 = vadd.f32 %v668_v6, %v8525_v14  ;;  %v8673_v14 = vmul.f32 %v720_v13, %v702_v12  ;;  %v625_v23 = vpop.f32.mrf.mxu0  ;;  %v648_v25 = vpop.f32.mrf.mxu1 }
 0x199   :  { %7257 = vrot.lane.b32.xlu2 %v8570_v43, %s8287_s29  ;;  %11655 = vst [vmem:[#allocation16_spill] sm:$0xff] %v8643_v5  ;;  %v626_v28 = vadd.f32 %v625_v23, %v8544_v30  ;;  %v649_v32 = vadd.f32 %v648_v25, %v8544_v30 }
 0x19a   :  { %v704_v59 = vmax.f32 %v692_v57, 0.0  ;;  %v703_v10 = vmax.f32 %v669_v8, 0.0  ;;  %11657 = vst [vmem:[#allocation18_spill] sm:$0xff] %v8673_v14 }
 0x19b   :  { %v709_v36 = vmax.f32 %v626_v28, 0.0  ;;  %v710_v39 = vmax.f32 %v649_v32, 0.0 }
 0x19c   :  { %v8626_v0 = vmul.f32 %v722_v60, %v704_v59  ;;  %v8667_v16 = vmul.f32 %v721_v11, %v703_v10 }
 0x19d   :  { %v8710_v45 = vmul.f32 %v719_v63, %v709_v36  ;;  %v8716_v48 = vmul.f32 %v720_v13, %v710_v39 }
 0x19e   :  { %7227 = vrot.lane.b32.xlu1 %v8558_v40, %s8289_s9  ;;  %11651 = vst [vmem:[#allocation12_spill] sm:$0xff] %v8626_v0  ;;  %v8633_v3 = vpack.i.bf16 0.0, %v8626_v0  ;;  %v8677_v18 = vpack.i.bf16 %v8667_v16, %v8673_v14 }
 0x19f   :  { %7202 = vrot.lane.b32.xlu0 %v8540_v27, %s8291_s12  ;;  %11656 = vst [vmem:[#allocation17_spill] sm:$0xff] %v8667_v16  ;;  %v694_v29 = vpop.f32.mrf.mxu3  ;;  %v671_v33 = vpop.f32.mrf.mxu2  ;;  %v8726_v50 = vpack.i.bf16 %v8716_v48, %v8710_v45 }
 0x1a0   :  { %11653 = vst [vmem:[#allocation14_spill] sm:$0xff] %v8633_v3  ;;  %v695_v34 = vadd.f32 %v694_v29, %v8544_v30  ;;  %v672_v38 = vadd.f32 %v671_v33, %v8544_v30 }
 0x1a1   :  { %7262 = vrot.lane.b32.xlu2 %v8570_v43, %s8289_s9  ;;  %11658 = vst [vmem:[#allocation19_spill] sm:$0xff] %v8710_v45 }
 0x1a2   :  { %v712_v44 = vmax.f32 %v695_v34, 0.0  ;;  %v711_v46 = vmax.f32 %v672_v38, 0.0  ;;  %11659 = vst [vmem:[#allocation20_spill] sm:$0xff] %v8716_v48 }
 0x1a4   :  { %v8720_v30 = vmul.f32 %v722_v60, %v712_v44  ;;  %v8728_v51 = vmul.f32 %v721_v11, %v711_v46 }
 0x1a6   :  { %7232 = vrot.lane.b32.xlu1 %v8558_v40, %s8290_s10  ;;  %11660 = vst [vmem:[#allocation21_spill] sm:$0xff] %v8720_v30  ;;  %v8736_v54 = vpack.i.bf16 %v8720_v30, %v8728_v51 }
 0x1a7   :  { %7207 = vrot.lane.b32.xlu0 %v8540_v27, %s8292_s14  ;;  %11661 = vst [vmem:[#allocation22_spill] sm:$0xff] %v8728_v51 }
 0x1a9   :  { %7267 = vrot.lane.b32.xlu2 %v8570_v43, %s8290_s10 }
 0x1ae   :  { %7237 = vrot.lane.b32.xlu1 %v8558_v40, %s8291_s12 }
 0x1af   :  { %7212 = vrot.lane.b32.xlu0 %v8540_v27, %s8293_s15 }
 0x1b1   :  { %7272 = vrot.lane.b32.xlu2 %v8570_v43, %s8291_s12 }
 0x1b6   :  { %7242 = vrot.lane.b32.xlu1 %v8558_v40, %s8292_s14 }
 0x1b7   :  { %7287 = vrot.lane.b32.xlu0 %v8607_v55, %s8288_s8 }
 0x1b9   :  { %7277 = vrot.lane.b32.xlu2 %v8570_v43, %s8292_s14 }
 0x1be   :  { %7247 = vrot.lane.b32.xlu1 %v8558_v40, %s8293_s15 }
 0x1bf   :  { %7292 = vrot.lane.b32.xlu0 %v8607_v55, %s8287_s29 }
 0x1c1   :  { %7282 = vrot.lane.b32.xlu2 %v8570_v43, %s8293_s15 }
 0x1c6   :  { %7357 = vrot.lane.b32.xlu1 %v8633_v3, %s8288_s8 }
 0x1c7   :  { %7297 = vrot.lane.b32.xlu0 %v8607_v55, %s8289_s9 }
 0x1c9   :  { %7317 = vrot.lane.b32.xlu2 %v8643_v5, %s8288_s8 }
 0x1ce   :  { %7367 = vrot.lane.b32.xlu1 %v8633_v3, %s8287_s29 }
 0x1cf   :  { %7302 = vrot.lane.b32.xlu0 %v8607_v55, %s8290_s10 }
 0x1d1   :  { %7322 = vrot.lane.b32.xlu2 %v8643_v5, %s8287_s29 }
 0x1d6   :  { %7377 = vrot.lane.b32.xlu1 %v8633_v3, %s8289_s9 }
 0x1d7   :  { %7307 = vrot.lane.b32.xlu0 %v8607_v55, %s8291_s12 }
 0x1d9   :  { %7327 = vrot.lane.b32.xlu2 %v8643_v5, %s8289_s9 }
 0x1de   :  { %7387 = vrot.lane.b32.xlu1 %v8633_v3, %s8290_s10 }
 0x1df   :  { %7312 = vrot.lane.b32.xlu0 %v8607_v55, %s8292_s14 }
 0x1e1   :  { %7332 = vrot.lane.b32.xlu2 %v8643_v5, %s8290_s10  ;;  %v8671_v17 = vpop.permute.xlu2 %7182 }
 0x1e2   :  { %v7185_v56 = vunpack.i.h.bf16 %v8671_v17 }
 0x1e6   :  { %7397 = vrot.lane.b32.xlu1 %v8633_v3, %s8291_s12 }
 0x1e7   :  { %7352 = vrot.lane.b32.xlu0 %v8677_v18, %s8288_s8 }
 0x1e9   :  { %7337 = vrot.lane.b32.xlu2 %v8643_v5, %s8291_s12 }
 0x1eb   :  { %v8685_v19 = vpop.permute.xlu2 %7252 }
 0x1ec   :  { %v7255_v20 = vunpack.i.h.bf16 %v8685_v19  ;;  %v7254_v21 = vunpack.i.l.bf16 %v8685_v19 }
 0x1ee   :  { %7407 = vrot.lane.b32.xlu1 %v8633_v3, %s8292_s14  ;;  %v852_v24 = vsel %vm842_vm9, %v7254_v21, %v7255_v20 }
 0x1ef   :  { %7362 = vrot.lane.b32.xlu0 %v8677_v18, %s8287_s29  ;;  %913 = vmatpush.msra.mxu1 %v852_v24 }
 0x1f1   :  { %7342 = vrot.lane.b32.xlu2 %v8643_v5, %s8292_s14 }
 0x1f3   :  { %v8703_v35 = vpop.permute.xlu2 %7257 }
 0x1f4   :  { %v7259_v31 = vunpack.i.l.bf16 %v8703_v35 }
 0x1f6   :  { %7422 = vrot.lane.b32.xlu1 %v8633_v3, %s8293_s15 }
 0x1f7   :  { %7372 = vrot.lane.b32.xlu0 %v8677_v18, %s8289_s9 }
 0x1f9   :  { %7347 = vrot.lane.b32.xlu2 %v8643_v5, %s8293_s15  ;;  %v8714_v47 = vpop.permute.xlu0 %7187 }
 0x1fb   :  { %v8722_v49 = vpop.permute.xlu2 %7262 }
 0x1fe   :  { %7427 = vrot.lane.b32.xlu1 %v8726_v50, %s8288_s8 }
 0x1ff   :  { %7382 = vrot.lane.b32.xlu0 %v8677_v18, %s8290_s10 }
 0x200   :  { %v7218_v15 = vpop.permute.xlu1 %7217 }
 0x201   :  { %v7219_v57 = vunpack.i.l.bf16 %v7218_v15  ;;  %7472 = vrot.lane.b32.xlu2 %v8736_v54, %s8288_s8  ;;  %v8741_v58 = vpop.permute.xlu0 %7192  ;;  %v7220_v25 = vunpack.i.h.bf16 %v7218_v15 }
 0x203   :  { %v8743_v59 = vpop.permute.xlu2 %7267  ;;  %v844_v60 = vsel %vm842_vm9, %v7185_v56, %v7219_v57  ;;  %v845_v38 = vsel %vm842_vm9, %v7219_v57, %v7220_v25  ;;  %v7184_v57 = vunpack.i.l.bf16 %v8671_v17 }
 0x204   :  { %914 = vmatpush.msra.mxu1 %v844_v60 }
 0x206   :  { %7432 = vrot.lane.b32.xlu1 %v8726_v50, %s8287_s29 }
 0x207   :  { %7392 = vrot.lane.b32.xlu0 %v8677_v18, %s8291_s12 }
 0x208   :  { %v8752_v61 = vpop.permute.xlu1 %7222 }
 0x209   :  { %7477 = vrot.lane.b32.xlu2 %v8736_v54, %s8287_s29  ;;  %v8756_v62 = vpop.permute.xlu0 %7197  ;;  %v11673_v2 = vunpack.i.h.bf16 %v8752_v61  ;;  %s8298_s29 = smov 1  }
 0x20b   :  { %v8758_v63 = vpop.permute.xlu2 %7272 }
 0x20e   :  { %7437 = vrot.lane.b32.xlu1 %v8726_v50, %s8289_s9 }
 0x20f   :  { %7402 = vrot.lane.b32.xlu0 %v8677_v18, %s8292_s14 }
 0x210   :  { %v8764_v1 = vpop.permute.xlu1 %7227 }
 0x211   :  { %7482 = vrot.lane.b32.xlu2 %v8736_v54, %s8289_s9  ;;  %v8768_v6 = vpop.permute.xlu0 %7202  ;;  %s8301_s9 = smov 90  }
 0x213   :  { %v8770_v7 = vpop.permute.xlu2 %7277 }
 0x214   :  { %11662 = vst [vmem:[#allocation23_spill] sm:$0xff] %v8770_v7 }
 0x216   :  { %7442 = vrot.lane.b32.xlu1 %v8726_v50, %s8290_s10 }
 0x217   :  { %7412 = vrot.lane.b32.xlu0 %v8677_v18, %s8293_s15 }
 0x218   :  { %v8776_v8 = vpop.permute.xlu1 %7232 }
 0x219   :  { %7487 = vrot.lane.b32.xlu2 %v8736_v54, %s8290_s10  ;;  %v8780_v9 = vpop.permute.xlu0 %7207 }
 0x21a   :  { %11663 = vst [vmem:[#allocation24_spill] sm:$0xff] %v8780_v9 }
 0x21b   :  { %v8782_v10 = vpop.permute.xlu2 %7282 }
 0x21c   :  { %11664 = vst [vmem:[#allocation25_spill] sm:$0xff] %v8782_v10 }
 0x21e   :  { %7447 = vrot.lane.b32.xlu1 %v8726_v50, %s8291_s12 }
 0x21f   :  { %7417 = vrot.lane.b32.xlu0 %v8607_v55, %s8293_s15 }
 0x220   :  { %v8788_v11 = vpop.permute.xlu1 %7237 }
 0x221   :  { %7492 = vrot.lane.b32.xlu2 %v8736_v54, %s8291_s12  ;;  %v8792_v12 = vpop.permute.xlu0 %7212  ;;  %s8302_s12 = smov 89  }
 0x222   :  { %11665 = vst [vmem:[#allocation26_spill] sm:$0xff] %v8792_v12 }
 0x223   :  { %v8794_v13 = vpop.permute.xlu2 %7317 }
 0x224   :  { %v11564_v32 = vunpack.i.l.bf16 %v8794_v13 }
 0x226   :  { %7452 = vrot.lane.b32.xlu1 %v8726_v50, %s8292_s14  ;;  %v846_v39 = vsel %vm842_vm9, %v7220_v25, %v11564_v32 }
 0x227   :  { %7462 = vrot.lane.b32.xlu0 %v8540_v27, %s8294_s17 }
 0x228   :  { %v8800_v23 = vpop.permute.xlu1 %7242 }
 0x229   :  { %7497 = vrot.lane.b32.xlu2 %v8736_v54, %s8292_s14  ;;  %v8804_v24 = vpop.permute.xlu0 %7287 }
 0x22a   :  { %v11565_v28 = vunpack.i.h.bf16 %v8804_v24  ;;  %v7289_v29 = vunpack.i.l.bf16 %v8804_v24 }
 0x22b   :  { %v8809_v33 = vpop.permute.xlu2 %7322 }
 0x22c   :  { %v853_v34 = vsel %vm842_vm9, %v7255_v20, %v7289_v29  ;;  %v854_v36 = vsel %vm842_vm9, %v7289_v29, %v11565_v28  ;;  %v8845_v29 = vld [vmem:[%s11559_s4 + $0x4] sm:$0x7] }
 0x22d   :  { %933 = vmatpush.msra.mxu2 %v853_v34  ;;  %953 = vmatpush.msra.mxu3 %v854_v36 }
 0x22e   :  { %7457 = vrot.lane.b32.xlu1 %v8726_v50, %s8293_s15  ;;  %6907 = vmatmul.msk.f32.vlgmr.msra.gmra.mxu1 %vm875_vm13, %v8845_v29 }
 0x22f   :  { %7512 = vrot.lane.b32.xlu0 %v8677_v18, %s8294_s17  ;;  %934 = vmatpush.msra.mxu2 %v845_v38  ;;  %v843_v38 = vsel %vm842_vm9, %v7184_v57, %v7185_v56 }
 0x230   :  { %v8825_v20 = vpop.permute.xlu1 %7247  ;;  %954 = vmatpush.msra.mxu3 %v846_v39  ;;  %6908 = vmatmul.msk.f32.vlgmr.msra.gmra.mxu2 %vm875_vm13, %v8845_v29 }
 0x231   :  { %11666 = vst [vmem:[#allocation27_spill] sm:$0xff] %v8825_v20  ;;  %7502 = vrot.lane.b32.xlu2 %v8736_v54, %s8293_s15  ;;  %v8829_v44 = vpop.permute.xlu0 %7292  ;;  %6909 = vmatmul.msk.f32.vlgmr.msra.gmra.mxu3 %vm875_vm13, %v8845_v29 }
 0x233   :  { %v8831_v46 = vpop.permute.xlu2 %7327 }
 0x236   :  { %7467 = vrot.lane.b32.xlu1 %v8558_v40, %s8294_s17 }
 0x237   :  { %7527 = vrot.lane.b32.xlu0 %v8607_v55, %s8294_s17 }
 0x238   :  { %v7358_v15 = vpop.permute.xlu1 %7357 }
 0x239   :  { %v7360_v60 = vunpack.i.h.bf16 %v7358_v15  ;;  %7507 = vrot.lane.b32.xlu2 %v8643_v5, %s8294_s17  ;;  %v8840_v25 = vpop.permute.xlu0 %7297  ;;  %v7359_v53 = vunpack.i.l.bf16 %v7358_v15 }
 0x23a   :  { %v11593_v52 = vunpack.i.h.bf16 %v8840_v25 }
 0x23b   :  { %v8851_v34 = vpop.permute.xlu2 %7332  ;;  %v851_v36 = vsel %vm842_vm9, %v7360_v60, %v7254_v21 }
 0x23c   :  { %893 = vmatpush.msra.mxu0 %v851_v36 }
 0x23e   :  { %7517 = vrot.lane.b32.xlu1 %v8633_v3, %s8294_s17  ;;  %894 = vmatpush.msra.mxu0 %v843_v38 }
 0x23f   :  { %7542 = vrot.lane.b32.xlu0 %v8540_v27, %s8295_s20  ;;  %6906 = vmatmul.msk.f32.vlgmr.msra.gmra.mxu0 %vm875_vm13, %v8845_v29 }
 0x240   :  { %v8867_v19 = vpop.permute.xlu1 %7367 }
 0x241   :  { %7522 = vrot.lane.b32.xlu2 %v8570_v43, %s8294_s17  ;;  %v8871_v21 = vpop.permute.xlu0 %7302  ;;  %v7370_v22 = vunpack.i.h.bf16 %v8867_v19 }
 0x243   :  { %v8873_v17 = vpop.permute.xlu2 %7337 }
 0x246   :  { %7532 = vrot.lane.b32.xlu1 %v8726_v50, %s8294_s17 }
 0x247   :  { %7557 = vrot.lane.b32.xlu0 %v8677_v18, %s8295_s20 }
 0x248   :  { %v8879_v56 = vpop.permute.xlu1 %7377 }
 0x249   :  { %7537 = vrot.lane.b32.xlu2 %v8736_v54, %s8294_s17  ;;  %v8883_v39 = vpop.permute.xlu0 %7307 }
 0x24b   :  { %v8885_v57 = vpop.permute.xlu2 %7342 }
 0x24e   :  { %7547 = vrot.lane.b32.xlu1 %v8558_v40, %s8295_s20 }
 0x24f   :  { %7572 = vrot.lane.b32.xlu0 %v8607_v55, %s8295_s20 }
 0x250   :  { %v8891_v60 = vpop.permute.xlu1 %7387 }
 0x251   :  { %7552 = vrot.lane.b32.xlu2 %v8643_v5, %s8295_s20  ;;  %v8895_v36 = vpop.permute.xlu0 %7312 }
 0x253   :  { %v8897_v38 = vpop.permute.xlu2 %7347 }
 0x254   :  { %11667 = vst [vmem:[#allocation28_spill] sm:$0xff] %v8897_v38 }
 0x256   :  { %7562 = vrot.lane.b32.xlu1 %v8633_v3, %s8295_s20 }
 0x257   :  { %7587 = vrot.lane.b32.xlu0 %v8540_v27, %s8296_s21 }
 0x258   :  { %v8903_v26 = vpop.permute.xlu1 %7397 }
 0x259   :  { %7567 = vrot.lane.b32.xlu2 %v8570_v43, %s8295_s20  ;;  %v8907_v32 = vpop.permute.xlu0 %7352 }
 0x25a   :  { %v11669_v51 = vunpack.i.h.bf16 %v8907_v32 }
 0x25b   :  { %v8909_v28 = vpop.permute.xlu2 %7472 }
 0x25c   :  { %v7475_v12 = vunpack.i.h.bf16 %v8909_v28  ;;  %v11580_v10 = vunpack.i.l.bf16 %v8909_v28  ;;  %v850_v48 = vsel %vm842_vm9, %v11669_v51, %v7359_v53  ;;  %v11678_v0 = vunpack.i.l.bf16 %v8909_v28 }
 0x25d   :  { %v7189_v28 = vunpack.i.l.bf16 %v8714_v47 }
 0x25e   :  { %7577 = vrot.lane.b32.xlu1 %v8726_v50, %s8295_s20  ;;  %v858_v42 = vsel %vm842_vm9, %v11580_v10, %v7475_v12  ;;  %v11670_v12 = vunpack.i.h.bf16 %v8829_v44  ;;  %v11671_v10 = vunpack.i.l.bf16 %v8829_v44 }
 0x25f   :  { %1033 = vmatpush.msrb.mxu3 %v858_v42  ;;  %7602 = vrot.lane.b32.xlu0 %v8677_v18, %s8296_s21  ;;  %v11672_v42 = vunpack.i.l.bf16 %v8809_v33 }
 0x260   :  { %v8924_v41 = vpop.permute.xlu1 %7407  ;;  %v1087_v30 = vsel %vm1075_vm14, %v11671_v10, %v11670_v12 }
 0x261   :  { %11668 = vst [vmem:[#allocation29_spill] sm:$0xff] %v8924_v41  ;;  %7582 = vrot.lane.b32.xlu2 %v8736_v54, %s8295_s20  ;;  %1034 = vmatpush.msrb.mxu3 %v850_v48  ;;  %v8931_v15 = vpop.permute.xlu0 %7362  ;;  %v1079_v45 = vsel %vm1075_vm14, %v11673_v2, %v11672_v42  ;;  %v8964_v2 = vld [vmem:[%s11559_s4] sm:$0x7]  ;;  %v7260_v41 = vunpack.i.h.bf16 %v8703_v35 }
 0x262   :  { %6913 = vmatmul.msk.f32.vlgmr.msrb.gmra.mxu3 %vm875_vm13, %v8845_v29  ;;  %v11590_v51 = vunpack.i.h.bf16 %v8931_v15 }
 0x263   :  { %1185 = vmatpush.msra.mxu3 %v1087_v30  ;;  %v8941_v53 = vpop.permute.xlu2 %7477  ;;  %v7369_v30 = vunpack.i.l.bf16 %v8867_v19 }
 0x264   :  { %v7480_v48 = vunpack.i.h.bf16 %v8941_v53  ;;  %v11589_v14 = vunpack.i.l.bf16 %v8941_v53 }
 0x265   :  { %1186 = vmatpush.msra.mxu3 %v1079_v45  ;;  %v1083_v10 = vsel %vm1075_vm14, %v11590_v51, %v7369_v30  ;;  %v11676_v51 = vunpack.i.l.bf16 %v8831_v46 }
 0x266   :  { %7592 = vrot.lane.b32.xlu1 %v8558_v40, %s8296_s21  ;;  %v1091_v12 = vsel %vm1075_vm14, %v11589_v14, %v7480_v48  ;;  %v11675_v14 = vunpack.i.l.bf16 %v8840_v25 }
 0x267   :  { %1265 = vmatpush.msrb.mxu3 %v1091_v12  ;;  %7617 = vrot.lane.b32.xlu0 %v8607_v55, %s8296_s21  ;;  %v11596_v12 = vunpack.i.h.bf16 %v8764_v1 }
 0x268   :  { %v8967_v42 = vpop.permute.xlu1 %7422  ;;  %v1321_v45 = vsel %vm1309_vm15, %v11675_v14, %v11593_v52  ;;  %v7320_v52 = vunpack.i.h.bf16 %v8794_v13 }
 0x269   :  { %11674 = vst [vmem:[#allocation30_spill] sm:$0xff] %v8967_v42  ;;  %7597 = vrot.lane.b32.xlu2 %v8643_v5, %s8296_s21  ;;  %1266 = vmatpush.msrb.mxu3 %v1083_v10  ;;  %v8974_v48 = vpop.permute.xlu0 %7372  ;;  %v1313_v10 = vsel %vm1309_vm15, %v11596_v12, %v11676_v51  ;;  %v7354_v12 = vunpack.i.l.bf16 %v8907_v32 }
 0x26a   :  { %6917 = vmatmul.msk.f32.vlgmr.msra.gmra.mxu3 %vm875_vm13, %v8964_v2 }
 0x26b   :  { %1419 = vmatpush.msra.mxu3 %v1321_v45  ;;  %v8984_v30 = vpop.permute.xlu2 %7482  ;;  %v848_v35 = vsel %vm842_vm9, %v7320_v52, %v7354_v12 }
 0x26c   :  { %v7485_v42 = vunpack.i.h.bf16 %v8984_v30  ;;  %v7484_v9 = vunpack.i.l.bf16 %v8984_v30 }
 0x26d   :  { %1420 = vmatpush.msra.mxu3 %v1313_v10  ;;  %v7379_v10 = vunpack.i.l.bf16 %v8879_v56 }
 0x26e   :  { %7607 = vrot.lane.b32.xlu1 %v8633_v3, %s8296_s21  ;;  %v1325_v14 = vsel %vm1309_vm15, %v7484_v9, %v7485_v42  ;;  %v11679_v42 = vunpack.i.h.bf16 %v8974_v48 }
 0x26f   :  { %7632 = vrot.lane.b32.xlu0 %v8540_v27, %s8297_s25 }
 0x270   :  { %v7428_v45 = vpop.permute.xlu1 %7427 }
 0x271   :  { %v7430_v20 = vunpack.i.h.bf16 %v7428_v45  ;;  %v7429_v7 = vunpack.i.l.bf16 %v7428_v45  ;;  %7612 = vrot.lane.b32.xlu2 %v8570_v43, %s8296_s21  ;;  %v9001_v51 = vpop.permute.xlu0 %7382  ;;  %v11677_v45 = vunpack.i.h.bf16 %v8804_v24 }
 0x272   :  { %6921 = vmatmul.msk.f32.vlgmr.msrb.gmra.mxu3 %vm875_vm13, %v8964_v2 }
 0x273   :  { %1499 = vmatpush.msrb.mxu3 %v1325_v14  ;;  %v9010_v4 = vpop.permute.xlu2 %7487  ;;  %v855_v37 = vsel %vm842_vm9, %v11677_v45, %v7429_v7  ;;  %v856_v38 = vsel %vm842_vm9, %v7429_v7, %v7430_v20  ;;  %v857_v16 = vsel %vm842_vm9, %v7430_v20, %v11678_v0  ;;  %v1317_v14 = vsel %vm1309_vm15, %v11679_v42, %v7379_v10 }
 0x274   :  { %973 = vmatpush.msrb.mxu0 %v855_v37  ;;  %993 = vmatpush.msrb.mxu1 %v856_v38  ;;  %v11680_v7 = vunpack.i.l.bf16 %v8794_v13  ;;  %v7190_v0 = vunpack.i.h.bf16 %v8714_v47  ;;  %v11681_v20 = vunpack.i.h.bf16 %v8907_v32  ;;  %v1084_v47 = vsel %vm1075_vm14, %v7370_v22, %v7259_v31 }
 0x275   :  { %1500 = vmatpush.msrb.mxu3 %v1317_v14  ;;  %1013 = vmatpush.msrb.mxu2 %v857_v16  ;;  %v7224_v16 = vunpack.i.l.bf16 %v8752_v61  ;;  %v1085_v13 = vsel %vm1075_vm14, %v7259_v31, %v7260_v41  ;;  %v7305_v38 = vunpack.i.h.bf16 %v8871_v21  ;;  %v9056_v31 = vld [vmem:[%s11559_s4 + $0x8] sm:$0x7]  ;;  %v11683_v14 = vunpack.i.h.bf16 %v8752_v61 }
 0x276   :  { %v847_v24 = vsel %vm842_vm9, %v11680_v7, %v7320_v52  ;;  %7622 = vrot.lane.b32.xlu1 %v8726_v50, %s8296_s21  ;;  %v849_v37 = vsel %vm842_vm9, %v7354_v12, %v11681_v20  ;;  %994 = vmatpush.msrb.mxu1 %v848_v35  ;;  %v11682_v52 = vunpack.i.l.bf16 %v8829_v44  ;;  %v7304_v12 = vunpack.i.l.bf16 %v8871_v21  ;;  %v9273_v21 = vld [vmem:[%s11559_s4 + $0x10] sm:$0x7] }
 0x277   :  { %974 = vmatpush.msrb.mxu0 %v847_v24  ;;  %1014 = vmatpush.msrb.mxu2 %v849_v37  ;;  %v1076_v22 = vsel %vm1075_vm14, %v7189_v28, %v7190_v0  ;;  %v1078_v7 = vsel %vm1075_vm14, %v7224_v16, %v11683_v14  ;;  %v11684_v28 = vunpack.i.h.bf16 %v8829_v44  ;;  %v7325_v20 = vunpack.i.h.bf16 %v8809_v33 }
 0x278   :  { %6910 = vmatmul.msk.f32.vlgmr.msrb.gmra.mxu0 %vm875_vm13, %v8845_v29  ;;  %6911 = vmatmul.msk.f32.vlgmr.msrb.gmra.mxu1 %vm875_vm13, %v8845_v29  ;;  %v1086_v32 = vsel %vm1075_vm14, %v7260_v41, %v11682_v52  ;;  %v7433_v19 = vpop.permute.xlu1 %7432  ;;  %v7334_v41 = vunpack.i.l.bf16 %v8851_v34  ;;  %v7364_v37 = vunpack.i.l.bf16 %v8931_v15  ;;  %v1563_v44 = vsel %vm1551_vm1, %v7304_v12, %v7305_v38 }
 0x279   :  { %6912 = vmatmul.msk.f32.vlgmr.msrb.gmra.mxu2 %vm875_vm13, %v8845_v29  ;;  %1125 = vmatpush.msra.mxu0 %v1084_v47  ;;  %v7435_v10 = vunpack.i.h.bf16 %v7433_v19  ;;  %v7434_v45 = vunpack.i.l.bf16 %v7433_v19  ;;  %v9050_v42 = vpop.permute.xlu0 %7392  ;;  %v1077_v29 = vsel %vm1075_vm14, %v7190_v0, %v7224_v16  ;;  %v11685_v0 = vunpack.i.l.bf16 %v8941_v53 }
 0x27a   :  { %1145 = vmatpush.msra.mxu1 %v1085_v13  ;;  %1165 = vmatpush.msra.mxu2 %v1086_v32  ;;  %v7235_v16 = vunpack.i.h.bf16 %v8776_v8  ;;  %v7265_v13 = vunpack.i.h.bf16 %v8722_v49  ;;  %v7264_v53 = vunpack.i.l.bf16 %v8722_v49  ;;  %v7380_v52 = vunpack.i.h.bf16 %v8879_v56 }
 0x27b   :  { %7647 = vrot.lane.b32.xlu0 %v8677_v18, %s8297_s25  ;;  %7627 = vrot.lane.b32.xlu2 %v8736_v54, %s8296_s21  ;;  %v9067_v24 = vpop.permute.xlu2 %7492  ;;  %v1088_v35 = vsel %vm1075_vm14, %v11684_v28, %v7434_v45  ;;  %v1089_v47 = vsel %vm1075_vm14, %v7434_v45, %v7435_v10  ;;  %v1090_v61 = vsel %vm1075_vm14, %v7435_v10, %v11685_v0  ;;  %v11686_v19 = vunpack.i.l.bf16 %v8809_v33 }
 0x27c   :  { %1126 = vmatpush.msra.mxu0 %v1076_v22  ;;  %1146 = vmatpush.msra.mxu1 %v1077_v29  ;;  %v1555_v32 = vsel %vm1551_vm1, %v7235_v16, %v7334_v41  ;;  %v1081_v49 = vsel %vm1075_vm14, %v7325_v20, %v7364_v37  ;;  %v7195_v56 = vunpack.i.h.bf16 %v8741_v58  ;;  %v7194_v22 = vunpack.i.l.bf16 %v8741_v58 }
 0x27d   :  { %1166 = vmatpush.msra.mxu2 %v1078_v7  ;;  %6926 = vmatmul.msk.f32.vlgmr.msra.gmra.mxu3 %vm875_vm13, %v9056_v31  ;;  %v1080_v10 = vsel %vm1075_vm14, %v11686_v19, %v7325_v20  ;;  %v11687_v29 = vunpack.i.h.bf16 %v8931_v15  ;;  %v7229_v28 = vunpack.i.l.bf16 %v8764_v1  ;;  %v1318_v58 = vsel %vm1309_vm15, %v7380_v52, %v7264_v53 }
 0x27e   :  { %1661 = vmatpush.msra.mxu3 %v1563_v44  ;;  %1205 = vmatpush.msrb.mxu0 %v1088_v35  ;;  %v1319_v33 = vsel %vm1309_vm15, %v7264_v53, %v7265_v13  ;;  %v7490_v35 = vunpack.i.h.bf16 %v9010_v4  ;;  %v7489_v20 = vunpack.i.l.bf16 %v9010_v4  ;;  %v1310_v0 = vsel %vm1309_vm15, %v7194_v22, %v7195_v56 }
 0x27f   :  { %1225 = vmatpush.msrb.mxu1 %v1089_v47  ;;  %1245 = vmatpush.msrb.mxu2 %v1090_v61  ;;  %v1082_v14 = vsel %vm1075_vm14, %v7364_v37, %v11687_v29  ;;  %v11688_v37 = vunpack.i.l.bf16 %v8840_v25  ;;  %v7385_v61 = vunpack.i.h.bf16 %v9001_v51  ;;  %v1311_v44 = vsel %vm1309_vm15, %v7195_v56, %v7229_v28 }
 0x280   :  { %1662 = vmatpush.msra.mxu3 %v1555_v32  ;;  %7637 = vrot.lane.b32.xlu1 %v8558_v40, %s8297_s25  ;;  %v7438_v45 = vpop.permute.xlu1 %7437  ;;  %v11689_v53 = vunpack.i.h.bf16 %v8764_v1  ;;  %v7330_v56 = vunpack.i.h.bf16 %v8831_v46  ;;  %v7374_v22 = vunpack.i.l.bf16 %v8974_v48  ;;  %v11690_v29 = vunpack.i.h.bf16 %v8840_v25  ;;  %v9170_v25 = vld [vmem:[%s11559_s4 + $0xc] sm:$0x7] }
 0x281   :  { %1206 = vmatpush.msrb.mxu0 %v1080_v10  ;;  %1226 = vmatpush.msrb.mxu1 %v1081_v49  ;;  %v9105_v7 = vpop.permute.xlu0 %7402  ;;  %v1320_v47 = vsel %vm1309_vm15, %v7265_v13, %v11688_v37  ;;  %v7439_v32 = vunpack.i.l.bf16 %v7438_v45  ;;  %v7389_v13 = vunpack.i.l.bf16 %v8891_v60  ;;  %v7440_v19 = vunpack.i.h.bf16 %v7438_v45 }
 0x282   :  { %1246 = vmatpush.msrb.mxu2 %v1082_v14  ;;  %6914 = vmatmul.msk.f32.vlgmr.msra.gmra.mxu0 %vm875_vm13, %v8964_v2  ;;  %v1312_v52 = vsel %vm1309_vm15, %v7229_v28, %v11689_v53  ;;  %v1567_v10 = vsel %vm1551_vm1, %v7489_v20, %v7490_v35  ;;  %v1315_v30 = vsel %vm1309_vm15, %v7330_v56, %v7374_v22  ;;  %vm2519_vm9 = vcmask 162816  }
 0x283   :  { %6915 = vmatmul.msk.f32.vlgmr.msra.gmra.mxu1 %vm875_vm13, %v8964_v2  ;;  %6916 = vmatmul.msk.f32.vlgmr.msra.gmra.mxu2 %vm875_vm13, %v8964_v2  ;;  %v9116_v15 = vpop.permute.xlu2 %7497  ;;  %v1559_v45 = vsel %vm1551_vm1, %v7385_v61, %v7389_v13  ;;  %v1322_v14 = vsel %vm1309_vm15, %v11690_v29, %v7439_v32  ;;  %v1323_v35 = vsel %vm1309_vm15, %v7439_v32, %v7440_v19  ;;  %v7269_v32 = vunpack.i.l.bf16 %v8743_v59 }
 0x284   :  { %1359 = vmatpush.msra.mxu0 %v1318_v58  ;;  %1379 = vmatpush.msra.mxu1 %v1319_v33  ;;  %v7310_v58 = vunpack.i.h.bf16 %v8883_v39  ;;  %v7309_v33 = vunpack.i.l.bf16 %v8883_v39  ;;  %v1324_v37 = vsel %vm1309_vm15, %v7440_v19, %v7484_v9  ;;  %v7240_v13 = vunpack.i.h.bf16 %v8788_v11 }
 0x285   :  { %1399 = vmatpush.msra.mxu2 %v1320_v47  ;;  %7662 = vrot.lane.b32.xlu0 %v8607_v55, %s8297_s25  ;;  %v7339_v47 = vunpack.i.l.bf16 %v8873_v17  ;;  %v7199_v19 = vunpack.i.l.bf16 %v8756_v62  ;;  %v7494_v29 = vunpack.i.l.bf16 %v9067_v24  ;;  %vm2761_vm14 = vcmask 154624  }
 0x286   :  { %7642 = vrot.lane.b32.xlu2 %v8643_v5, %s8297_s25  ;;  %1360 = vmatpush.msra.mxu0 %v1310_v0  ;;  %v7390_v0 = vunpack.i.h.bf16 %v8891_v60 }
 0x287   :  { %1380 = vmatpush.msra.mxu1 %v1311_v44  ;;  %1400 = vmatpush.msra.mxu2 %v1312_v52  ;;  %v11692_v44 = vunpack.i.h.bf16 %v8974_v48  ;;  %v7270_v52 = vunpack.i.h.bf16 %v8743_v59  ;;  %v7200_v59 = vunpack.i.h.bf16 %v8756_v62  ;;  %v7495_v62 = vunpack.i.h.bf16 %v9067_v24 }
 0x288   :  { %6930 = vmatmul.msk.f32.vlgmr.msrb.gmra.mxu3 %vm875_vm13, %v9056_v31  ;;  %7652 = vrot.lane.b32.xlu1 %v8633_v3, %s8297_s25  ;;  %v9141_v49 = vpop.permute.xlu1 %7442 }
 0x289   :  { %1741 = vmatpush.msrb.mxu3 %v1567_v10  ;;  %v9143_v1 = vpop.permute.xlu0 %7412  ;;  %v1316_v53 = vsel %vm1309_vm15, %v7374_v22, %v11692_v44  ;;  %v7234_v10 = vunpack.i.l.bf16 %v8776_v8  ;;  %v1560_v22 = vsel %vm1551_vm1, %v7390_v0, %v7269_v32  ;;  %v7399_v0 = vunpack.i.l.bf16 %v8903_v26 }
 0x28a   :  { %6918 = vmatmul.msk.f32.vlgmr.msrb.gmra.mxu0 %vm875_vm13, %v8964_v2  ;;  %v7445_v44 = vunpack.i.h.bf16 %v9141_v49 }
 0x28b   :  { %1742 = vmatpush.msrb.mxu3 %v1559_v45  ;;  %6919 = vmatmul.msk.f32.vlgmr.msrb.gmra.mxu1 %vm875_vm13, %v8964_v2  ;;  %v9157_v28 = vpop.permute.xlu2 %7502 }
 0x28c   :  { %6920 = vmatmul.msk.f32.vlgmr.msrb.gmra.mxu2 %vm875_vm13, %v8964_v2  ;;  %1439 = vmatpush.msrb.mxu0 %v1322_v14  ;;  %v11691_v2 = vunpack.i.l.bf16 %v8831_v46  ;;  %v1805_v46 = vsel %vm1793_vm4, %v7309_v33, %v7310_v58  ;;  %v1561_v14 = vsel %vm1551_vm1, %v7269_v32, %v7270_v52 }
 0x28d   :  { %1459 = vmatpush.msrb.mxu1 %v1323_v35  ;;  %1479 = vmatpush.msrb.mxu2 %v1324_v37  ;;  %v1562_v35 = vsel %vm1551_vm1, %v7270_v52, %v7304_v12  ;;  %v7395_v37 = vunpack.i.h.bf16 %v9050_v42  ;;  %v1554_v12 = vsel %vm1551_vm1, %v7234_v10, %v7235_v16  ;;  %v7335_v16 = vunpack.i.h.bf16 %v8851_v34 }
 0x28e   :  { %7677 = vrot.lane.b32.xlu0 %v8540_v27, %s8298_s29  ;;  %7657 = vrot.lane.b32.xlu2 %v8570_v43, %s8297_s25  ;;  %v1314_v9 = vsel %vm1309_vm15, %v11691_v2, %v7330_v56  ;;  %v1797_v56 = vsel %vm1793_vm4, %v7240_v13, %v7339_v47  ;;  %v1552_v2 = vsel %vm1551_vm1, %v7199_v19, %v7200_v59  ;;  %vm3003_vm15 = vcmask 146432  }
 0x28f   :  { %1440 = vmatpush.msrb.mxu0 %v1314_v9  ;;  %1460 = vmatpush.msrb.mxu1 %v1315_v30  ;;  %v1553_v9 = vsel %vm1551_vm1, %v7200_v59, %v7234_v10  ;;  %v7444_v30 = vunpack.i.l.bf16 %v9141_v49  ;;  %v7384_v49 = vunpack.i.l.bf16 %v9001_v51  ;;  %v1801_v52 = vsel %vm1793_vm4, %v7395_v37, %v7399_v0 }
 0x290   :  { %1480 = vmatpush.msrb.mxu2 %v1316_v53  ;;  %6935 = vmatmul.msk.f32.vlgmr.msra.gmra.mxu3 %vm875_vm13, %v9170_v25  ;;  %v9195_v60 = vpop.permute.xlu1 %7447  ;;  %v7314_v59 = vunpack.i.l.bf16 %v8895_v36  ;;  %v1566_v10 = vsel %vm1551_vm1, %v7445_v44, %v7489_v20  ;;  %v1556_v4 = vsel %vm1551_vm1, %v7334_v41, %v7335_v16  ;;  %v7400_v20 = vunpack.i.h.bf16 %v8903_v26 }
 0x291   :  { %1903 = vmatpush.msra.mxu3 %v1805_v46  ;;  %7667 = vrot.lane.b32.xlu1 %v8726_v50, %s8297_s25  ;;  %v9199_v48 = vpop.permute.xlu0 %7417  ;;  %v7315_v46 = vunpack.i.h.bf16 %v8895_v36  ;;  %v1565_v19 = vsel %vm1551_vm1, %v7444_v30, %v7445_v44  ;;  %v7204_v41 = vunpack.i.l.bf16 %v8768_v6  ;;  %v7499_v0 = vunpack.i.l.bf16 %v9116_v15 }
 0x292   :  { %6923 = vmatmul.msk.f32.vlgmr.msra.gmra.mxu0 %vm875_vm13, %v9056_v31 }
 0x293   :  { %1904 = vmatpush.msra.mxu3 %v1797_v56  ;;  %6924 = vmatmul.msk.f32.vlgmr.msra.gmra.mxu1 %vm875_vm13, %v9056_v31  ;;  %v9214_v45 = vpop.permute.xlu2 %7507  ;;  %v1558_v56 = vsel %vm1551_vm1, %v7384_v49, %v7385_v61  ;;  %v2047_v26 = vsel %vm2035_vm8, %v7314_v59, %v7315_v46  ;;  %v7239_v61 = vunpack.i.l.bf16 %v8788_v11 }
 0x294   :  { %6925 = vmatmul.msk.f32.vlgmr.msra.gmra.mxu2 %vm875_vm13, %v9056_v31  ;;  %1601 = vmatpush.msra.mxu0 %v1560_v22  ;;  %v7274_v22 = vunpack.i.l.bf16 %v8758_v63 }
 0x295   :  { %1621 = vmatpush.msra.mxu1 %v1561_v14  ;;  %1641 = vmatpush.msra.mxu2 %v1562_v35 }
 0x296   :  { %7692 = vrot.lane.b32.xlu0 %v8677_v18, %s8298_s29  ;;  %7672 = vrot.lane.b32.xlu2 %v8736_v54, %s8297_s25  ;;  %v1809_v18 = vsel %vm1793_vm4, %v7494_v29, %v7495_v62  ;;  %v7245_v62 = vunpack.i.h.bf16 %v8800_v23  ;;  %v1802_v35 = vsel %vm1793_vm4, %v7400_v20, %v7274_v22 }
 0x297   :  { %1602 = vmatpush.msra.mxu0 %v1552_v2  ;;  %1622 = vmatpush.msra.mxu1 %v1553_v9  ;;  %v11693_v2 = vld [vmem:[#allocation4_spill] sm:$0xff]  ;;  %v11694_v9 = vld [vmem:[#allocation6_spill] sm:$0xff] }
 0x298   :  { %1642 = vmatpush.msra.mxu2 %v1554_v12  ;;  %6939 = vmatmul.msk.f32.vlgmr.msrb.gmra.mxu3 %vm875_vm13, %v9170_v25  ;;  %v9242_v53 = vpop.permute.xlu1 %7452  ;;  %v7500_v12 = vunpack.i.h.bf16 %v9116_v15 }
 0x299   :  { %1983 = vmatpush.msrb.mxu3 %v1809_v18  ;;  %7682 = vrot.lane.b32.xlu1 %v8558_v40, %s8298_s29  ;;  %v9246_v8 = vpop.permute.xlu0 %7462  ;;  %v1564_v40 = vsel %vm1551_vm1, %v7305_v38, %v7444_v30  ;;  %v7344_v38 = vunpack.i.l.bf16 %v8885_v57 }
 0x29a   :  { %6927 = vmatmul.msk.f32.vlgmr.msrb.gmra.mxu0 %vm875_vm13, %v9056_v31 }
 0x29b   :  { %1984 = vmatpush.msrb.mxu3 %v1801_v52  ;;  %6928 = vmatmul.msk.f32.vlgmr.msrb.gmra.mxu1 %vm875_vm13, %v9056_v31  ;;  %v9260_v32 = vpop.permute.xlu2 %7522  ;;  %v2039_v14 = vsel %vm2035_vm8, %v7245_v62, %v7344_v38 }
 0x29c   :  { %6929 = vmatmul.msk.f32.vlgmr.msrb.gmra.mxu2 %vm875_vm13, %v9056_v31  ;;  %1681 = vmatpush.msrb.mxu0 %v1564_v40  ;;  %v1557_v31 = vsel %vm1551_vm1, %v7335_v16, %v7384_v49  ;;  %v7405_v16 = vunpack.i.h.bf16 %v9105_v7  ;;  %v7449_v40 = vunpack.i.l.bf16 %v9195_v60  ;;  %vm3245_vm1 = vcmask 15360  }
 0x29d   :  { %1701 = vmatpush.msrb.mxu1 %v1565_v19  ;;  %1721 = vmatpush.msrb.mxu2 %v1566_v10  ;;  %v11695_v19 = vld [vmem:[#allocation29_spill] sm:$0xff] }
 0x29e   :  { %7707 = vrot.lane.b32.xlu0 %v8607_v55, %s8298_s29  ;;  %7687 = vrot.lane.b32.xlu2 %v8643_v5, %s8298_s29  ;;  %v7275_v55 = vunpack.i.h.bf16 %v8758_v63  ;;  %v7205_v63 = vunpack.i.h.bf16 %v8768_v6  ;;  %v9319_v6 = vpack.i.bf16 %v11694_v9, %v11693_v2  ;;  %v7409_v10 = vunpack.i.l.bf16 %v11695_v19 }
 0x29f   :  { %1682 = vmatpush.msrb.mxu0 %v1556_v4  ;;  %1702 = vmatpush.msrb.mxu1 %v1557_v31  ;;  %v7450_v4 = vunpack.i.h.bf16 %v9195_v60  ;;  %v7394_v60 = vunpack.i.l.bf16 %v9050_v42 }
 0x2a0   :  { %1722 = vmatpush.msrb.mxu2 %v1558_v56  ;;  %6944 = vmatmul.msk.f32.vlgmr.msra.gmra.mxu3 %vm875_vm13, %v9273_v21  ;;  %v9298_v34 = vpop.permute.xlu1 %7457  ;;  %v1803_v44 = vsel %vm1793_vm4, %v7274_v22, %v7275_v55  ;;  %v1804_v18 = vsel %vm1793_vm4, %v7275_v55, %v7309_v33  ;;  %v1794_v49 = vsel %vm1793_vm4, %v7204_v41, %v7205_v63  ;;  %v11696_v56 = vld [vmem:[#allocation17_spill] sm:$0xff]  ;;  %v11697_v55 = vld [vmem:[#allocation12_spill] sm:$0xff]  ;;  %v11614_v41 = vunpack.i.l.bf16 %v9199_v48 }
 0x2a1   :  { %2145 = vmatpush.msra.mxu3 %v2047_v26  ;;  %7697 = vrot.lane.b32.xlu1 %v8633_v3, %s8298_s29  ;;  %v9302_v51 = vpop.permute.xlu0 %7512  ;;  %v1795_v52 = vsel %vm1793_vm4, %v7205_v63, %v7239_v61  ;;  %v1796_v33 = vsel %vm1793_vm4, %v7239_v61, %v7240_v13  ;;  %v7340_v13 = vunpack.i.h.bf16 %v8873_v17  ;;  %v2043_v20 = vsel %vm2035_vm8, %v7405_v16, %v7409_v10 }
 0x2a2   :  { %6932 = vmatmul.msk.f32.vlgmr.msra.gmra.mxu0 %vm875_vm13, %v9170_v25  ;;  %v9369_v22 = vpack.i.bf16 %v11697_v55, %v11696_v56  ;;  %v11612_v63 = vunpack.i.h.bf16 %v9199_v48  ;;  %v1807_v61 = vsel %vm1793_vm4, %v7449_v40, %v7450_v4  ;;  %v1808_v39 = vsel %vm1793_vm4, %v7450_v4, %v7494_v29 }
 0x2a3   :  { %2146 = vmatpush.msra.mxu3 %v2039_v14  ;;  %6933 = vmatmul.msk.f32.vlgmr.msra.gmra.mxu1 %vm875_vm13, %v9170_v25  ;;  %v9321_v30 = vpop.permute.xlu2 %7537  ;;  %v11698_v14 = vld [vmem:[#allocation28_spill] sm:$0xff]  ;;  %v1798_v24 = vsel %vm1793_vm4, %v7339_v47, %v7340_v13  ;;  %v7410_v29 = vunpack.i.h.bf16 %v11695_v19  ;;  %v11702_v47 = vld [vmem:[#allocation27_spill] sm:$0xff] }
 0x2a4   :  { %6934 = vmatmul.msk.f32.vlgmr.msra.gmra.mxu2 %vm875_vm13, %v9170_v25  ;;  %1843 = vmatpush.msra.mxu0 %v1802_v35  ;;  %v11611_v35 = vunpack.i.l.bf16 %v11698_v14  ;;  %v2289_v42 = vsel %vm2277_vm0, %v11614_v41, %v11612_v63  ;;  %v11703_v19 = vld [vmem:[#allocation24_spill] sm:$0xff]  ;;  %v11710_v63 = vld [vmem:[#allocation30_spill] sm:$0xff]  ;;  %v7455_v41 = vunpack.i.h.bf16 %v9242_v53  ;;  %v7540_v27 = vunpack.i.h.bf16 %v9321_v30 }
 0x2a5   :  { %1863 = vmatpush.msra.mxu1 %v1803_v44  ;;  %1883 = vmatpush.msra.mxu2 %v1804_v18  ;;  %v11699_v44 = vld [vmem:[#allocation7_spill] sm:$0xff]  ;;  %v7210_v10 = vunpack.i.h.bf16 %v11703_v19  ;;  %v7209_v4 = vunpack.i.l.bf16 %v11703_v19 }
 0x2a6   :  { %7722 = vrot.lane.b32.xlu0 %v9319_v6, %s8262_s24  ;;  %7702 = vrot.lane.b32.xlu2 %v8570_v43, %s8298_s29  ;;  %v2051_v43 = vsel %vm2035_vm8, %v7499_v0, %v7500_v12  ;;  %v1800_v12 = vsel %vm1793_vm4, %v7394_v60, %v7395_v37  ;;  %v11700_v18 = vld [vmem:[#allocation15_spill] sm:$0xff]  ;;  %v2050_v36 = vsel %vm2035_vm8, %v7455_v41, %v7499_v0  ;;  %v7425_v0 = vunpack.i.h.bf16 %v11710_v63 }
 0x2a7   :  { %1844 = vmatpush.msra.mxu0 %v1794_v49  ;;  %1864 = vmatpush.msra.mxu1 %v1795_v52  ;;  %v9401_v49 = vpack.i.bf16 %v11700_v18, %v11699_v44 }
 0x2a8   :  { %1884 = vmatpush.msra.mxu2 %v1796_v33  ;;  %6948 = vmatmul.msk.f32.vlgmr.msrb.gmra.mxu3 %vm875_vm13, %v9273_v21  ;;  %v9349_v31 = vpop.permute.xlu1 %7467 }
 0x2a9   :  { %2225 = vmatpush.msrb.mxu3 %v2051_v43  ;;  %7712 = vrot.lane.b32.xlu1 %v8726_v50, %s8298_s29  ;;  %v9353_v11 = vpop.permute.xlu0 %7527  ;;  %v1806_v50 = vsel %vm1793_vm4, %v7310_v58, %v7449_v40  ;;  %v9384_v58 = vld [vmem:[%s11559_s4 + $0x14] sm:$0x7]  ;;  %v11613_v40 = vunpack.i.h.bf16 %v11702_v47  ;;  %v7244_v43 = vunpack.i.l.bf16 %v8800_v23 }
 0x2aa   :  { %6936 = vmatmul.msk.f32.vlgmr.msrb.gmra.mxu0 %vm875_vm13, %v9170_v25 }
 0x2ab   :  { %2226 = vmatpush.msrb.mxu3 %v2043_v20  ;;  %6937 = vmatmul.msk.f32.vlgmr.msrb.gmra.mxu1 %vm875_vm13, %v9170_v25  ;;  %v9371_v26 = vpop.permute.xlu2 %7552  ;;  %v11704_v20 = vld [vmem:[#allocation10_spill] sm:$0xff] }
 0x2ac   :  { %6938 = vmatmul.msk.f32.vlgmr.msrb.gmra.mxu2 %vm875_vm13, %v9170_v25  ;;  %1923 = vmatpush.msrb.mxu0 %v1806_v50  ;;  %v1799_v25 = vsel %vm1793_vm4, %v7340_v13, %v7394_v60  ;;  %v2281_v13 = vsel %vm2277_vm0, %v11613_v40, %v11611_v35  ;;  %v11705_v50 = vld [vmem:[#allocation19_spill] sm:$0xff]  ;;  %v2036_v35 = vsel %vm2035_vm8, %v7209_v4, %v7210_v10  ;;  %v7424_v40 = vunpack.i.l.bf16 %v11710_v63 }
 0x2ad   :  { %1943 = vmatpush.msrb.mxu1 %v1807_v61  ;;  %1963 = vmatpush.msrb.mxu2 %v1808_v39  ;;  %v9434_v61 = vpack.i.bf16 %v11705_v50, %v11704_v20  ;;  %v11706_v39 = vld [vmem:[#allocation13_spill] sm:$0xff]  ;;  %vm3487_vm4 = vcmask 7168  }
 0x2ae   :  { %7737 = vrot.lane.b32.xlu0 %v9369_v22, %s8262_s24  ;;  %7717 = vrot.lane.b32.xlu2 %v8736_v54, %s8298_s29  ;;  %v11701_v54 = vld [vmem:[#allocation23_spill] sm:$0xff] }
 0x2af   :  { %1924 = vmatpush.msrb.mxu0 %v1798_v24  ;;  %1944 = vmatpush.msrb.mxu1 %v1799_v25  ;;  %v7280_v52 = vunpack.i.h.bf16 %v11701_v54  ;;  %v7279_v17 = vunpack.i.l.bf16 %v11701_v54  ;;  %v11707_v24 = vld [vmem:[#allocation18_spill] sm:$0xff]  ;;  %v7505_v54 = vunpack.i.h.bf16 %v9157_v28 }
 0x2b0   :  { %1964 = vmatpush.msrb.mxu2 %v1800_v12  ;;  %6953 = vmatmul.msk.f32.vlgmr.msra.gmra.mxu3 %vm875_vm13, %v9384_v58  ;;  %v9413_v37 = vpop.permute.xlu1 %7517  ;;  %v9438_v25 = vpack.i.bf16 %v11707_v24, %v11706_v39 }
 0x2b1   :  { %2387 = vmatpush.msra.mxu3 %v2289_v42  ;;  %7727 = vrot.lane.b32.xlu1 %v9401_v49, %s8262_s24  ;;  %v9417_v33 = vpop.permute.xlu0 %7542  ;;  %v2044_v60 = vsel %vm2035_vm8, %v7410_v29, %v7279_v17  ;;  %v11615_v42 = vunpack.i.l.bf16 %v9157_v28  ;;  %v2045_v29 = vsel %vm2035_vm8, %v7279_v17, %v7280_v52  ;;  %v2046_v19 = vsel %vm2035_vm8, %v7280_v52, %v7314_v59 }
 0x2b2   :  { %6941 = vmatmul.msk.f32.vlgmr.msra.gmra.mxu0 %vm875_vm13, %v9273_v21  ;;  %v7454_v17 = vunpack.i.l.bf16 %v9242_v53  ;;  %v2038_v59 = vsel %vm2035_vm8, %v7244_v43, %v7245_v62  ;;  %v11708_v52 = vmov 0.0   ;;  %v7345_v62 = vunpack.i.h.bf16 %v8885_v57 }
 0x2b3   :  { %2388 = vmatpush.msra.mxu3 %v2281_v13  ;;  %6942 = vmatmul.msk.f32.vlgmr.msra.gmra.mxu1 %vm875_vm13, %v9273_v21  ;;  %v9440_v12 = vpop.permute.xlu2 %7567  ;;  %v11616_v13 = vunpack.i.h.bf16 %v9143_v1  ;;  %v7404_v53 = vunpack.i.l.bf16 %v9105_v7 }
 0x2b4   :  { %6943 = vmatmul.msk.f32.vlgmr.msra.gmra.mxu2 %vm875_vm13, %v9273_v21  ;;  %2085 = vmatpush.msra.mxu0 %v2044_v60  ;;  %v2037_v60 = vsel %vm2035_vm8, %v7210_v10, %v7244_v43  ;;  %v2048_v43 = vsel %vm2035_vm8, %v7315_v46, %v7454_v17  ;;  %v9507_v46 = vld [vmem:[%s11559_s4 + $0x18] sm:$0x7]  ;;  %v2040_v15 = vsel %vm2035_vm8, %v7344_v38, %v7345_v62  ;;  %v11623_v38 = vunpack.i.l.bf16 %v9214_v45 }
 0x2b5   :  { %2105 = vmatpush.msra.mxu1 %v2045_v29  ;;  %2125 = vmatpush.msra.mxu2 %v2046_v19  ;;  %v11709_v29 = vld [vmem:[#allocation8_spill] sm:$0xff]  ;;  %v2285_v4 = vsel %vm2277_vm0, %v11616_v13, %v7424_v40  ;;  %v11618_v40 = vunpack.i.l.bf16 %v9353_v11 }
 0x2b6   :  { %7752 = vrot.lane.b32.xlu0 %v9434_v61, %s8262_s24  ;;  %7732 = vrot.lane.b32.xlu2 %v9438_v25, %s8262_s24  ;;  %v9463_v19 = vpack.i.bf16 %v11709_v29, %v11708_v52 }
 0x2b7   :  { %2086 = vmatpush.msra.mxu0 %v2036_v35  ;;  %2106 = vmatpush.msra.mxu1 %v2037_v60  ;;  %v2293_v35 = vsel %vm2277_vm0, %v11615_v42, %v7505_v54  ;;  %v11711_v54 = vld [vmem:[#allocation9_spill] sm:$0xff]  ;;  %v11712_v60 = vld [vmem:[#allocation11_spill] sm:$0xff]  ;;  %v11617_v42 = vunpack.i.h.bf16 %v9353_v11 }
 0x2b8   :  { %2126 = vmatpush.msra.mxu2 %v2038_v59  ;;  %6957 = vmatmul.msk.f32.vlgmr.msrb.gmra.mxu3 %vm875_vm13, %v9384_v58  ;;  %v9472_v10 = vpop.permute.xlu1 %7532  ;;  %v9492_v59 = vpack.i.bf16 %v11712_v60, %v11711_v54 }
 0x2b9   :  { %2467 = vmatpush.msrb.mxu3 %v2293_v35  ;;  %7742 = vrot.lane.b32.xlu1 %v9463_v19, %s8262_s24  ;;  %v9476_v23 = vpop.permute.xlu0 %7557  ;;  %v2531_v7 = vsel %vm2519_vm9, %v11618_v40, %v11617_v42  ;;  %v11718_v42 = vld [vmem:[#allocation21_spill] sm:$0xff] }
 0x2ba   :  { %6945 = vmatmul.msk.f32.vlgmr.msrb.gmra.mxu0 %vm875_vm13, %v9273_v21  ;;  %v9556_v40 = vpack.i.bf16 0.0, %v11718_v42 }
 0x2bb   :  { %2468 = vmatpush.msrb.mxu3 %v2285_v4  ;;  %6946 = vmatmul.msk.f32.vlgmr.msrb.gmra.mxu1 %vm875_vm13, %v9273_v21  ;;  %v9494_v35 = vpop.permute.xlu2 %7582  ;;  %v2049_v4 = vsel %vm2035_vm8, %v7454_v17, %v7455_v41  ;;  %v2042_v41 = vsel %vm2035_vm8, %v7404_v53, %v7405_v16  ;;  %v11713_v17 = vld [vmem:[#allocation20_spill] sm:$0xff] }
 0x2bc   :  { %6947 = vmatmul.msk.f32.vlgmr.msrb.gmra.mxu2 %vm875_vm13, %v9273_v21  ;;  %2165 = vmatpush.msrb.mxu0 %v2048_v43  ;;  %v2041_v21 = vsel %vm2035_vm8, %v7345_v62, %v7404_v53  ;;  %v11714_v43 = vld [vmem:[#allocation22_spill] sm:$0xff] }
 0x2bd   :  { %2185 = vmatpush.msrb.mxu1 %v2049_v4  ;;  %2205 = vmatpush.msrb.mxu2 %v2050_v36  ;;  %v9524_v4 = vpack.i.bf16 %v11714_v43, %v11713_v17  ;;  %v11715_v36 = vld [vmem:[#allocation25_spill] sm:$0xff]  ;;  %v11716_v62 = vld [vmem:[#allocation26_spill] sm:$0xff] }
 0x2be   :  { %7767 = vrot.lane.b32.xlu0 %v9319_v6, %s8261_s23  ;;  %7747 = vrot.lane.b32.xlu2 %v9492_v59, %s8262_s24  ;;  %v7285_v13 = vunpack.i.h.bf16 %v11715_v36  ;;  %v7284_v57 = vunpack.i.l.bf16 %v11715_v36  ;;  %v7215_v53 = vunpack.i.h.bf16 %v11716_v62 }
 0x2bf   :  { %2166 = vmatpush.msrb.mxu0 %v2040_v15  ;;  %2186 = vmatpush.msrb.mxu1 %v2041_v21  ;;  %v7214_v15 = vunpack.i.l.bf16 %v11716_v62  ;;  %v7249_v21 = vunpack.i.l.bf16 %v11702_v47 }
 0x2c0   :  { %2206 = vmatpush.msrb.mxu2 %v2042_v41  ;;  %6962 = vmatmul.msk.f32.vlgmr.msra.gmra.mxu3 %vm875_vm13, %v9507_v46  ;;  %v9536_v16 = vpop.permute.xlu1 %7547  ;;  %v11717_v41 = vunpack.i.h.bf16 %v9349_v31 }
 0x2c1   :  { %2629 = vmatpush.msra.mxu3 %v2531_v7  ;;  %7757 = vrot.lane.b32.xlu1 %v9524_v4, %s8262_s24  ;;  %v9540_v63 = vpop.permute.xlu0 %7572  ;;  %v2286_v7 = vsel %vm2277_vm0, %v7425_v0, %v7284_v57  ;;  %v7519_v0 = vunpack.i.l.bf16 %v9413_v37  ;;  %v2278_v3 = vsel %vm2277_vm0, %v7214_v15, %v7215_v53  ;;  %v11721_v15 = vunpack.i.l.bf16 %v9321_v30 }
 0x2c2   :  { %v2523_v36 = vsel %vm2519_vm9, %v11717_v41, %v11623_v38  ;;  %6950 = vmatmul.msk.f32.vlgmr.msra.gmra.mxu0 %vm875_vm13, %v9384_v58  ;;  %v2287_v41 = vsel %vm2277_vm0, %v7284_v57, %v7285_v13  ;;  %v7459_v57 = vunpack.i.l.bf16 %v9298_v34 }
 0x2c3   :  { %2630 = vmatpush.msra.mxu3 %v2523_v36  ;;  %6951 = vmatmul.msk.f32.vlgmr.msra.gmra.mxu1 %vm875_vm13, %v9384_v58  ;;  %v9558_v62 = vpop.permute.xlu2 %7597  ;;  %v11719_v36 = vunpack.i.l.bf16 %v9199_v48 }
 0x2c4   :  { %6952 = vmatmul.msk.f32.vlgmr.msra.gmra.mxu2 %vm875_vm13, %v9384_v58  ;;  %2327 = vmatpush.msra.mxu0 %v2286_v7  ;;  %v2279_v7 = vsel %vm2277_vm0, %v7215_v53, %v7249_v21  ;;  %v2535_v53 = vsel %vm2519_vm9, %v11721_v15, %v7540_v27  ;;  %v11722_v27 = vunpack.i.h.bf16 %v9199_v48  ;;  %v11723_v15 = vunpack.i.l.bf16 %v9157_v28  ;;  %v9617_v48 = vld [vmem:[%s11559_s4 + $0x1c] sm:$0x7] }
 0x2c5   :  { %v2288_v38 = vsel %vm2277_vm0, %v7285_v13, %v11719_v36  ;;  %2347 = vmatpush.msra.mxu1 %v2287_v41  ;;  %v11720_v13 = vunpack.i.h.bf16 %v11702_v47  ;;  %v7460_v41 = vunpack.i.h.bf16 %v9298_v34  ;;  %v11626_v36 = vunpack.i.h.bf16 %v9302_v51 }
 0x2c6   :  { %2367 = vmatpush.msra.mxu2 %v2288_v38  ;;  %7782 = vrot.lane.b32.xlu0 %v9369_v22, %s8261_s23  ;;  %v7350_v34 = vunpack.i.h.bf16 %v11698_v14  ;;  %v7414_v47 = vunpack.i.l.bf16 %v9143_v1  ;;  %v11724_v28 = vunpack.i.l.bf16 %v11698_v14 }
 0x2c7   :  { %7762 = vrot.lane.b32.xlu2 %v9556_v40, %s8262_s24  ;;  %2328 = vmatpush.msra.mxu0 %v2278_v3  ;;  %v2280_v38 = vsel %vm2277_vm0, %v7249_v21, %v11720_v13  ;;  %v2527_v21 = vsel %vm2519_vm9, %v11626_v36, %v7519_v0  ;;  %v7575_v13 = vunpack.i.h.bf16 %v9540_v63  ;;  %v2291_v0 = vsel %vm2277_vm0, %v7459_v57, %v7460_v41 }
 0x2c8   :  { %2348 = vmatpush.msra.mxu1 %v2279_v7  ;;  %2368 = vmatpush.msra.mxu2 %v2280_v38  ;;  %v9586_v5 = vpop.permute.xlu1 %7562  ;;  %v2290_v7 = vsel %vm2277_vm0, %v11722_v27, %v7459_v57  ;;  %v7574_v38 = vunpack.i.l.bf16 %v9540_v63  ;;  %v7550_v27 = vunpack.i.h.bf16 %v9536_v16  ;;  %v2283_v57 = vsel %vm2277_vm0, %v7350_v34, %v7414_v47  ;;  %v9825_v63 = vld [vmem:[%s11559_s4 + $0x24] sm:$0x7] }
 0x2c9   :  { %6966 = vmatmul.msk.f32.vlgmr.msrb.gmra.mxu3 %vm875_vm13, %v9507_v46  ;;  %7772 = vrot.lane.b32.xlu1 %v9401_v49, %s8261_s23  ;;  %v9590_v3 = vpop.permute.xlu0 %7587  ;;  %v11627_v36 = vunpack.i.l.bf16 %v9371_v26 }
 0x2ca   :  { %2709 = vmatpush.msrb.mxu3 %v2535_v53  ;;  %6954 = vmatmul.msk.f32.vlgmr.msrb.gmra.mxu0 %vm875_vm13, %v9384_v58  ;;  %v2292_v53 = vsel %vm2277_vm0, %v7460_v41, %v11723_v15  ;;  %v7520_v41 = vunpack.i.h.bf16 %v9413_v37  ;;  %v7525_v15 = vunpack.i.h.bf16 %v9260_v32  ;;  %v2773_v14 = vsel %vm2761_vm14, %v7574_v38, %v7575_v13 }
 0x2cb   :  { %6955 = vmatmul.msk.f32.vlgmr.msrb.gmra.mxu1 %vm875_vm13, %v9384_v58  ;;  %2407 = vmatpush.msrb.mxu0 %v2290_v7  ;;  %v11725_v7 = vunpack.i.h.bf16 %v9143_v1 }
 0x2cc   :  { %2710 = vmatpush.msrb.mxu3 %v2527_v21  ;;  %6956 = vmatmul.msk.f32.vlgmr.msrb.gmra.mxu2 %vm875_vm13, %v9384_v58  ;;  %v9612_v21 = vpop.permute.xlu2 %7612  ;;  %v2282_v58 = vsel %vm2277_vm0, %v11724_v28, %v7350_v34  ;;  %v7464_v34 = vunpack.i.l.bf16 %v9246_v8  ;;  %v2765_v28 = vsel %vm2761_vm14, %v7550_v27, %v11627_v36  ;;  %v7534_v36 = vunpack.i.l.bf16 %v9472_v10 }
 0x2cd   :  { %2427 = vmatpush.msrb.mxu1 %v2291_v0  ;;  %2447 = vmatpush.msrb.mxu2 %v2292_v53  ;;  %v2284_v0 = vsel %vm2277_vm0, %v7414_v47, %v11725_v7  ;;  %v7524_v53 = vunpack.i.l.bf16 %v9260_v32  ;;  %v7465_v32 = vunpack.i.h.bf16 %v9246_v8  ;;  %v7469_v47 = vunpack.i.l.bf16 %v9349_v31 }
 0x2ce   :  { %7797 = vrot.lane.b32.xlu0 %v9434_v61, %s8261_s23  ;;  %2408 = vmatpush.msrb.mxu0 %v2282_v58  ;;  %v11629_v8 = vunpack.i.l.bf16 %v9494_v35 }
 0x2cf   :  { %7777 = vrot.lane.b32.xlu2 %v9438_v25, %s8261_s23  ;;  %2428 = vmatpush.msrb.mxu1 %v2283_v57  ;;  %v2528_v58 = vsel %vm2519_vm9, %v7520_v41, %v7524_v53  ;;  %v7585_v57 = vunpack.i.h.bf16 %v9494_v35  ;;  %v2529_v7 = vsel %vm2519_vm9, %v7524_v53, %v7525_v15  ;;  %v2520_v41 = vsel %vm2519_vm9, %v7464_v34, %v7465_v32 }
 0x2d0   :  { %2448 = vmatpush.msrb.mxu2 %v2284_v0  ;;  %v9642_v1 = vpop.permute.xlu1 %7577  ;;  %v11726_v0 = vunpack.i.l.bf16 %v9353_v11 }
 0x2d1   :  { %6971 = vmatmul.msk.f32.vlgmr.msra.gmra.mxu3 %vm875_vm13, %v9617_v48  ;;  %7787 = vrot.lane.b32.xlu1 %v9463_v19, %s8261_s23  ;;  %v9646_v37 = vpop.permute.xlu0 %7602 }
 0x2d2   :  { %2871 = vmatpush.msra.mxu3 %v2773_v14  ;;  %6959 = vmatmul.msk.f32.vlgmr.msra.gmra.mxu0 %vm875_vm13, %v9507_v46  ;;  %v2530_v14 = vsel %vm2519_vm9, %v7525_v15, %v11726_v0  ;;  %v11727_v15 = vunpack.i.h.bf16 %v9349_v31  ;;  %v7535_v0 = vunpack.i.h.bf16 %v9472_v10  ;;  %v7514_v10 = vunpack.i.l.bf16 %v9302_v51 }
 0x2d3   :  { %6960 = vmatmul.msk.f32.vlgmr.msra.gmra.mxu1 %vm875_vm13, %v9507_v46  ;;  %2569 = vmatpush.msra.mxu0 %v2528_v58  ;;  %v2521_v58 = vsel %vm2519_vm9, %v7465_v32, %v7469_v47  ;;  %v2777_v32 = vsel %vm2761_vm14, %v11629_v8, %v7585_v57 }
 0x2d4   :  { %2872 = vmatpush.msra.mxu3 %v2765_v28  ;;  %6961 = vmatmul.msk.f32.vlgmr.msra.gmra.mxu2 %vm875_vm13, %v9507_v46  ;;  %v7564_v28 = vunpack.i.l.bf16 %v9586_v5 }
 0x2d5   :  { %2589 = vmatpush.msra.mxu1 %v2529_v7  ;;  %2609 = vmatpush.msra.mxu2 %v2530_v14  ;;  %v9676_v53 = vpop.permute.xlu2 %7627  ;;  %v2522_v7 = vsel %vm2519_vm9, %v7469_v47, %v11727_v15  ;;  %v11628_v14 = vunpack.i.h.bf16 %v9476_v23  ;;  %v11728_v15 = vunpack.i.h.bf16 %v9353_v11  ;;  %v9720_v11 = vld [vmem:[%s11559_s4 + $0x20] sm:$0x7] }
 0x2d6   :  { %7812 = vrot.lane.b32.xlu0 %v9319_v6, %s8299_s18  ;;  %2570 = vmatpush.msra.mxu0 %v2520_v41  ;;  %v7510_v41 = vunpack.i.h.bf16 %v9214_v45 }
 0x2d7   :  { %7792 = vrot.lane.b32.xlu2 %v9492_v59, %s8261_s23  ;;  %2590 = vmatpush.msra.mxu1 %v2521_v58  ;;  %v2769_v47 = vsel %vm2761_vm14, %v11628_v14, %v7564_v28  ;;  %v2533_v28 = vsel %vm2519_vm9, %v7534_v36, %v7535_v0  ;;  %v11729_v14 = vunpack.i.l.bf16 %v9321_v30  ;;  %v11730_v30 = vunpack.i.l.bf16 %v9214_v45 }
 0x2d8   :  { %2610 = vmatpush.msra.mxu2 %v2522_v7  ;;  %v9689_v34 = vpop.permute.xlu1 %7592  ;;  %v2532_v7 = vsel %vm2519_vm9, %v11728_v15, %v7534_v36  ;;  %v2525_v36 = vsel %vm2519_vm9, %v7510_v41, %v7514_v10 }
 0x2d9   :  { %6975 = vmatmul.msk.f32.vlgmr.msrb.gmra.mxu3 %vm875_vm13, %v9617_v48  ;;  %7802 = vrot.lane.b32.xlu1 %v9524_v4, %s8261_s23  ;;  %v9694_v31 = vpop.permute.xlu0 %7617  ;;  %v2534_v8 = vsel %vm2519_vm9, %v7535_v0, %v11729_v14  ;;  %v7569_v0 = vunpack.i.l.bf16 %v9440_v12  ;;  %v11731_v14 = vunpack.i.h.bf16 %v9302_v51  ;;  %v7595_v15 = vunpack.i.h.bf16 %v9689_v34 }
 0x2da   :  { %2951 = vmatpush.msrb.mxu3 %v2777_v32  ;;  %6963 = vmatmul.msk.f32.vlgmr.msrb.gmra.mxu0 %vm875_vm13, %v9507_v46  ;;  %v7620_v57 = vunpack.i.h.bf16 %v9694_v31  ;;  %v7619_v58 = vunpack.i.l.bf16 %v9694_v31  ;;  %v9709_v32 = vpop.f32.mrf.mxu3  ;;  %v7544_v51 = vunpack.i.l.bf16 %v9417_v33 }
 0x2db   :  { %6964 = vmatmul.msk.f32.vlgmr.msrb.gmra.mxu1 %vm875_vm13, %v9507_v46  ;;  %2649 = vmatpush.msrb.mxu0 %v2532_v7  ;;  %v2526_v45 = vsel %vm2519_vm9, %v7514_v10, %v11731_v14  ;;  %v11630_v10 = vunpack.i.l.bf16 %v9558_v62  ;;  %v7629_v14 = vunpack.i.l.bf16 %v9676_v53 }
 0x2dc   :  { %2952 = vmatpush.msrb.mxu3 %v2769_v47  ;;  %6965 = vmatmul.msk.f32.vlgmr.msrb.gmra.mxu2 %vm875_vm13, %v9507_v46  ;;  %v7565_v47 = vunpack.i.h.bf16 %v9586_v5  ;;  %v2524_v46 = vsel %vm2519_vm9, %v11730_v30, %v7510_v41  ;;  %v7570_v5 = vunpack.i.h.bf16 %v9440_v12  ;;  %v7549_v12 = vunpack.i.l.bf16 %v9536_v16 }
 0x2dd   :  { %2669 = vmatpush.msrb.mxu1 %v2533_v28  ;;  %2689 = vmatpush.msrb.mxu2 %v2534_v8  ;;  %v3015_v8 = vsel %vm3003_vm15, %v7619_v58, %v7620_v57  ;;  %v7545_v28 = vunpack.i.h.bf16 %v9417_v33  ;;  %v7555_v16 = vunpack.i.h.bf16 %v9371_v26 }
 0x2de   :  { %7827 = vrot.lane.b32.xlu0 %v9369_v22, %s8299_s18  ;;  %2650 = vmatpush.msrb.mxu0 %v2524_v46  ;;  %v2770_v30 = vsel %vm2761_vm14, %v7565_v47, %v7569_v0  ;;  %v2771_v46 = vsel %vm2761_vm14, %v7569_v0, %v7570_v5  ;;  %v3007_v0 = vsel %vm3003_vm15, %v7595_v15, %v11630_v10 }
 0x2df   :  { %7807 = vrot.lane.b32.xlu2 %v9556_v40, %s8261_s23  ;;  %2670 = vmatpush.msrb.mxu1 %v2525_v36  ;;  %v2772_v36 = vsel %vm2761_vm14, %v7570_v5, %v7574_v38  ;;  %v11632_v5 = vunpack.i.h.bf16 %v9646_v37 }
 0x2e0   :  { %2690 = vmatpush.msrb.mxu2 %v2526_v45  ;;  %v9744_v41 = vpop.permute.xlu2 %7642  ;;  %v9746_v7 = vpop.permute.xlu1 %7607  ;;  %v2762_v45 = vsel %vm2761_vm14, %v7544_v51, %v7545_v28 }
 0x2e1   :  { %6980 = vmatmul.msk.f32.vlgmr.msra.gmra.mxu3 %vm875_vm13, %v9720_v11  ;;  %7817 = vrot.lane.b32.xlu1 %v9401_v49, %s8299_s18  ;;  %v9763_v33 = vpop.permute.xlu0 %7632  ;;  %v7609_v47 = vunpack.i.l.bf16 %v9746_v7 }
 0x2e2   :  { %3113 = vmatpush.msra.mxu3 %v3015_v8  ;;  %6968 = vmatmul.msk.f32.vlgmr.msra.gmra.mxu0 %vm875_vm13, %v9617_v48  ;;  %v7630_v8 = vunpack.i.h.bf16 %v9676_v53 }
 0x2e3   :  { %6969 = vmatmul.msk.f32.vlgmr.msra.gmra.mxu1 %vm875_vm13, %v9617_v48  ;;  %2811 = vmatpush.msra.mxu0 %v2770_v30  ;;  %v2763_v30 = vsel %vm2761_vm14, %v7545_v28, %v7549_v12  ;;  %v3011_v28 = vsel %vm3003_vm15, %v11632_v5, %v7609_v47  ;;  %v11732_v47 = vunpack.i.l.bf16 %v9494_v35  ;;  %v11733_v35 = vunpack.i.l.bf16 %v9371_v26 }
 0x2e4   :  { %6970 = vmatmul.msk.f32.vlgmr.msra.gmra.mxu2 %vm875_vm13, %v9617_v48  ;;  %2831 = vmatpush.msra.mxu1 %v2771_v46  ;;  %v7579_v46 = vunpack.i.l.bf16 %v9642_v1  ;;  %v3019_v51 = vsel %vm3003_vm15, %v7629_v14, %v7630_v8 }
 0x2e5   :  { %2851 = vmatpush.msra.mxu2 %v2772_v36  ;;  %3114 = vmatpush.msra.mxu3 %v3007_v0  ;;  %v9775_v38 = vpop.f32.mrf.mxu3  ;;  %v2764_v36 = vsel %vm2761_vm14, %v7549_v12, %v7550_v27  ;;  %v7580_v0 = vunpack.i.h.bf16 %v9642_v1  ;;  %v7559_v27 = vunpack.i.l.bf16 %v9476_v23  ;;  %v9812_v12 = vpop.f32.mrf.mxu0 }
 0x2e6   :  { %7842 = vrot.lane.b32.xlu0 %v9434_v61, %s8299_s18  ;;  %2812 = vmatpush.msra.mxu0 %v2762_v45  ;;  %v2774_v1 = vsel %vm2761_vm14, %v7575_v13, %v7579_v46 }
 0x2e7   :  { %7822 = vrot.lane.b32.xlu2 %v9438_v25, %s8299_s18  ;;  %2832 = vmatpush.msra.mxu1 %v2763_v30  ;;  %v2775_v8 = vsel %vm2761_vm14, %v7579_v46, %v7580_v0  ;;  %v2776_v30 = vsel %vm2761_vm14, %v7580_v0, %v11732_v47  ;;  %v2766_v46 = vsel %vm2761_vm14, %v11733_v35, %v7555_v16  ;;  %v7590_v47 = vunpack.i.h.bf16 %v9590_v3 }
 0x2e8   :  { %2852 = vmatpush.msra.mxu2 %v2764_v36  ;;  %v9794_v10 = vpop.permute.xlu2 %7657  ;;  %v9799_v45 = vpop.permute.xlu1 %7622  ;;  %v2767_v0 = vsel %vm2761_vm14, %v7555_v16, %v7559_v27 }
 0x2e9   :  { %6984 = vmatmul.msk.f32.vlgmr.msrb.gmra.mxu3 %vm875_vm13, %v9720_v11  ;;  %7832 = vrot.lane.b32.xlu1 %v9463_v19, %s8299_s18  ;;  %v9820_v36 = vpop.f32.mrf.mxu1 }
 0x2ea   :  { %3193 = vmatpush.msrb.mxu3 %v3019_v51  ;;  %6972 = vmatmul.msk.f32.vlgmr.msrb.gmra.mxu0 %vm875_vm13, %v9617_v48 }
 0x2eb   :  { %6973 = vmatmul.msk.f32.vlgmr.msrb.gmra.mxu1 %vm875_vm13, %v9617_v48  ;;  %2891 = vmatpush.msrb.mxu0 %v2774_v1  ;;  %v7614_v1 = vunpack.i.l.bf16 %v9612_v21 }
 0x2ec   :  { %3194 = vmatpush.msrb.mxu3 %v3011_v28  ;;  %6974 = vmatmul.msk.f32.vlgmr.msrb.gmra.mxu2 %vm875_vm13, %v9617_v48  ;;  %v7610_v48 = vunpack.i.h.bf16 %v9746_v7  ;;  %v7615_v28 = vunpack.i.h.bf16 %v9612_v21  ;;  %v11734_v7 = vunpack.i.h.bf16 %v9476_v23  ;;  %v7594_v21 = vunpack.i.l.bf16 %v9689_v34 }
 0x2ed   :  { %2911 = vmatpush.msrb.mxu1 %v2775_v8  ;;  %2931 = vmatpush.msrb.mxu2 %v2776_v30  ;;  %v9827_v13 = vpop.permute.xlu0 %7647  ;;  %v9829_v51 = vpop.f32.mrf.mxu3  ;;  %v7589_v30 = vunpack.i.l.bf16 %v9590_v3 }
 0x2ee   :  { %7857 = vrot.lane.b32.xlu0 %v9319_v6, %s8300_s22  ;;  %2892 = vmatpush.msrb.mxu0 %v2766_v46  ;;  %v2768_v8 = vsel %vm2761_vm14, %v7559_v27, %v11734_v7  ;;  %v3012_v23 = vsel %vm3003_vm15, %v7610_v48, %v7614_v1  ;;  %v9859_v27 = vpop.f32.mrf.mxu2  ;;  %v3013_v3 = vsel %vm3003_vm15, %v7614_v1, %v7615_v28 }
 0x2ef   :  { %7837 = vrot.lane.b32.xlu2 %v9492_v59, %s8299_s18  ;;  %2912 = vmatpush.msrb.mxu1 %v2767_v0  ;;  %v3014_v35 = vsel %vm3003_vm15, %v7615_v28, %v7619_v58  ;;  %v3004_v48 = vsel %vm3003_vm15, %v7589_v30, %v7590_v47  ;;  %v3005_v0 = vsel %vm3003_vm15, %v7590_v47, %v7594_v21  ;;  %v7624_v58 = vunpack.i.l.bf16 %v9799_v45 }
 0x2f0   :  { %2932 = vmatpush.msrb.mxu2 %v2768_v8  ;;  %v9849_v26 = vpop.permute.xlu2 %7672  ;;  %v3006_v1 = vsel %vm3003_vm15, %v7594_v21, %v7595_v15  ;;  %v7625_v30 = vunpack.i.h.bf16 %v9799_v45  ;;  %v7600_v21 = vunpack.i.h.bf16 %v9558_v62 }
 0x2f1   :  { %6989 = vmatmul.msk.f32.vlgmr.msra.gmra.mxu3 %vm875_vm13, %v9825_v63  ;;  %7847 = vrot.lane.b32.xlu1 %v9524_v4, %s8299_s18  ;;  %v7675_v5 = vunpack.i.h.bf16 %v9849_v26 }
 0x2f2   :  { %6977 = vmatmul.msk.f32.vlgmr.msra.gmra.mxu0 %vm875_vm13, %v9720_v11  ;;  %v9857_v16 = vpop.permute.xlu1 %7637 }
 0x2f3   :  { %6978 = vmatmul.msk.f32.vlgmr.msra.gmra.mxu1 %vm875_vm13, %v9720_v11  ;;  %3053 = vmatpush.msra.mxu0 %v3012_v23  ;;  %v11736_v53 = vunpack.i.h.bf16 %v9857_v16 }
 0x2f4   :  { %6979 = vmatmul.msk.f32.vlgmr.msra.gmra.mxu2 %vm875_vm13, %v9720_v11  ;;  %3073 = vmatpush.msra.mxu1 %v3013_v3 }
 0x2f5   :  { %3093 = vmatpush.msra.mxu2 %v3014_v35  ;;  %3054 = vmatpush.msra.mxu0 %v3004_v48  ;;  %v9870_v46 = vpop.f32.mrf.mxu0  ;;  %v9880_v7 = vpop.f32.mrf.mxu1  ;;  %v7604_v35 = vunpack.i.l.bf16 %v9646_v37  ;;  %v3016_v48 = vsel %vm3003_vm15, %v7620_v57, %v7624_v58 }
 0x2f6   :  { %7872 = vrot.lane.b32.xlu0 %v9369_v22, %s8300_s22  ;;  %11735 = vst [vmem:[#allocation4_spill] sm:$0xff] %v9880_v7  ;;  %3074 = vmatpush.msra.mxu1 %v3005_v0  ;;  %v9885_v8 = vpop.f32.mrf.mxu3  ;;  %v11633_v0 = vunpack.i.l.bf16 %v9744_v41 }
 0x2f7   :  { %7852 = vrot.lane.b32.xlu2 %v9556_v40, %s8299_s18  ;;  %3094 = vmatpush.msra.mxu2 %v3006_v1  ;;  %v9883_v28 = vpop.permute.xlu0 %7662  ;;  %v3017_v1 = vsel %vm3003_vm15, %v7624_v58, %v7625_v30 }
 0x2f8   :  { %v11631_v47 = vunpack.i.h.bf16 %v9883_v28  ;;  %v7664_v34 = vunpack.i.l.bf16 %v9883_v28  ;;  %v9892_v15 = vpop.permute.xlu2 %7687 }
 0x2f9   :  { %6993 = vmatmul.msk.f32.vlgmr.msrb.gmra.mxu3 %vm875_vm13, %v9825_v63  ;;  %7862 = vrot.lane.b32.xlu1 %v9401_v49, %s8300_s22 }
 0x2fa   :  { %v3257_v45 = vsel %vm3245_vm1, %v7664_v34, %v11631_v47  ;;  %6981 = vmatmul.msk.f32.vlgmr.msrb.gmra.mxu0 %vm875_vm13, %v9720_v11  ;;  %v7653_v3 = vpop.permute.xlu1 %7652  ;;  %v3018_v47 = vsel %vm3003_vm15, %v7625_v30, %v7629_v14  ;;  %v11737_v14 = vunpack.i.l.bf16 %v9558_v62  ;;  %v9935_v30 = vld [vmem:[%s11559_s4 + $0x28] sm:$0x7]  ;;  %v7660_v62 = vunpack.i.h.bf16 %v9794_v10 }
 0x2fb   :  { %3355 = vmatpush.msra.mxu3 %v3257_v45  ;;  %6982 = vmatmul.msk.f32.vlgmr.msrb.gmra.mxu1 %vm875_vm13, %v9720_v11  ;;  %v7654_v57 = vunpack.i.l.bf16 %v7653_v3  ;;  %v7655_v23 = vunpack.i.h.bf16 %v7653_v3  ;;  %v3009_v3 = vsel %vm3003_vm15, %v7600_v21, %v7604_v35 }
 0x2fc   :  { %6983 = vmatmul.msk.f32.vlgmr.msrb.gmra.mxu2 %vm875_vm13, %v9720_v11  ;;  %3133 = vmatpush.msrb.mxu0 %v3016_v48  ;;  %v9916_v45 = vpop.f32.mrf.mxu2  ;;  %v3249_v11 = vsel %vm3245_vm1, %v11736_v53, %v11633_v0  ;;  %v3008_v58 = vsel %vm3003_vm15, %v11737_v14, %v7600_v21  ;;  %v11738_v48 = vunpack.i.h.bf16 %v9646_v37  ;;  %v7659_v14 = vunpack.i.l.bf16 %v9794_v10 }
 0x2fd   :  { %3153 = vmatpush.msrb.mxu1 %v3017_v1  ;;  %3173 = vmatpush.msrb.mxu2 %v3018_v47  ;;  %v11634_v47 = vunpack.i.h.bf16 %v9827_v13  ;;  %v11739_v21 = vunpack.i.l.bf16 %v9849_v26 }
 0x2fe   :  { %7887 = vrot.lane.b32.xlu0 %v9434_v61, %s8300_s22  ;;  %3356 = vmatpush.msra.mxu3 %v3249_v11  ;;  %v3010_v1 = vsel %vm3003_vm15, %v7604_v35, %v11738_v48  ;;  %v7639_v48 = vunpack.i.l.bf16 %v9857_v16 }
 0x2ff   :  { %7867 = vrot.lane.b32.xlu2 %v9438_v25, %s8300_s22  ;;  %3134 = vmatpush.msrb.mxu0 %v3008_v58  ;;  %v9942_v53 = vpop.f32.mrf.mxu0  ;;  %v3261_v37 = vsel %vm3245_vm1, %v11739_v21, %v7675_v5  ;;  %v3253_v10 = vsel %vm3245_vm1, %v11634_v47, %v7654_v57  ;;  %v7635_v58 = vunpack.i.h.bf16 %v9763_v33  ;;  %v3254_v5 = vsel %vm3245_vm1, %v7655_v23, %v7659_v14 }
 0x300   :  { %3154 = vmatpush.msrb.mxu1 %v3009_v3  ;;  %3174 = vmatpush.msrb.mxu2 %v3010_v1  ;;  %v9946_v0 = vpop.permute.xlu0 %7677  ;;  %v9948_v31 = vpop.permute.xlu2 %7702  ;;  %v7634_v3 = vunpack.i.l.bf16 %v9763_v33  ;;  %v3255_v1 = vsel %vm3245_vm1, %v7659_v14, %v7660_v62  ;;  %v3256_v33 = vsel %vm3245_vm1, %v7660_v62, %v7664_v34  ;;  %v11740_v14 = vunpack.i.h.bf16 %v9857_v16 }
 0x301   :  { %6998 = vmatmul.msk.f32.vlgmr.msra.gmra.mxu3 %vm875_vm13, %v9935_v30  ;;  %v9955_v35 = vpop.f32.mrf.mxu1  ;;  %v9957_v11 = vpop.f32.mrf.mxu3  ;;  %7877 = vrot.lane.b32.xlu1 %v9463_v19, %s8300_s22  ;;  %v7649_v16 = vunpack.i.l.bf16 %v9827_v13 }
 0x302   :  { %3435 = vmatpush.msrb.mxu3 %v3261_v37  ;;  %6986 = vmatmul.msk.f32.vlgmr.msra.gmra.mxu0 %vm875_vm13, %v9825_v63  ;;  %v3246_v23 = vsel %vm3245_vm1, %v7634_v3, %v7635_v58  ;;  %v3247_v37 = vsel %vm3245_vm1, %v7635_v58, %v7639_v48  ;;  %v3248_v34 = vsel %vm3245_vm1, %v7639_v48, %v11740_v14 }
 0x303   :  { %6987 = vmatmul.msk.f32.vlgmr.msra.gmra.mxu1 %vm875_vm13, %v9825_v63  ;;  %3295 = vmatpush.msra.mxu0 %v3254_v5  ;;  %v7668_v57 = vpop.permute.xlu1 %7667 }
 0x304   :  { %3436 = vmatpush.msrb.mxu3 %v3253_v10  ;;  %6988 = vmatmul.msk.f32.vlgmr.msra.gmra.mxu2 %vm875_vm13, %v9825_v63  ;;  %v7669_v21 = vunpack.i.l.bf16 %v7668_v57  ;;  %v7670_v5 = vunpack.i.h.bf16 %v7668_v57 }
 0x305   :  { %3315 = vmatpush.msra.mxu1 %v3255_v1  ;;  %3335 = vmatpush.msra.mxu2 %v3256_v33  ;;  %v7645_v33 = vunpack.i.h.bf16 %v9744_v41 }
 0x306   :  { %7902 = vrot.lane.b32.xlu0 %v9319_v6, %s8265_s11  ;;  %v1168_v10 = vpop.f32.mrf.mxu2  ;;  %3296 = vmatpush.msra.mxu0 %v3246_v23  ;;  %v3259_v23 = vsel %vm3245_vm1, %v7669_v21, %v7670_v5 }
 0x307   :  { %7882 = vrot.lane.b32.xlu2 %v9492_v59, %s8300_s22  ;;  %3316 = vmatpush.msra.mxu1 %v3247_v37  ;;  %v9986_v62 = vadd.f32 %v1168_v10, %v9859_v27  ;;  %v9988_v1 = vpop.f32.mrf.mxu0  ;;  %v11743_v27 = vunpack.i.h.bf16 %v9883_v28  ;;  %v11745_v10 = vunpack.i.l.bf16 %v9849_v26  ;;  %v11746_v28 = vunpack.i.l.bf16 %v9744_v41 }
 0x308   :  { %11741 = vst [vmem:[#allocation6_spill] sm:$0xff] %v9988_v1  ;;  %3336 = vmatpush.msra.mxu2 %v3248_v34  ;;  %v9991_v47 = vpop.permute.xlu0 %7692  ;;  %v9993_v3 = vpop.permute.xlu2 %7717  ;;  %v7704_v41 = vunpack.i.l.bf16 %v9948_v31 }
 0x309   :  { %7002 = vmatmul.msk.f32.vlgmr.msrb.gmra.mxu3 %vm875_vm13, %v9935_v30  ;;  %v9997_v58 = vpop.f32.mrf.mxu1  ;;  %7892 = vrot.lane.b32.xlu1 %v9524_v4, %s8300_s22  ;;  %v3258_v48 = vsel %vm3245_vm1, %v11743_v27, %v7669_v21  ;;  %v3260_v14 = vsel %vm3245_vm1, %v7670_v5, %v11745_v10  ;;  %v3250_v34 = vsel %vm3245_vm1, %v11746_v28, %v7645_v33  ;;  %v7705_v5 = vunpack.i.h.bf16 %v9948_v31 }
 0x30a   :  { %11742 = vst [vmem:[#allocation29_spill] sm:$0xff] %v9997_v58  ;;  %6990 = vmatmul.msk.f32.vlgmr.msrb.gmra.mxu0 %vm875_vm13, %v9825_v63  ;;  %v3251_v21 = vsel %vm3245_vm1, %v7645_v33, %v7649_v16  ;;  %v7720_v31 = vunpack.i.h.bf16 %v9993_v3 }
 0x30b   :  { %v10007_v57 = vpop.f32.mrf.mxu3  ;;  %6991 = vmatmul.msk.f32.vlgmr.msrb.gmra.mxu1 %vm875_vm13, %v9825_v63  ;;  %3375 = vmatpush.msrb.mxu0 %v3258_v48  ;;  %v7683_v37 = vpop.permute.xlu1 %7682 }
 0x30c   :  { %11744 = vst [vmem:[#allocation17_spill] sm:$0xff] %v10007_v57  ;;  %6992 = vmatmul.msk.f32.vlgmr.msrb.gmra.mxu2 %vm875_vm13, %v9825_v63  ;;  %3395 = vmatpush.msrb.mxu1 %v3259_v23  ;;  %v11747_v63 = vunpack.i.h.bf16 %v9827_v13  ;;  %v7685_v28 = vunpack.i.h.bf16 %v7683_v37  ;;  %v10066_v57 = vld [vmem:[%s11559_s4 + $0x2c] sm:$0x7] }
 0x30d   :  { %3415 = vmatpush.msrb.mxu2 %v3260_v14  ;;  %3376 = vmatpush.msrb.mxu0 %v3250_v34  ;;  %v7684_v34 = vunpack.i.l.bf16 %v7683_v37 }
 0x30e   :  { %7917 = vrot.lane.b32.xlu0 %v9369_v22, %s8265_s11  ;;  %v3252_v26 = vsel %vm3245_vm1, %v7649_v16, %v11747_v63  ;;  %3396 = vmatpush.msrb.mxu1 %v3251_v21 }
 0x30f   :  { %7897 = vrot.lane.b32.xlu2 %v9556_v40, %s8300_s22  ;;  %3416 = vmatpush.msrb.mxu2 %v3252_v26  ;;  %v1248_v27 = vpop.f32.mrf.mxu2  ;;  %v10030_v48 = vpop.f32.mrf.mxu0  ;;  %v3497_v26 = vsel %vm3487_vm4, %v7704_v41, %v7705_v5 }
 0x310   :  { %11748 = vst [vmem:[#allocation12_spill] sm:$0xff] %v10030_v48  ;;  %v10032_v23 = vpop.permute.xlu0 %7707  ;;  %v10034_v10 = vpop.permute.xlu2 %7732  ;;  %v10037_v14 = vadd.f32 %v1248_v27, %v9916_v45  ;;  %v7680_v45 = vunpack.i.h.bf16 %v9946_v0 }
 0x311   :  { %v11635_v13 = vunpack.i.h.bf16 %v10032_v23  ;;  %v7709_v33 = vunpack.i.l.bf16 %v10032_v23  ;;  %v10041_v16 = vpop.f32.mrf.mxu1  ;;  %7907 = vrot.lane.b32.xlu1 %v9401_v49, %s8265_s11 }
 0x312   :  { %11749 = vst [vmem:[#allocation28_spill] sm:$0xff] %v10041_v16  ;;  %6995 = vmatmul.msk.f32.vlgmr.msra.gmra.mxu0 %vm875_vm13, %v9935_v30  ;;  %v7719_v16 = vunpack.i.l.bf16 %v9993_v3  ;;  %v11751_v3 = vunpack.i.l.bf16 %v9892_v15 }
 0x313   :  { %v10049_v21 = vpop.f32.mrf.mxu3  ;;  %v3499_v63 = vsel %vm3487_vm4, %v7709_v33, %v11635_v13  ;;  %6996 = vmatmul.msk.f32.vlgmr.msra.gmra.mxu1 %vm875_vm13, %v9935_v30  ;;  %v3498_v27 = vsel %vm3487_vm4, %v7705_v5, %v7709_v33  ;;  %v7698_v37 = vpop.permute.xlu1 %7697  ;;  %v7679_v13 = vunpack.i.l.bf16 %v9946_v0  ;;  %v7695_v5 = vunpack.i.h.bf16 %v9991_v47 }
 0x314   :  { %11750 = vst [vmem:[#allocation7_spill] sm:$0xff] %v10049_v21  ;;  %3597 = vmatpush.msra.mxu3 %v3499_v63  ;;  %6997 = vmatmul.msk.f32.vlgmr.msra.gmra.mxu2 %vm875_vm13, %v9935_v30  ;;  %v7700_v21 = vunpack.i.h.bf16 %v7698_v37  ;;  %v7699_v48 = vunpack.i.l.bf16 %v7698_v37  ;;  %v3491_v33 = vsel %vm3487_vm4, %v7685_v28, %v11751_v3  ;;  %v3489_v0 = vsel %vm3487_vm4, %v7680_v45, %v7684_v34 }
 0x315   :  { %3557 = vmatpush.msra.mxu1 %v3497_v26  ;;  %3577 = vmatpush.msra.mxu2 %v3498_v27  ;;  %v3490_v26 = vsel %vm3487_vm4, %v7684_v34, %v7685_v28  ;;  %v3503_v58 = vsel %vm3487_vm4, %v7719_v16, %v7720_v31  ;;  %v3488_v28 = vsel %vm3487_vm4, %v7679_v13, %v7680_v45  ;;  %v7694_v13 = vunpack.i.l.bf16 %v9991_v47 }
 0x316   :  { %7932 = vrot.lane.b32.xlu0 %v9434_v61, %s8265_s11  ;;  %v3496_v63 = vsel %vm3487_vm4, %v7700_v21, %v7704_v41  ;;  %3598 = vmatpush.msra.mxu3 %v3491_v33  ;;  %v3495_v41 = vsel %vm3487_vm4, %v7695_v5, %v7699_v48  ;;  %v7690_v48 = vunpack.i.h.bf16 %v9892_v15  ;;  %v11752_v45 = vunpack.i.h.bf16 %v10032_v23 }
 0x317   :  { %7912 = vrot.lane.b32.xlu2 %v9438_v25, %s8265_s11  ;;  %3558 = vmatpush.msra.mxu1 %v3489_v0  ;;  %v1402_v27 = vpop.f32.mrf.mxu2  ;;  %v10079_v37 = vpop.f32.mrf.mxu0 }
 0x318   :  { %3578 = vmatpush.msra.mxu2 %v3490_v26  ;;  %7007 = vmatmul.msk.f32.vlgmr.msra.gmra.mxu3 %vm875_vm13, %v10066_v57  ;;  %v10084_v7 = vpop.permute.xlu0 %7722  ;;  %v10086_v3 = vpop.permute.xlu2 %7747  ;;  %v1507_v1 = vadd.f32 %v1402_v27, %v9986_v62  ;;  %v11753_v26 = vunpack.i.l.bf16 %v9892_v15  ;;  %v10154_v15 = vld [vmem:[%s11559_s4 + $0x30] sm:$0x7] }
 0x319   :  { %3677 = vmatpush.msrb.mxu3 %v3503_v58  ;;  %v10090_v21 = vpop.f32.mrf.mxu1  ;;  %3537 = vmatpush.msra.mxu0 %v3496_v63 }
 0x31a   :  { %7922 = vrot.lane.b32.xlu1 %v9463_v19, %s8265_s11  ;;  %6999 = vmatmul.msk.f32.vlgmr.msrb.gmra.mxu0 %vm875_vm13, %v9935_v30  ;;  %v3492_v27 = vsel %vm3487_vm4, %v11753_v26, %v7690_v48  ;;  %v11637_v26 = vunpack.i.l.bf16 %v10034_v10 }
 0x31b   :  { %v10097_v31 = vpop.f32.mrf.mxu3  ;;  %3678 = vmatpush.msrb.mxu3 %v3495_v41  ;;  %3538 = vmatpush.msra.mxu0 %v3488_v28  ;;  %v7713_v34 = vpop.permute.xlu1 %7712  ;;  %v3493_v41 = vsel %vm3487_vm4, %v7690_v48, %v7694_v13 }
 0x31c   :  { %7000 = vmatmul.msk.f32.vlgmr.msrb.gmra.mxu1 %vm875_vm13, %v9935_v30  ;;  %v7715_v62 = vunpack.i.h.bf16 %v7713_v34  ;;  %v7714_v58 = vunpack.i.l.bf16 %v7713_v34  ;;  %7001 = vmatmul.msk.f32.vlgmr.msrb.gmra.mxu2 %vm875_vm13, %v9935_v30 }
 0x31d   :  { %3770 = vmatpush.msra.mxu3 %v11704_v20 }
 0x31e   :  { %7947 = vrot.lane.b32.xlu0 %v9319_v6, %s8266_s16  ;;  %v3500_v20 = vsel %vm3487_vm4, %v11752_v45, %v7714_v58  ;;  %v3501_v33 = vsel %vm3487_vm4, %v7714_v58, %v7715_v62  ;;  %v3502_v0 = vsel %vm3487_vm4, %v7715_v62, %v7719_v16 }
 0x31f   :  { %3771 = vmatpush.msra.mxu3 %v11700_v18  ;;  %7927 = vrot.lane.b32.xlu2 %v9492_v59, %s8265_s11  ;;  %v1482_v63 = vpop.f32.mrf.mxu2  ;;  %v10116_v30 = vpop.f32.mrf.mxu0 }
 0x320   :  { %3617 = vmatpush.msrb.mxu0 %v3500_v20  ;;  %7011 = vmatmul.msk.f32.vlgmr.msrb.gmra.mxu3 %vm875_vm13, %v10066_v57  ;;  %v10120_v18 = vpop.permute.xlu0 %7737  ;;  %v1511_v23 = vadd.f32 %v1482_v63, %v10037_v14  ;;  %v3494_v14 = vsel %vm3487_vm4, %v7694_v13, %v7695_v5 }
 0x321   :  { %v10122_v47 = vpop.permute.xlu2 %7762  ;;  %3637 = vmatpush.msrb.mxu1 %v3501_v33  ;;  %3850 = vmatpush.msrb.mxu3 %v11718_v42  ;;  %v10126_v16 = vpop.f32.mrf.mxu1 }
 0x322   :  { %3657 = vmatpush.msrb.mxu2 %v3502_v0  ;;  %7937 = vrot.lane.b32.xlu1 %v9524_v4, %s8265_s11 }
 0x323   :  { %3618 = vmatpush.msrb.mxu0 %v3492_v27  ;;  %3851 = vmatpush.msrb.mxu3 %v11697_v55  ;;  %v10135_v28 = vpop.f32.mrf.mxu3  ;;  %v10138_v34 = vpop.permute.xlu1 %7727  ;;  %v7765_v27 = vunpack.i.h.bf16 %v10122_v47 }
 0x324   :  { %3638 = vmatpush.msrb.mxu1 %v3493_v41  ;;  %3658 = vmatpush.msrb.mxu2 %v3494_v14 }
 0x325   :  { %7004 = vmatmul.msk.f32.vlgmr.msra.gmra.mxu0 %vm875_vm13, %v10066_v57  ;;  %7005 = vmatmul.msk.f32.vlgmr.msra.gmra.mxu1 %vm875_vm13, %v10066_v57 }
 0x326   :  { %7006 = vmatmul.msk.f32.vlgmr.msra.gmra.mxu2 %vm875_vm13, %v10066_v57  ;;  %3710 = vmatpush.msra.mxu0 %v11709_v29 }
 0x327   :  { %3730 = vmatpush.msra.mxu1 %v11711_v54  ;;  %3750 = vmatpush.msra.mxu2 %v11712_v60  ;;  %v1644_v5 = vpop.f32.mrf.mxu2  ;;  %v10156_v62 = vpop.f32.mrf.mxu0 }
 0x328   :  { %7962 = vrot.lane.b32.xlu0 %v9369_v22, %s8266_s16  ;;  %7942 = vrot.lane.b32.xlu2 %v9556_v40, %s8265_s11  ;;  %v10161_v58 = vpop.permute.xlu0 %7752  ;;  %v10165_v13 = vadd.f32 %v1644_v5, %v1507_v1 }
 0x329   :  { %3711 = vmatpush.msra.mxu0 %v11693_v2  ;;  %v10163_v48 = vpop.permute.xlu2 %7777  ;;  %3731 = vmatpush.msra.mxu1 %v11694_v9  ;;  %v11636_v45 = vunpack.i.h.bf16 %v10161_v58  ;;  %v7754_v20 = vunpack.i.l.bf16 %v10161_v58  ;;  %v10171_v33 = vpop.f32.mrf.mxu1  ;;  %v11638_v2 = vunpack.i.h.bf16 %v10138_v34 }
 0x32a   :  { %3751 = vmatpush.msra.mxu2 %v11699_v44  ;;  %11754 = vst [vmem:[#allocation15_spill] sm:$0xff] %v10171_v33  ;;  %7016 = vmatmul.msk.f32.vlgmr.msra.gmra.mxu3 %vm875_vm13, %v10154_v15 }
 0x32b   :  { %7952 = vrot.lane.b32.xlu1 %v9401_v49, %s8266_s16  ;;  %v10178_v1 = vpop.f32.mrf.mxu3  ;;  %v3949_v0 = vsel %vm38_vm3, %v7754_v20, %v11636_v45  ;;  %v7743_v63 = vpop.permute.xlu1 %7742  ;;  %v7749_v45 = vunpack.i.l.bf16 %v10086_v3 }
 0x32c   :  { %11755 = vst [vmem:[#allocation23_spill] sm:$0xff] %v10178_v1  ;;  %4047 = vmatpush.msra.mxu3 %v3949_v0  ;;  %v7744_v14 = vunpack.i.l.bf16 %v7743_v63  ;;  %v7745_v33 = vunpack.i.h.bf16 %v7743_v63  ;;  %v11760_v63 = vunpack.i.h.bf16 %v10120_v18 }
 0x32d   :  { %7008 = vmatmul.msk.f32.vlgmr.msrb.gmra.mxu0 %vm875_vm13, %v10066_v57  ;;  %7009 = vmatmul.msk.f32.vlgmr.msrb.gmra.mxu1 %vm875_vm13, %v10066_v57 }
 0x32e   :  { %7010 = vmatmul.msk.f32.vlgmr.msrb.gmra.mxu2 %vm875_vm13, %v10066_v57  ;;  %3790 = vmatpush.msrb.mxu0 %v11705_v50  ;;  %v3941_v57 = vsel %vm38_vm3, %v11638_v2, %v11637_v26  ;;  %v7750_v2 = vunpack.i.h.bf16 %v10086_v3 }
 0x32f   :  { %3810 = vmatpush.msrb.mxu1 %v11713_v17  ;;  %3830 = vmatpush.msrb.mxu2 %v11714_v43  ;;  %v1724_v5 = vpop.f32.mrf.mxu2  ;;  %v10202_v0 = vpop.f32.mrf.mxu0 }
 0x330   :  { %7977 = vrot.lane.b32.xlu0 %v9434_v61, %s8266_s16  ;;  %11756 = vst [vmem:[#allocation27_spill] sm:$0xff] %v10202_v0  ;;  %7957 = vrot.lane.b32.xlu2 %v9438_v25, %s8266_s16  ;;  %v10207_v50 = vpop.permute.xlu0 %7767  ;;  %v10211_v1 = vadd.f32 %v1724_v5, %v1511_v23  ;;  %v7729_v0 = vunpack.i.l.bf16 %v10138_v34 }
 0x331   :  { %4048 = vmatpush.msra.mxu3 %v3941_v57  ;;  %v10209_v41 = vpop.permute.xlu2 %7792  ;;  %3791 = vmatpush.msrb.mxu0 %v11706_v39  ;;  %v10215_v26 = vpop.f32.mrf.mxu1  ;;  %v11759_v57 = vunpack.i.l.bf16 %v10122_v47  ;;  %v3945_v39 = vsel %vm38_vm3, %v11760_v63, %v7744_v14  ;;  %v3947_v14 = vsel %vm38_vm3, %v7749_v45, %v7750_v2 }
 0x332   :  { %11757 = vst [vmem:[#allocation24_spill] sm:$0xff] %v10211_v1  ;;  %3811 = vmatpush.msrb.mxu1 %v11707_v24  ;;  %3831 = vmatpush.msrb.mxu2 %v11696_v56  ;;  %v7725_v1 = vunpack.i.h.bf16 %v10084_v7 }
 0x333   :  { %11758 = vst [vmem:[#allocation10_spill] sm:$0xff] %v10215_v26  ;;  %7020 = vmatmul.msk.f32.vlgmr.msrb.gmra.mxu3 %vm875_vm13, %v10154_v15  ;;  %v3953_v23 = vsel %vm38_vm3, %v11759_v57, %v7765_v27  ;;  %v10228_v5 = vpop.f32.mrf.mxu3  ;;  %7967 = vrot.lane.b32.xlu1 %v9463_v19, %s8266_s16  ;;  %v7758_v3 = vpop.permute.xlu1 %7757  ;;  %v7724_v26 = vunpack.i.l.bf16 %v10084_v7  ;;  %v3946_v27 = vsel %vm38_vm3, %v7745_v33, %v7749_v45  ;;  %v10247_v7 = vld [vmem:[%s11559_s4 + $0x34] sm:$0x7] }
 0x334   :  { %4127 = vmatpush.msrb.mxu3 %v3953_v23  ;;  %11761 = vst [vmem:[#allocation19_spill] sm:$0xff] %v10228_v5  ;;  %v3948_v57 = vsel %vm38_vm3, %v7750_v2, %v7754_v20  ;;  %v3939_v20 = vsel %vm38_vm3, %v7725_v1, %v7729_v0 }
 0x335   :  { %7013 = vmatmul.msk.f32.vlgmr.msra.gmra.mxu0 %vm875_vm13, %v10154_v15  ;;  %7014 = vmatmul.msk.f32.vlgmr.msra.gmra.mxu1 %vm875_vm13, %v10154_v15  ;;  %v3938_v45 = vsel %vm38_vm3, %v7724_v26, %v7725_v1  ;;  %v7735_v26 = vunpack.i.h.bf16 %v10034_v10 }
 0x336   :  { %4128 = vmatpush.msrb.mxu3 %v3945_v39  ;;  %7015 = vmatmul.msk.f32.vlgmr.msra.gmra.mxu2 %vm875_vm13, %v10154_v15  ;;  %v7759_v39 = vunpack.i.l.bf16 %v7758_v3 }
 0x337   :  { %3987 = vmatpush.msra.mxu0 %v3946_v27  ;;  %4007 = vmatpush.msra.mxu1 %v3947_v14  ;;  %v1886_v23 = vpop.f32.mrf.mxu2  ;;  %v10249_v63 = vpop.f32.mrf.mxu0  ;;  %v7760_v14 = vunpack.i.h.bf16 %v7758_v3  ;;  %v7739_v3 = vunpack.i.l.bf16 %v10120_v18 }
 0x338   :  { %4027 = vmatpush.msra.mxu2 %v3948_v57  ;;  %11762 = vst [vmem:[#allocation13_spill] sm:$0xff] %v10249_v63  ;;  %7992 = vrot.lane.b32.xlu0 %v9319_v6, %s8267_s19  ;;  %v10257_v33 = vpop.permute.xlu0 %7782  ;;  %v10262_v27 = vadd.f32 %v1886_v23, %v10165_v13  ;;  %v11764_v57 = vunpack.i.h.bf16 %v10138_v34  ;;  %v11765_v34 = vunpack.i.h.bf16 %v10161_v58 }
 0x339   :  { %7972 = vrot.lane.b32.xlu2 %v9492_v59, %s8266_s16  ;;  %v10259_v2 = vpop.permute.xlu2 %7807  ;;  %3988 = vmatpush.msra.mxu0 %v3938_v45  ;;  %v10267_v5 = vpop.f32.mrf.mxu1  ;;  %v3951_v23 = vsel %vm38_vm3, %v7759_v39, %v7760_v14 }
 0x33a   :  { %11763 = vst [vmem:[#allocation18_spill] sm:$0xff] %v10262_v27  ;;  %4008 = vmatpush.msra.mxu1 %v3939_v20  ;;  %v3940_v63 = vsel %vm38_vm3, %v7729_v0, %v11764_v57  ;;  %v3950_v0 = vsel %vm38_vm3, %v11765_v34, %v7759_v39  ;;  %v11767_v20 = vunpack.i.l.bf16 %v10034_v10  ;;  %v7810_v27 = vunpack.i.h.bf16 %v10259_v2 }
 0x33b   :  { %4028 = vmatpush.msra.mxu2 %v3940_v63  ;;  %7025 = vmatmul.msk.f32.vlgmr.msra.gmra.mxu3 %vm875_vm13, %v10247_v7  ;;  %v10272_v1 = vpop.f32.mrf.mxu3  ;;  %v7773_v13 = vpop.permute.xlu1 %7772  ;;  %v11766_v63 = vunpack.i.l.bf16 %v10122_v47  ;;  %v3943_v47 = vsel %vm38_vm3, %v7735_v26, %v7739_v3 }
 0x33c   :  { %7982 = vrot.lane.b32.xlu1 %v9524_v4, %s8266_s16  ;;  %v3942_v58 = vsel %vm38_vm3, %v11767_v20, %v7735_v26  ;;  %v7775_v26 = vunpack.i.h.bf16 %v7773_v13  ;;  %v11639_v20 = vunpack.i.l.bf16 %v10163_v48 }
 0x33d   :  { %7017 = vmatmul.msk.f32.vlgmr.msrb.gmra.mxu0 %vm875_vm13, %v10154_v15  ;;  %7018 = vmatmul.msk.f32.vlgmr.msrb.gmra.mxu1 %vm875_vm13, %v10154_v15  ;;  %v3952_v45 = vsel %vm38_vm3, %v7760_v14, %v11766_v63 }
 0x33e   :  { %4067 = vmatpush.msrb.mxu0 %v3950_v0  ;;  %7019 = vmatmul.msk.f32.vlgmr.msrb.gmra.mxu2 %vm875_vm13, %v10154_v15  ;;  %v11769_v15 = vunpack.i.h.bf16 %v10120_v18  ;;  %v7795_v0 = vunpack.i.h.bf16 %v10209_v41 }
 0x33f   :  { %4087 = vmatpush.msrb.mxu1 %v3951_v23  ;;  %4107 = vmatpush.msrb.mxu2 %v3952_v45  ;;  %v10293_v57 = vpop.f32.mrf.mxu2  ;;  %v10295_v34 = vpop.f32.mrf.mxu0  ;;  %v7794_v23 = vunpack.i.l.bf16 %v10209_v41 }
 0x340   :  { %4068 = vmatpush.msrb.mxu0 %v3942_v58  ;;  %11768 = vst [vmem:[#allocation8_spill] sm:$0xff] %v10295_v34  ;;  %8007 = vrot.lane.b32.xlu0 %v9369_v22, %s8267_s19  ;;  %v3944_v10 = vsel %vm38_vm3, %v7739_v3, %v11769_v15  ;;  %v10305_v39 = vpop.permute.xlu0 %7797  ;;  %v7774_v58 = vunpack.i.l.bf16 %v7773_v13  ;;  %v7784_v34 = vunpack.i.l.bf16 %v10257_v33  ;;  %vm4420_vm3 = vcmask 900096  }
 0x341   :  { %7987 = vrot.lane.b32.xlu2 %v9556_v40, %s8266_s16  ;;  %v10307_v14 = vpop.permute.xlu2 %7822  ;;  %4088 = vmatpush.msrb.mxu1 %v3943_v47  ;;  %v7800_v22 = vunpack.i.h.bf16 %v10305_v39  ;;  %v7799_v63 = vunpack.i.l.bf16 %v10305_v39  ;;  %v10313_v45 = vpop.f32.mrf.mxu1  ;;  %v4188_v39 = vsel %vm55_vm2, %v7794_v23, %v7795_v0 }
 0x342   :  { %4108 = vmatpush.msrb.mxu2 %v3944_v10  ;;  %11770 = vst [vmem:[#allocation30_spill] sm:$0xff] %v10313_v45  ;;  %v7770_v10 = vunpack.i.h.bf16 %v10207_v50 }
 0x343   :  { %7029 = vmatmul.msk.f32.vlgmr.msrb.gmra.mxu3 %vm875_vm13, %v10247_v7  ;;  %v10317_v18 = vpop.f32.mrf.mxu3  ;;  %v4190_v3 = vsel %vm55_vm2, %v7799_v63, %v7800_v22  ;;  %v7788_v41 = vpop.permute.xlu1 %7787  ;;  %v4189_v47 = vsel %vm55_vm2, %v7795_v0, %v7799_v63  ;;  %v4182_v63 = vsel %vm55_vm2, %v7775_v26, %v11639_v20  ;;  %v10341_v0 = vld [vmem:[%s11559_s4 + $0x38] sm:$0x7] }
 0x344   :  { %11771 = vst [vmem:[#allocation9_spill] sm:$0xff] %v10317_v18  ;;  %7997 = vrot.lane.b32.xlu1 %v9401_v49, %s8267_s19  ;;  %4288 = vmatpush.msra.mxu3 %v4190_v3  ;;  %v7790_v15 = vunpack.i.h.bf16 %v7788_v41  ;;  %v7809_v18 = vunpack.i.l.bf16 %v10259_v2  ;;  %v7789_v13 = vunpack.i.l.bf16 %v7788_v41  ;;  %v7769_v3 = vunpack.i.l.bf16 %v10207_v50 }
 0x345   :  { %7022 = vmatmul.msk.f32.vlgmr.msra.gmra.mxu0 %vm875_vm13, %v10247_v7  ;;  %7023 = vmatmul.msk.f32.vlgmr.msra.gmra.mxu1 %vm875_vm13, %v10247_v7  ;;  %v7785_v41 = vunpack.i.h.bf16 %v10257_v33  ;;  %v4180_v50 = vsel %vm55_vm2, %v7770_v10, %v7774_v58 }
 0x346   :  { %7024 = vmatmul.msk.f32.vlgmr.msra.gmra.mxu2 %vm875_vm13, %v10247_v7  ;;  %4248 = vmatpush.msra.mxu1 %v4188_v39  ;;  %v4187_v39 = vsel %vm55_vm2, %v7790_v15, %v7794_v23  ;;  %v4194_v23 = vsel %vm55_vm2, %v7809_v18, %v7810_v27 }
 0x347   :  { %4268 = vmatpush.msra.mxu2 %v4189_v47  ;;  %4289 = vmatpush.msra.mxu3 %v4182_v63  ;;  %v10343_v45 = vpop.f32.mrf.mxu2  ;;  %v10345_v2 = vpop.f32.mrf.mxu0  ;;  %v4181_v47 = vsel %vm55_vm2, %v7774_v58, %v7775_v26  ;;  %v4186_v15 = vsel %vm55_vm2, %v7785_v41, %v7789_v13  ;;  %v4179_v26 = vsel %vm55_vm2, %v7769_v3, %v7770_v10 }
 0x348   :  { %11772 = vst [vmem:[#allocation11_spill] sm:$0xff] %v10343_v45  ;;  %8022 = vrot.lane.b32.xlu0 %v9434_v61, %s8267_s19  ;;  %v10355_v63 = vpop.permute.xlu0 %7812  ;;  %4249 = vmatpush.msra.mxu1 %v4180_v50  ;;  %v7780_v50 = vunpack.i.h.bf16 %v10163_v48 }
 0x349   :  { %11773 = vst [vmem:[#allocation20_spill] sm:$0xff] %v10345_v2  ;;  %8002 = vrot.lane.b32.xlu2 %v9438_v25, %s8267_s19  ;;  %v10357_v20 = vpop.permute.xlu2 %7837  ;;  %4269 = vmatpush.msra.mxu2 %v4181_v47  ;;  %v10359_v2 = vpop.f32.mrf.mxu1 }
 0x34a   :  { %11774 = vst [vmem:[#allocation22_spill] sm:$0xff] %v10359_v2  ;;  %4228 = vmatpush.msra.mxu0 %v4187_v39  ;;  %4368 = vmatpush.msrb.mxu3 %v4194_v23  ;;  %v4184_v39 = vsel %vm55_vm2, %v7780_v50, %v7784_v34  ;;  %v7840_v23 = vunpack.i.h.bf16 %v10357_v20 }
 0x34b   :  { %7034 = vmatmul.msk.f32.vlgmr.msra.gmra.mxu3 %vm875_vm13, %v10341_v0  ;;  %v7803_v58 = vpop.permute.xlu1 %7802 }
 0x34c   :  { %v10365_v45 = vpop.f32.mrf.mxu3  ;;  %8012 = vrot.lane.b32.xlu1 %v9463_v19, %s8267_s19  ;;  %4229 = vmatpush.msra.mxu0 %v4179_v26  ;;  %v7805_v47 = vunpack.i.h.bf16 %v7803_v58  ;;  %v7804_v2 = vunpack.i.l.bf16 %v7803_v58  ;;  %v7815_v26 = vunpack.i.h.bf16 %v10355_v63 }
 0x34d   :  { %4369 = vmatpush.msrb.mxu3 %v4186_v15  ;;  %7026 = vmatmul.msk.f32.vlgmr.msrb.gmra.mxu0 %vm875_vm13, %v10247_v7 }
 0x34e   :  { %7027 = vmatmul.msk.f32.vlgmr.msrb.gmra.mxu1 %vm875_vm13, %v10247_v7  ;;  %7028 = vmatmul.msk.f32.vlgmr.msrb.gmra.mxu2 %vm875_vm13, %v10247_v7  ;;  %v4191_v19 = vsel %vm55_vm2, %v7800_v22, %v7804_v2  ;;  %v4192_v27 = vsel %vm55_vm2, %v7804_v2, %v7805_v47  ;;  %v4193_v10 = vsel %vm55_vm2, %v7805_v47, %v7809_v18  ;;  %v11775_v22 = vunpack.i.l.bf16 %v10163_v48 }
 0x34f   :  { %v10381_v13 = vpop.f32.mrf.mxu2  ;;  %v10383_v3 = vpop.f32.mrf.mxu0  ;;  %4308 = vmatpush.msrb.mxu0 %v4191_v19  ;;  %4328 = vmatpush.msrb.mxu1 %v4192_v27 }
 0x350   :  { %8037 = vrot.lane.b32.xlu0 %v9319_v6, %s8301_s9  ;;  %v10389_v7 = vpop.permute.xlu0 %7827  ;;  %v4183_v18 = vsel %vm55_vm2, %v11775_v22, %v7780_v50  ;;  %4348 = vmatpush.msrb.mxu2 %v4193_v10  ;;  %v7839_v6 = vunpack.i.l.bf16 %v10357_v20 }
 0x351   :  { %8017 = vrot.lane.b32.xlu2 %v9492_v59, %s8267_s19  ;;  %v10391_v33 = vpop.permute.xlu2 %7852  ;;  %v10396_v2 = vpop.f32.mrf.mxu1  ;;  %4309 = vmatpush.msrb.mxu0 %v4183_v18  ;;  %v4185_v59 = vsel %vm55_vm2, %v7784_v34, %v7785_v41  ;;  %vm4662_vm2 = vcmask 891904  }
 0x352   :  { %4329 = vmatpush.msrb.mxu1 %v4184_v39  ;;  %4349 = vmatpush.msrb.mxu2 %v4185_v59  ;;  %v4430_v34 = vsel %vm4420_vm3, %v7839_v6, %v7840_v23 }
 0x353   :  { %7038 = vmatmul.msk.f32.vlgmr.msrb.gmra.mxu3 %vm875_vm13, %v10341_v0  ;;  %v7818_v48 = vpop.permute.xlu1 %7817 }
 0x354   :  { %v10404_v15 = vpop.f32.mrf.mxu3  ;;  %8027 = vrot.lane.b32.xlu1 %v9524_v4, %s8267_s19  ;;  %v7819_v58 = vunpack.i.l.bf16 %v7818_v48  ;;  %v7820_v22 = vunpack.i.h.bf16 %v7818_v48  ;;  %v7855_v48 = vunpack.i.h.bf16 %v10391_v33 }
 0x355   :  { %7031 = vmatmul.msk.f32.vlgmr.msra.gmra.mxu0 %vm875_vm13, %v10341_v0 }
 0x356   :  { %7032 = vmatmul.msk.f32.vlgmr.msra.gmra.mxu1 %vm875_vm13, %v10341_v0  ;;  %7033 = vmatmul.msk.f32.vlgmr.msra.gmra.mxu2 %vm875_vm13, %v10341_v0  ;;  %v4422_v20 = vsel %vm4420_vm3, %v7815_v26, %v7819_v58 }
 0x357   :  { %4490 = vmatpush.msra.mxu1 %v4430_v34  ;;  %v10417_v4 = vpop.f32.mrf.mxu2  ;;  %v10419_v41 = vpop.f32.mrf.mxu0 }
 0x358   :  { %11776 = vst [vmem:[#allocation25_spill] sm:$0xff] %v10419_v41  ;;  %8052 = vrot.lane.b32.xlu0 %v9434_v61, %s8301_s9  ;;  %v7843_v50 = vpop.permute.xlu0 %7842 }
 0x359   :  { %8032 = vrot.lane.b32.xlu2 %v9556_v40, %s8267_s19  ;;  %v10425_v47 = vpop.permute.xlu2 %7867  ;;  %v7845_v19 = vunpack.i.h.bf16 %v7843_v50  ;;  %v7844_v27 = vunpack.i.l.bf16 %v7843_v50  ;;  %v10427_v10 = vpop.f32.mrf.mxu1  ;;  %4491 = vmatpush.msra.mxu1 %v4422_v20  ;;  %v11640_v40 = vunpack.i.l.bf16 %v10307_v14  ;;  %v8066_v50 = vpack.i.bf16 %v11697_v55, %v11708_v52 }
 0x35a   :  { %v7854_v20 = vunpack.i.l.bf16 %v10391_v33  ;;  %v10454_v33 = vld [vmem:[%s11559_s4 + $0x3c] sm:$0x7] }
 0x35b   :  { %v4431_v39 = vsel %vm4420_vm3, %v7840_v23, %v7844_v27  ;;  %v4432_v59 = vsel %vm4420_vm3, %v7844_v27, %v7845_v19  ;;  %v7833_v34 = vpop.permute.xlu1 %7832  ;;  %v7814_v23 = vunpack.i.l.bf16 %v10355_v63  ;;  %v4423_v27 = vsel %vm4420_vm3, %v7819_v58, %v7820_v22 }
 0x35c   :  { %v10429_v18 = vpop.f32.mrf.mxu3  ;;  %8042 = vrot.lane.b32.xlu1 %v9401_v49, %s8301_s9  ;;  %4510 = vmatpush.msra.mxu2 %v4431_v39  ;;  %v7835_v41 = vunpack.i.h.bf16 %v7833_v34  ;;  %v7834_v49 = vunpack.i.l.bf16 %v7833_v34  ;;  %v4424_v55 = vsel %vm4420_vm3, %v7820_v22, %v11640_v40  ;;  %v7830_v63 = vunpack.i.h.bf16 %v10389_v7 }
 0x35d   :  { %4530 = vmatpush.msra.mxu3 %v4432_v59  ;;  %7035 = vmatmul.msk.f32.vlgmr.msrb.gmra.mxu0 %vm875_vm13, %v10341_v0 }
 0x35e   :  { %7036 = vmatmul.msk.f32.vlgmr.msrb.gmra.mxu1 %vm875_vm13, %v10341_v0  ;;  %7037 = vmatmul.msk.f32.vlgmr.msrb.gmra.mxu2 %vm875_vm13, %v10341_v0  ;;  %v4429_v39 = vsel %vm4420_vm3, %v7835_v41, %v7839_v6  ;;  %v4436_v6 = vsel %vm4420_vm3, %v7854_v20, %v7855_v48  ;;  %v4428_v34 = vsel %vm4420_vm3, %v7830_v63, %v7834_v49 }
 0x35f   :  { %4511 = vmatpush.msra.mxu2 %v4423_v27  ;;  %4531 = vmatpush.msra.mxu3 %v4424_v55  ;;  %v10458_v59 = vpop.f32.mrf.mxu2  ;;  %v10460_v0 = vpop.f32.mrf.mxu0  ;;  %v10487_v49 = vpack.i.bf16 %v11718_v42, %v11709_v29 }
 0x360   :  { %11777 = vst [vmem:[#allocation26_spill] sm:$0xff] %v10458_v59  ;;  %8067 = vrot.lane.b32.xlu0 %v8066_v50, %s8301_s9  ;;  %v10465_v58 = vpop.permute.xlu0 %7857  ;;  %7043 = vmatmul.msk.f32.vlgmr.msra.gmra.mxu3 %vm875_vm13, %v10454_v33  ;;  %v8056_v50 = vpack.i.bf16 %v11711_v54, %v11712_v60  ;;  %v7825_v59 = vunpack.i.h.bf16 %v10307_v14 }
 0x361   :  { %8047 = vrot.lane.b32.xlu2 %v9438_v25, %s8301_s9  ;;  %v10467_v22 = vpop.permute.xlu2 %7882  ;;  %v10472_v41 = vpop.f32.mrf.mxu1  ;;  %4470 = vmatpush.msra.mxu0 %v4429_v39  ;;  %v4421_v25 = vsel %vm4420_vm3, %v7814_v23, %v7815_v26  ;;  %v7829_v39 = vunpack.i.l.bf16 %v10389_v7 }
 0x362   :  { %4610 = vmatpush.msrb.mxu3 %v4436_v6  ;;  %v7885_v7 = vunpack.i.h.bf16 %v10467_v22 }
 0x363   :  { %4471 = vmatpush.msra.mxu0 %v4421_v25  ;;  %v7848_v55 = vpop.permute.xlu1 %7847  ;;  %v11782_v25 = vunpack.i.l.bf16 %v10307_v14  ;;  %v7860_v14 = vunpack.i.h.bf16 %v10465_v58 }
 0x364   :  { %v10478_v27 = vpop.f32.mrf.mxu3  ;;  %8057 = vrot.lane.b32.xlu1 %v8056_v50, %s8301_s9  ;;  %4611 = vmatpush.msrb.mxu3 %v4428_v34  ;;  %v7850_v40 = vunpack.i.h.bf16 %v7848_v55  ;;  %v7849_v48 = vunpack.i.l.bf16 %v7848_v55  ;;  %v11641_v34 = vunpack.i.l.bf16 %v10467_v22 }
 0x365   :  { %11778 = vst [vmem:[#allocation21_spill] sm:$0xff] %v10478_v27  ;;  %7040 = vmatmul.msk.f32.vlgmr.msra.gmra.mxu0 %vm875_vm13, %v10454_v33  ;;  %v4425_v55 = vsel %vm4420_vm3, %v11782_v25, %v7825_v59  ;;  %v7859_v27 = vunpack.i.l.bf16 %v10465_v58 }
 0x366   :  { %7041 = vmatmul.msk.f32.vlgmr.msra.gmra.mxu1 %vm875_vm13, %v10454_v33  ;;  %7042 = vmatmul.msk.f32.vlgmr.msra.gmra.mxu2 %vm875_vm13, %v10454_v33  ;;  %v4433_v26 = vsel %vm4420_vm3, %v7845_v19, %v7849_v48  ;;  %v4434_v23 = vsel %vm4420_vm3, %v7849_v48, %v7850_v40  ;;  %v4435_v6 = vsel %vm4420_vm3, %v7850_v40, %v7854_v20 }
 0x367   :  { %v10498_v50 = vpop.f32.mrf.mxu2  ;;  %v10500_v42 = vpop.f32.mrf.mxu0  ;;  %4550 = vmatpush.msrb.mxu0 %v4433_v26  ;;  %4570 = vmatpush.msrb.mxu1 %v4434_v23  ;;  %v8071_v20 = vpack.i.bf16 %v11714_v43, %v11708_v52  ;;  %v4426_v48 = vsel %vm4420_vm3, %v7825_v59, %v7829_v39  ;;  %v4427_v26 = vsel %vm4420_vm3, %v7829_v39, %v7830_v63 }
 0x368   :  { %11779 = vst [vmem:[#allocation31_spill] sm:$0xff] %v10498_v50  ;;  %8082 = vrot.lane.b32.xlu0 %v9434_v61, %s8302_s12  ;;  %v10506_v29 = vpop.permute.xlu0 %7872  ;;  %7047 = vmatmul.msk.f32.vlgmr.msrb.gmra.mxu3 %vm875_vm13, %v10454_v33  ;;  %v4672_v52 = vsel %vm4662_vm2, %v11641_v34, %v7885_v7  ;;  %v10536_v63 = vpack.i.bf16 %v11694_v9, %v11711_v54  ;;  %v11786_v34 = vld [vmem:[#allocation16_spill] sm:$0xff] }
 0x369   :  { %11780 = vst [vmem:[#allocation32_spill] sm:$0xff] %v10500_v42  ;;  %8062 = vrot.lane.b32.xlu2 %v10487_v49, %s8301_s9  ;;  %v10508_v19 = vpop.permute.xlu2 %7897  ;;  %v10512_v40 = vpop.f32.mrf.mxu1  ;;  %4590 = vmatpush.msrb.mxu2 %v4435_v6  ;;  %v8076_v59 = vpack.i.bf16 %v11713_v17, %v11696_v56 }
 0x36a   :  { %11781 = vst [vmem:[#allocation33_spill] sm:$0xff] %v10512_v40  ;;  %4551 = vmatpush.msrb.mxu0 %v4425_v55  ;;  %4571 = vmatpush.msrb.mxu1 %v4426_v48  ;;  %v7869_v40 = vunpack.i.l.bf16 %v10425_v47  ;;  %v7900_v42 = vunpack.i.h.bf16 %v10508_v19  ;;  %v7899_v50 = vunpack.i.l.bf16 %v10508_v19  ;;  %v7875_v19 = vunpack.i.h.bf16 %v10506_v29 }
 0x36b   :  { %4591 = vmatpush.msrb.mxu2 %v4427_v26  ;;  %v7863_v6 = vpop.permute.xlu1 %7862 }
 0x36c   :  { %v10521_v23 = vpop.f32.mrf.mxu3  ;;  %8072 = vrot.lane.b32.xlu1 %v8071_v20, %s8301_s9  ;;  %4732 = vmatpush.msra.mxu1 %v4672_v52  ;;  %v7864_v25 = vunpack.i.l.bf16 %v7863_v6  ;;  %v7865_v9 = vunpack.i.h.bf16 %v7863_v6 }
 0x36d   :  { %11783 = vst [vmem:[#allocation34_spill] sm:$0xff] %v10521_v23  ;;  %7044 = vmatmul.msk.f32.vlgmr.msrb.gmra.mxu0 %vm875_vm13, %v10454_v33  ;;  %v10559_v23 = vld [vmem:[%s11559_s4 + $0x40] sm:$0x7] }
 0x36e   :  { %7045 = vmatmul.msk.f32.vlgmr.msrb.gmra.mxu1 %vm875_vm13, %v10454_v33  ;;  %7046 = vmatmul.msk.f32.vlgmr.msrb.gmra.mxu2 %vm875_vm13, %v10454_v33  ;;  %v4664_v39 = vsel %vm4662_vm2, %v7860_v14, %v7864_v25 }
 0x36f   :  { %v10541_v20 = vpop.f32.mrf.mxu2  ;;  %v10543_v55 = vpop.f32.mrf.mxu0  ;;  %4733 = vmatpush.msra.mxu1 %v4664_v39 }
 0x370   :  { %11784 = vst [vmem:[#allocation35_spill] sm:$0xff] %v10541_v20  ;;  %8097 = vrot.lane.b32.xlu0 %v10536_v63, %s8302_s12  ;;  %v7888_v33 = vpop.permute.xlu0 %7887 }
 0x371   :  { %8077 = vrot.lane.b32.xlu2 %v8076_v59, %s8301_s9  ;;  %v10548_v48 = vpop.permute.xlu2 %7912  ;;  %v7890_v54 = vunpack.i.h.bf16 %v7888_v33  ;;  %v7889_v26 = vunpack.i.l.bf16 %v7888_v33  ;;  %v10550_v52 = vpop.f32.mrf.mxu1 }
 0x372   :  { %11785 = vst [vmem:[#allocation36_spill] sm:$0xff] %v10550_v52  ;;  %v10572_v52 = vpack.i.bf16 %v11699_v44, %v11712_v60  ;;  %v11791_v44 = vld [vmem:[#allocation14_spill] sm:$0xff] }
 0x373   :  { %v4673_v20 = vsel %vm4662_vm2, %v7885_v7, %v7889_v26  ;;  %v4674_v39 = vsel %vm4662_vm2, %v7889_v26, %v7890_v54  ;;  %v7878_v59 = vpop.permute.xlu1 %7877  ;;  %v4665_v26 = vsel %vm4662_vm2, %v7864_v25, %v7865_v9 }
 0x374   :  { %8087 = vrot.lane.b32.xlu1 %v11786_v34, %s8302_s12  ;;  %v10562_v6 = vpop.f32.mrf.mxu3  ;;  %4752 = vmatpush.msra.mxu2 %v4673_v20  ;;  %v7880_v33 = vunpack.i.h.bf16 %v7878_v59  ;;  %v7879_v7 = vunpack.i.l.bf16 %v7878_v59  ;;  %v4666_v20 = vsel %vm4662_vm2, %v7865_v9, %v7869_v40 }
 0x375   :  { %11787 = vst [vmem:[#allocation16_spill] sm:$0xff] %v10562_v6  ;;  %4772 = vmatpush.msra.mxu3 %v4674_v39  ;;  %v11788_v39 = vunpack.i.l.bf16 %v10467_v22  ;;  %v4678_v22 = vsel %vm4662_vm2, %v7899_v50, %v7900_v42 }
 0x376   :  { %7050 = vmatmul.msk.f32.vlgmr.msra.gmra.mxu1 %vm875_vm13, %v10559_v23  ;;  %4753 = vmatpush.msra.mxu2 %v4665_v26  ;;  %v4663_v26 = vsel %vm4662_vm2, %v7859_v27, %v7860_v14 }
 0x377   :  { %v4671_v6 = vsel %vm4662_vm2, %v7880_v33, %v11788_v39  ;;  %4773 = vmatpush.msra.mxu3 %v4666_v20  ;;  %7051 = vmatmul.msk.f32.vlgmr.msra.gmra.mxu2 %vm875_vm13, %v10559_v23  ;;  %v10581_v58 = vpop.f32.mrf.mxu2  ;;  %v10583_v25 = vpop.f32.mrf.mxu0  ;;  %v4670_v33 = vsel %vm4662_vm2, %v7875_v19, %v7879_v7 }
 0x378   :  { %11789 = vst [vmem:[#allocation37_spill] sm:$0xff] %v10581_v58  ;;  %8112 = vrot.lane.b32.xlu0 %v11791_v44, %s8302_s12  ;;  %v10589_v60 = vpop.permute.xlu0 %7902  ;;  %7052 = vmatmul.msk.f32.vlgmr.msra.gmra.mxu3 %vm875_vm13, %v10559_v23 }
 0x379   :  { %11790 = vst [vmem:[#allocation38_spill] sm:$0xff] %v10583_v25  ;;  %8092 = vrot.lane.b32.xlu2 %v10572_v52, %s8302_s12  ;;  %v10594_v9 = vpop.permute.xlu2 %7927  ;;  %v10596_v59 = vpop.f32.mrf.mxu1  ;;  %4712 = vmatpush.msra.mxu0 %v4671_v6  ;;  %v7870_v25 = vunpack.i.h.bf16 %v10425_v47  ;;  %v7874_v6 = vunpack.i.l.bf16 %v10506_v29  ;;  %v11795_v29 = vld [vmem:[#allocation5_spill] sm:$0xff] }
 0x37a   :  { %11792 = vst [vmem:[#allocation14_spill] sm:$0xff] %v10596_v59  ;;  %4852 = vmatpush.msrb.mxu3 %v4678_v22  ;;  %v7929_v47 = vunpack.i.l.bf16 %v10594_v9 }
 0x37b   :  { %4713 = vmatpush.msra.mxu0 %v4663_v26  ;;  %v7893_v20 = vpop.permute.xlu1 %7892  ;;  %v7930_v26 = vunpack.i.h.bf16 %v10594_v9  ;;  %v4667_v9 = vsel %vm4662_vm2, %v7869_v40, %v7870_v25  ;;  %v10648_v40 = vpack.i.bf16 %v11707_v24, %v11713_v17 }
 0x37c   :  { %8102 = vrot.lane.b32.xlu1 %v10487_v49, %s8302_s12  ;;  %4853 = vmatpush.msrb.mxu3 %v4670_v33  ;;  %v7895_v42 = vunpack.i.h.bf16 %v7893_v20  ;;  %v7894_v39 = vunpack.i.l.bf16 %v7893_v20  ;;  %v10606_v59 = vpop.f32.mrf.mxu3  ;;  %v10629_v20 = vpack.i.bf16 %v11696_v56, %v11714_v43 }
 0x37d   :  { %7049 = vmatmul.msk.f32.vlgmr.msra.gmra.mxu0 %vm875_vm13, %v10559_v23  ;;  %11793 = vst [vmem:[#allocation39_spill] sm:$0xff] %v10606_v59  ;;  %v4913_v56 = vsel %vm106_vm6, %v7929_v47, %v7930_v26  ;;  %v7914_v59 = vunpack.i.l.bf16 %v10548_v48 }
 0x37e   :  { %v4675_v7 = vsel %vm4662_vm2, %v7890_v54, %v7894_v39  ;;  %v4676_v27 = vsel %vm4662_vm2, %v7894_v39, %v7895_v42  ;;  %v4677_v14 = vsel %vm4662_vm2, %v7895_v42, %v7899_v50  ;;  %v4668_v42 = vsel %vm4662_vm2, %v7870_v25, %v7874_v6 }
 0x37f   :  { %v10611_v22 = vpop.f32.mrf.mxu2  ;;  %v10613_v33 = vpop.f32.mrf.mxu0  ;;  %4792 = vmatpush.msrb.mxu0 %v4675_v7  ;;  %4812 = vmatpush.msrb.mxu1 %v4676_v27  ;;  %v4669_v7 = vsel %vm4662_vm2, %v7874_v6, %v7875_v19 }
 0x380   :  { %11794 = vst [vmem:[#allocation40_spill] sm:$0xff] %v10611_v22  ;;  %8127 = vrot.lane.b32.xlu0 %v9434_v61, %s8270_s30  ;;  %v10621_v54 = vpop.permute.xlu0 %7917  ;;  %7056 = vmatmul.msk.f32.vlgmr.msrb.gmra.mxu3 %vm875_vm13, %v10559_v23 }
 0x381   :  { %8107 = vrot.lane.b32.xlu2 %v11795_v29, %s8302_s12  ;;  %v10625_v50 = vpop.f32.mrf.mxu1  ;;  %4832 = vmatpush.msrb.mxu2 %v4677_v14  ;;  %v7905_v14 = vunpack.i.h.bf16 %v10589_v60 }
 0x382   :  { %11796 = vst [vmem:[#allocation5_spill] sm:$0xff] %v10625_v50  ;;  %v10633_v39 = vpop.permute.xlu2 %7942  ;;  %4793 = vmatpush.msrb.mxu0 %v4667_v9  ;;  %4813 = vmatpush.msrb.mxu1 %v4668_v42 }
 0x383   :  { %4833 = vmatpush.msrb.mxu2 %v4669_v7  ;;  %v7908_v27 = vpop.permute.xlu1 %7907  ;;  %7054 = vmatmul.msk.f32.vlgmr.msrb.gmra.mxu1 %vm875_vm13, %v10559_v23 }
 0x384   :  { %8117 = vrot.lane.b32.xlu1 %v10629_v20, %s8302_s12  ;;  %v7909_v43 = vunpack.i.l.bf16 %v7908_v27  ;;  %7055 = vmatmul.msk.f32.vlgmr.msrb.gmra.mxu2 %vm875_vm13, %v10559_v23  ;;  %v7910_v42 = vunpack.i.h.bf16 %v7908_v27 }
 0x385   :  { %7053 = vmatmul.msk.f32.vlgmr.msrb.gmra.mxu0 %vm875_vm13, %v10559_v23  ;;  %4973 = vmatpush.msra.mxu1 %v4913_v56  ;;  %v10659_v23 = vpop.f32.mrf.mxu3 }
 0x386   :  { %v4905_v19 = vsel %vm106_vm6, %v7905_v14, %v7909_v43  ;;  %11799 = vst [vmem:[#allocation43_spill] sm:$0xff] %v10659_v23  ;;  %v7944_v23 = vunpack.i.l.bf16 %v10633_v39  ;;  %v4906_v58 = vsel %vm106_vm6, %v7909_v43, %v7910_v42  ;;  %v4907_v50 = vsel %vm106_vm6, %v7910_v42, %v7914_v59 }
 0x387   :  { %v10651_v25 = vpop.f32.mrf.mxu2  ;;  %v10653_v6 = vpop.f32.mrf.mxu0  ;;  %4974 = vmatpush.msra.mxu1 %v4905_v19  ;;  %v10668_v19 = vld [vmem:[%s11559_s4 + $0x44] sm:$0x7] }
 0x388   :  { %11797 = vst [vmem:[#allocation41_spill] sm:$0xff] %v10651_v25  ;;  %8142 = vrot.lane.b32.xlu0 %v10536_v63, %s8270_s30  ;;  %v7933_v9 = vpop.permute.xlu0 %7932 }
 0x389   :  { %11798 = vst [vmem:[#allocation42_spill] sm:$0xff] %v10653_v6  ;;  %8122 = vrot.lane.b32.xlu2 %v10648_v40, %s8302_s12  ;;  %v7935_v7 = vunpack.i.h.bf16 %v7933_v9  ;;  %v7934_v24 = vunpack.i.l.bf16 %v7933_v9  ;;  %v10661_v17 = vpop.f32.mrf.mxu1  ;;  %v7945_v9 = vunpack.i.h.bf16 %v10633_v39 }
 0x38a   :  { %11800 = vst [vmem:[#allocation44_spill] sm:$0xff] %v10661_v17  ;;  %v10663_v56 = vpop.permute.xlu2 %7957 }
 0x38b   :  { %v4914_v22 = vsel %vm106_vm6, %v7930_v26, %v7934_v24  ;;  %v4915_v27 = vsel %vm106_vm6, %v7934_v24, %v7935_v7  ;;  %7059 = vmatmul.msk.f32.vlgmr.msra.gmra.mxu1 %vm875_vm13, %v10668_v19  ;;  %v7920_v26 = vunpack.i.h.bf16 %v10621_v54  ;;  %v7904_v24 = vunpack.i.l.bf16 %v10589_v60 }
 0x38c   :  { %8132 = vrot.lane.b32.xlu1 %v11786_v34, %s8270_s30  ;;  %4993 = vmatpush.msra.mxu2 %v4914_v22  ;;  %v7923_v17 = vpop.permute.xlu1 %7922 }
 0x38d   :  { %5013 = vmatpush.msra.mxu3 %v4915_v27  ;;  %v7925_v6 = vunpack.i.h.bf16 %v7923_v17  ;;  %v7924_v25 = vunpack.i.l.bf16 %v7923_v17  ;;  %v10704_v27 = vpop.f32.mrf.mxu3 }
 0x38e   :  { %4994 = vmatpush.msra.mxu2 %v4906_v58  ;;  %v4919_v58 = vsel %vm106_vm6, %v7944_v23, %v7945_v9  ;;  %11802 = vst [vmem:[#allocation46_spill] sm:$0xff] %v10704_v27 }
 0x38f   :  { %5014 = vmatpush.msra.mxu3 %v4907_v50  ;;  %7060 = vmatmul.msk.f32.vlgmr.msra.gmra.mxu2 %vm875_vm13, %v10668_v19  ;;  %v10687_v22 = vpop.f32.mrf.mxu2  ;;  %v10689_v39 = vpop.f32.mrf.mxu0  ;;  %v4912_v43 = vsel %vm106_vm6, %v7925_v6, %v7929_v47  ;;  %v4911_v50 = vsel %vm106_vm6, %v7920_v26, %v7924_v25  ;;  %v4904_v47 = vsel %vm106_vm6, %v7904_v24, %v7905_v14 }
 0x390   :  { %7061 = vmatmul.msk.f32.vlgmr.msra.gmra.mxu3 %vm875_vm13, %v10668_v19  ;;  %11801 = vst [vmem:[#allocation45_spill] sm:$0xff] %v10687_v22  ;;  %8157 = vrot.lane.b32.xlu0 %v11791_v44, %s8270_s30  ;;  %v10697_v60 = vpop.permute.xlu0 %7947 }
 0x391   :  { %8137 = vrot.lane.b32.xlu2 %v10572_v52, %s8270_s30  ;;  %5093 = vmatpush.msrb.mxu3 %v4919_v58  ;;  %v10700_v42 = vpop.f32.mrf.mxu1  ;;  %v7915_v58 = vunpack.i.h.bf16 %v10548_v48 }
 0x392   :  { %4953 = vmatpush.msra.mxu0 %v4912_v43  ;;  %v7919_v43 = vunpack.i.l.bf16 %v10621_v54 }
 0x393   :  { %v10702_v17 = vpop.permute.xlu2 %7972  ;;  %5094 = vmatpush.msrb.mxu3 %v4911_v50 }
 0x394   :  { %8147 = vrot.lane.b32.xlu1 %v10487_v49, %s8270_s30  ;;  %4954 = vmatpush.msra.mxu0 %v4904_v47  ;;  %v7938_v6 = vpop.permute.xlu1 %7937  ;;  %v7975_v48 = vunpack.i.h.bf16 %v10702_v17  ;;  %v4909_v54 = vsel %vm106_vm6, %v7915_v58, %v7919_v43 }
 0x395   :  { %7058 = vmatmul.msk.f32.vlgmr.msra.gmra.mxu0 %vm875_vm13, %v10668_v19  ;;  %v7940_v25 = vunpack.i.h.bf16 %v7938_v6  ;;  %v7939_v9 = vunpack.i.l.bf16 %v7938_v6 }
 0x397   :  { %v10715_v50 = vpop.f32.mrf.mxu2  ;;  %v10717_v27 = vpop.f32.mrf.mxu0  ;;  %v4916_v14 = vsel %vm106_vm6, %v7935_v7, %v7939_v9  ;;  %v4917_v24 = vsel %vm106_vm6, %v7939_v9, %v7940_v25  ;;  %v4918_v47 = vsel %vm106_vm6, %v7940_v25, %v7944_v23  ;;  %v4908_v23 = vsel %vm106_vm6, %v7914_v59, %v7915_v58 }
 0x398   :  { %7065 = vmatmul.msk.f32.vlgmr.msrb.gmra.mxu3 %vm875_vm13, %v10668_v19  ;;  %11803 = vst [vmem:[#allocation47_spill] sm:$0xff] %v10717_v27  ;;  %8172 = vrot.lane.b32.xlu0 %v9434_v61, %s8271_s7  ;;  %v1189_v25 = vadd.f32 %v9829_v51, %v9709_v32  ;;  %v11642_v59 = vunpack.i.h.bf16 %v10697_v60  ;;  %v11806_v32 = vunpack.i.l.bf16 %v10702_v17 }
 0x399   :  { %8152 = vrot.lane.b32.xlu2 %v11795_v29, %s8270_s30  ;;  %v10730_v22 = vpop.f32.mrf.mxu1  ;;  %5033 = vmatpush.msrb.mxu0 %v4916_v14 }
 0x39a   :  { %v10728_v6 = vpop.permute.xlu0 %7962  ;;  %11804 = vst [vmem:[#allocation48_spill] sm:$0xff] %v10730_v22  ;;  %5053 = vmatpush.msrb.mxu1 %v4917_v24  ;;  %5073 = vmatpush.msrb.mxu2 %v4918_v47  ;;  %v4910_v22 = vsel %vm106_vm6, %v7919_v43, %v7920_v26  ;;  %v1269_v24 = vadd.f32 %v9885_v8, %v9775_v38  ;;  %v11807_v43 = vld [vmem:[#allocation6_spill] sm:$0xff]  ;;  %vm5869_vm6 = vcmask 728064  }
 0x39b   :  { %v10732_v7 = vpop.permute.xlu2 %7987  ;;  %v10737_v9 = vpop.f32.mrf.mxu3  ;;  %5034 = vmatpush.msrb.mxu0 %v4908_v23  ;;  %v5154_v51 = vsel %vm123_vm5, %v11806_v32, %v7975_v48  ;;  %v1129_v38 = vadd.f32 %v9942_v53, %v9812_v12  ;;  %v1149_v8 = vadd.f32 %v9955_v35, %v9820_v36  ;;  %v1508_v26 = vadd.f32 %v9957_v11, %v1189_v25  ;;  %v11809_v12 = vld [vmem:[#allocation4_spill] sm:$0xff]  ;;  %v11810_v53 = vld [vmem:[#allocation29_spill] sm:$0xff] }
 0x39c   :  { %11805 = vst [vmem:[#allocation49_spill] sm:$0xff] %v10737_v9  ;;  %8162 = vrot.lane.b32.xlu1 %v10629_v20, %s8270_s30  ;;  %5054 = vmatpush.msrb.mxu1 %v4909_v54  ;;  %v1209_v47 = vadd.f32 %v11807_v43, %v9870_v46  ;;  %v1229_v36 = vadd.f32 %v11810_v53, %v11809_v12  ;;  %v11811_v35 = vld [vmem:[#allocation17_spill] sm:$0xff]  ;;  %v11813_v9 = vld [vmem:[#allocation28_spill] sm:$0xff]  ;;  %v11814_v53 = vld [vmem:[#allocation7_spill] sm:$0xff]  ;;  %v7959_v46 = vunpack.i.l.bf16 %v10663_v56 }
 0x39d   :  { %5074 = vmatpush.msrb.mxu2 %v4910_v22  ;;  %v7953_v14 = vpop.permute.xlu1 %7952  ;;  %7062 = vmatmul.msk.f32.vlgmr.msrb.gmra.mxu0 %vm875_vm13, %v10668_v19  ;;  %v1512_v11 = vadd.f32 %v11811_v35, %v1269_v24  ;;  %v1506_v12 = vadd.f32 %v11813_v9, %v1149_v8  ;;  %v1750_v24 = vadd.f32 %v11814_v53, %v1508_v26  ;;  %v7990_v53 = vunpack.i.h.bf16 %v10732_v7 }
 0x39e   :  { %7063 = vmatmul.msk.f32.vlgmr.msrb.gmra.mxu1 %vm875_vm13, %v10668_v19  ;;  %v7954_v58 = vunpack.i.l.bf16 %v7953_v14  ;;  %7064 = vmatmul.msk.f32.vlgmr.msrb.gmra.mxu2 %vm875_vm13, %v10668_v19  ;;  %v7955_v25 = vunpack.i.h.bf16 %v7953_v14  ;;  %v10794_v14 = vld [vmem:[%s11559_s4 + $0x48] sm:$0x7]  ;;  %v1510_v8 = vadd.f32 %v10090_v21, %v1229_v36 }
 0x39f   :  { %5214 = vmatpush.msra.mxu1 %v5154_v51  ;;  %v10769_v19 = vpop.f32.mrf.mxu2  ;;  %v1754_v26 = vadd.f32 %v10097_v31, %v1512_v11  ;;  %v1748_v36 = vadd.f32 %v10126_v16, %v1506_v12  ;;  %v7965_v11 = vunpack.i.h.bf16 %v10728_v6 }
 0x3a0   :  { %v5146_v22 = vsel %vm123_vm5, %v11642_v59, %v7954_v58  ;;  %8187 = vrot.lane.b32.xlu0 %v10536_v63, %s8271_s7  ;;  %11808 = vst [vmem:[#allocation6_spill] sm:$0xff] %v10769_v19  ;;  %v11812_v59 = vld [vmem:[#allocation12_spill] sm:$0xff]  ;;  %v5148_v21 = vsel %vm123_vm5, %v7955_v25, %v7959_v46 }
 0x3a1   :  { %8167 = vrot.lane.b32.xlu2 %v10648_v40, %s8270_s30  ;;  %5215 = vmatpush.msra.mxu1 %v5146_v22  ;;  %v1505_v19 = vadd.f32 %v11812_v59, %v1129_v38  ;;  %v1509_v22 = vadd.f32 %v10079_v37, %v1209_v47  ;;  %v5147_v47 = vsel %vm123_vm5, %v7954_v58, %v7955_v25 }
 0x3a2   :  { %v10774_v54 = vpop.permute.xlu0 %7977  ;;  %v10776_v23 = vpop.f32.mrf.mxu0 }
 0x3a3   :  { %v7979_v32 = vunpack.i.l.bf16 %v10774_v54  ;;  %v10780_v51 = vpop.permute.xlu2 %8002  ;;  %v10782_v43 = vpop.f32.mrf.mxu1  ;;  %v11816_v9 = vunpack.i.h.bf16 %v10774_v54  ;;  %v1747_v31 = vadd.f32 %v10116_v30, %v1505_v19  ;;  %v11817_v30 = vunpack.i.l.bf16 %v10702_v17  ;;  %v11818_v19 = vld [vmem:[#allocation15_spill] sm:$0xff] }
 0x3a4   :  { %v10787_v35 = vpop.f32.mrf.mxu3  ;;  %8177 = vrot.lane.b32.xlu1 %v11786_v34, %s8271_s7  ;;  %v1752_v25 = vadd.f32 %v11818_v19, %v1510_v8  ;;  %v11821_v8 = vld [vmem:[#allocation10_spill] sm:$0xff] }
 0x3a5   :  { %11815 = vst [vmem:[#allocation4_spill] sm:$0xff] %v10787_v35  ;;  %v5155_v59 = vsel %vm123_vm5, %v7975_v48, %v7979_v32  ;;  %v5156_v38 = vsel %vm123_vm5, %v7979_v32, %v11816_v9  ;;  %v7989_v35 = vunpack.i.l.bf16 %v10732_v7  ;;  %v7968_v27 = vpop.permute.xlu1 %7967  ;;  %v7949_v7 = vunpack.i.l.bf16 %v10697_v60  ;;  %v11820_v9 = vld [vmem:[#allocation27_spill] sm:$0xff] }
 0x3a6   :  { %5234 = vmatpush.msra.mxu2 %v5155_v59  ;;  %5254 = vmatpush.msra.mxu3 %v5156_v38  ;;  %v7970_v37 = vunpack.i.h.bf16 %v7968_v27  ;;  %v7969_v48 = vunpack.i.l.bf16 %v7968_v27  ;;  %v1992_v32 = vadd.f32 %v10135_v28, %v1750_v24  ;;  %v1751_v27 = vadd.f32 %v10156_v62, %v1509_v22  ;;  %v11819_v24 = vld [vmem:[#allocation23_spill] sm:$0xff] }
 0x3a7   :  { %7068 = vmatmul.msk.f32.vlgmr.msra.gmra.mxu1 %vm875_vm13, %v10794_v14  ;;  %v5160_v28 = vsel %vm123_vm5, %v7989_v35, %v7990_v53  ;;  %v1996_v17 = vadd.f32 %v11819_v24, %v1754_v26  ;;  %v1989_v38 = vadd.f32 %v11820_v9, %v1747_v31  ;;  %v11822_v53 = vunpack.i.h.bf16 %v10697_v60  ;;  %v11823_v26 = vld [vmem:[#allocation19_spill] sm:$0xff] }
 0x3a8   :  { %5235 = vmatpush.msra.mxu2 %v5147_v47  ;;  %5255 = vmatpush.msra.mxu3 %v5148_v21  ;;  %v5153_v16 = vsel %vm123_vm5, %v7970_v37, %v11817_v30  ;;  %v5152_v12 = vsel %vm123_vm5, %v7965_v11, %v7969_v48  ;;  %v1990_v37 = vadd.f32 %v11821_v8, %v1748_v36  ;;  %v11824_v30 = vld [vmem:[#allocation13_spill] sm:$0xff]  ;;  %v7960_v60 = vunpack.i.h.bf16 %v10663_v56 }
 0x3a9   :  { %8202 = vrot.lane.b32.xlu0 %v11791_v44, %s8271_s7  ;;  %8182 = vrot.lane.b32.xlu2 %v10572_v52, %s8271_s7  ;;  %v10822_v58 = vpop.f32.mrf.mxu2  ;;  %v5145_v48 = vsel %vm123_vm5, %v7949_v7, %v11822_v53  ;;  %v2234_v21 = vadd.f32 %v11823_v26, %v1992_v32  ;;  %v1993_v19 = vadd.f32 %v11824_v30, %v1751_v27  ;;  %v11826_v32 = vld [vmem:[#allocation8_spill] sm:$0xff]  ;;  %v11827_v27 = vld [vmem:[#allocation30_spill] sm:$0xff]  ;;  %v11831_v30 = vld [vmem:[#allocation11_spill] sm:$0xff] }
 0x3aa   :  { %7069 = vmatmul.msk.f32.vlgmr.msra.gmra.mxu2 %vm875_vm13, %v10794_v14  ;;  %7070 = vmatmul.msk.f32.vlgmr.msra.gmra.mxu3 %vm875_vm13, %v10794_v14  ;;  %v10833_v62 = vpop.f32.mrf.mxu0  ;;  %v10839_v22 = vpop.permute.xlu0 %7992  ;;  %v2231_v8 = vadd.f32 %v11826_v32, %v1989_v38  ;;  %v2232_v53 = vadd.f32 %v11827_v27, %v1990_v37  ;;  %v11830_v26 = vld [vmem:[#allocation18_spill] sm:$0xff] }
 0x3ab   :  { %5334 = vmatpush.msrb.mxu3 %v5160_v28  ;;  %v10841_v59 = vpop.permute.xlu2 %8017  ;;  %5194 = vmatpush.msra.mxu0 %v5153_v16  ;;  %v10845_v47 = vpop.f32.mrf.mxu1  ;;  %v1994_v16 = vadd.f32 %v10267_v5, %v1752_v25  ;;  %v2238_v28 = vadd.f32 %v10272_v1, %v1996_v17  ;;  %v7964_v5 = vunpack.i.l.bf16 %v10728_v6  ;;  %v11828_v25 = vunpack.i.h.bf16 %v10774_v54  ;;  %v11832_v54 = vld [vmem:[#allocation20_spill] sm:$0xff] }
 0x3ac   :  { %8192 = vrot.lane.b32.xlu1 %v10487_v49, %s8271_s7  ;;  %v2235_v27 = vadd.f32 %v11832_v54, %v1993_v19 }
 0x3ad   :  { %5335 = vmatpush.msrb.mxu3 %v5152_v12  ;;  %5195 = vmatpush.msra.mxu0 %v5145_v48  ;;  %v10855_v31 = vpop.f32.mrf.mxu3  ;;  %v11825_v12 = vld [vmem:[#allocation24_spill] sm:$0xff]  ;;  %v11829_v48 = vld [vmem:[#allocation9_spill] sm:$0xff]  ;;  %v5150_v19 = vsel %vm123_vm5, %v7960_v60, %v7964_v5 }
 0x3ae   :  { %7067 = vmatmul.msk.f32.vlgmr.msra.gmra.mxu0 %vm875_vm13, %v10794_v14  ;;  %v7983_v36 = vpop.permute.xlu1 %7982  ;;  %v1995_v9 = vadd.f32 %v10293_v57, %v11825_v12  ;;  %v2476_v37 = vadd.f32 %v11829_v48, %v2234_v21  ;;  %v8019_v12 = vunpack.i.l.bf16 %v10841_v59  ;;  %v2473_v48 = vadd.f32 %v10383_v3, %v2231_v8 }
 0x3af   :  { %v7985_v24 = vunpack.i.h.bf16 %v7983_v36  ;;  %v7984_v7 = vunpack.i.l.bf16 %v7983_v36  ;;  %v2233_v36 = vadd.f32 %v11831_v30, %v11830_v26  ;;  %v11838_v30 = vld [vmem:[#allocation31_spill] sm:$0xff] }
 0x3b0   :  { %v2237_v56 = vadd.f32 %v10381_v13, %v1995_v9  ;;  %v2718_v3 = vadd.f32 %v10404_v15, %v2476_v37  ;;  %v2715_v8 = vadd.f32 %v10460_v0, %v2473_v48  ;;  %v7995_v0 = vunpack.i.h.bf16 %v10839_v22  ;;  %v11837_v37 = vld [vmem:[#allocation21_spill] sm:$0xff] }
 0x3b1   :  { %8217 = vrot.lane.b32.xlu0 %v9434_v61, %s8272_s13  ;;  %8197 = vrot.lane.b32.xlu2 %v11795_v29, %s8271_s7  ;;  %v10870_v1 = vpop.f32.mrf.mxu2  ;;  %v5157_v17 = vsel %vm123_vm5, %v11828_v25, %v7984_v7  ;;  %v5158_v57 = vsel %vm123_vm5, %v7984_v7, %v7985_v24  ;;  %v5159_v38 = vsel %vm123_vm5, %v7985_v24, %v7989_v35  ;;  %v8020_v61 = vunpack.i.h.bf16 %v10841_v59  ;;  %v11833_v7 = vld [vmem:[#allocation22_spill] sm:$0xff] }
 0x3b2   :  { %7074 = vmatmul.msk.f32.vlgmr.msrb.gmra.mxu3 %vm875_vm13, %v10794_v14  ;;  %v10884_v32 = vpop.f32.mrf.mxu0  ;;  %5274 = vmatpush.msrb.mxu0 %v5157_v17  ;;  %v2236_v25 = vadd.f32 %v11833_v7, %v1994_v16  ;;  %v10888_v35 = vpop.permute.xlu0 %8007  ;;  %v5149_v24 = vsel %vm123_vm5, %v7959_v46, %v7960_v60  ;;  %v5151_v16 = vsel %vm123_vm5, %v7964_v5, %v7965_v11  ;;  %v11834_v11 = vld [vmem:[#allocation25_spill] sm:$0xff]  ;;  %v11835_v5 = vld [vmem:[#allocation26_spill] sm:$0xff]  ;;  %vm5627_vm5 = vcmask 736256  }
 0x3b3   :  { %v10890_v21 = vpop.permute.xlu2 %8032  ;;  %5294 = vmatpush.msrb.mxu1 %v5158_v57  ;;  %5314 = vmatpush.msrb.mxu2 %v5159_v38  ;;  %v10896_v26 = vpop.f32.mrf.mxu1  ;;  %v2480_v17 = vadd.f32 %v10365_v45, %v2238_v28  ;;  %v2474_v46 = vadd.f32 %v10396_v2, %v2232_v53  ;;  %v5395_v45 = vsel %vm140_vm7, %v8019_v12, %v8020_v61  ;;  %v11836_v38 = vld [vmem:[#allocation36_spill] sm:$0xff] }
 0x3b4   :  { %8207 = vrot.lane.b32.xlu1 %v10629_v20, %s8271_s7  ;;  %5275 = vmatpush.msrb.mxu0 %v5149_v24  ;;  %v2475_v2 = vadd.f32 %v10417_v4, %v2233_v36  ;;  %v2477_v28 = vadd.f32 %v11834_v11, %v2235_v27  ;;  %v2478_v60 = vadd.f32 %v10427_v10, %v2236_v25  ;;  %v11839_v36 = vld [vmem:[#allocation32_spill] sm:$0xff]  ;;  %v11841_v24 = vld [vmem:[#allocation34_spill] sm:$0xff] }
 0x3b5   :  { %5295 = vmatpush.msrb.mxu1 %v5150_v19  ;;  %5315 = vmatpush.msrb.mxu2 %v5151_v16  ;;  %v2716_v15 = vadd.f32 %v10472_v41, %v2474_v46  ;;  %v2722_v9 = vadd.f32 %v10429_v18, %v2480_v17  ;;  %v2957_v53 = vadd.f32 %v10543_v55, %v2715_v8  ;;  %v11842_v19 = vld [vmem:[#allocation35_spill] sm:$0xff]  ;;  %v11843_v17 = vld [vmem:[#allocation5_spill] sm:$0xff]  ;;  %v11844_v8 = vld [vmem:[#allocation16_spill] sm:$0xff] }
 0x3b6   :  { %v10909_v57 = vpop.f32.mrf.mxu3  ;;  %7071 = vmatmul.msk.f32.vlgmr.msrb.gmra.mxu0 %vm875_vm13, %v10794_v14  ;;  %7072 = vmatmul.msk.f32.vlgmr.msrb.gmra.mxu1 %vm875_vm13, %v10794_v14  ;;  %v10920_v13 = vpop.permute.xlu1 %7997  ;;  %v2479_v4 = vadd.f32 %v11835_v5, %v2237_v56  ;;  %v2960_v10 = vadd.f32 %v11837_v37, %v2718_v3  ;;  %v2717_v18 = vadd.f32 %v11838_v30, %v2475_v2 }
 0x3b7   :  { %7073 = vmatmul.msk.f32.vlgmr.msrb.gmra.mxu2 %vm875_vm13, %v10794_v14  ;;  %5455 = vmatpush.msra.mxu1 %v5395_v45  ;;  %v7999_v6 = vunpack.i.l.bf16 %v10920_v13  ;;  %v2958_v41 = vadd.f32 %v11836_v38, %v2716_v15  ;;  %v2719_v55 = vadd.f32 %v11839_v36, %v2477_v28  ;;  %v3199_v54 = vadd.f32 %v10613_v33, %v2957_v53  ;;  %v10962_v33 = vld [vmem:[%s11559_s4 + $0x4c] sm:$0x7]  ;;  %v11846_v53 = vld [vmem:[#allocation38_spill] sm:$0xff] }
 0x3b8   :  { %v10951_v48 = vadd.f32 %v11841_v24, %v2722_v9  ;;  %v2721_v16 = vadd.f32 %v11842_v19, %v2479_v4  ;;  %v3202_v45 = vadd.f32 %v11844_v8, %v2960_v10  ;;  %v8000_v38 = vunpack.i.h.bf16 %v10920_v13  ;;  %v11848_v19 = vld [vmem:[#allocation41_spill] sm:$0xff] }
 0x3b9   :  { %8232 = vrot.lane.b32.xlu0 %v10536_v63, %s8272_s13  ;;  %8212 = vrot.lane.b32.xlu2 %v10648_v40, %s8271_s7  ;;  %v5387_v14 = vsel %vm140_vm7, %v7995_v0, %v7999_v6  ;;  %v10945_v27 = vpop.f32.mrf.mxu2  ;;  %v11840_v63 = vld [vmem:[#allocation33_spill] sm:$0xff]  ;;  %v3200_v56 = vadd.f32 %v11843_v17, %v2958_v41  ;;  %v3441_v2 = vadd.f32 %v10689_v39, %v3199_v54  ;;  %v8004_v41 = vunpack.i.l.bf16 %v10780_v51  ;;  %v11849_v17 = vld [vmem:[#allocation42_spill] sm:$0xff] }
 0x3ba   :  { %v10947_v7 = vpop.f32.mrf.mxu0  ;;  %5456 = vmatpush.msra.mxu1 %v5387_v14  ;;  %v2720_v25 = vadd.f32 %v11840_v63, %v2478_v60  ;;  %v10955_v46 = vpop.permute.xlu0 %8022  ;;  %v11845_v60 = vld [vmem:[#allocation37_spill] sm:$0xff]  ;;  %v2961_v5 = vadd.f32 %v11846_v53, %v2719_v55  ;;  %v8035_v13 = vunpack.i.h.bf16 %v10890_v21  ;;  %v8034_v10 = vunpack.i.l.bf16 %v10890_v21 }
 0x3bb   :  { %v10957_v3 = vpop.permute.xlu2 %8047  ;;  %v8025_v15 = vunpack.i.h.bf16 %v10955_v46  ;;  %v8024_v11 = vunpack.i.l.bf16 %v10955_v46  ;;  %v10968_v28 = vpop.f32.mrf.mxu1  ;;  %v2959_v9 = vadd.f32 %v11845_v60, %v2717_v18  ;;  %v3442_v4 = vadd.f32 %v10700_v42, %v3200_v56  ;;  %v11847_v18 = vld [vmem:[#allocation14_spill] sm:$0xff] }
 0x3bc   :  { %8222 = vrot.lane.b32.xlu1 %v11786_v34, %s8272_s13  ;;  %v3683_v39 = vadd.f32 %v10776_v23, %v3441_v2  ;;  %v2962_v36 = vadd.f32 %v11847_v18, %v2720_v25  ;;  %v7994_v55 = vunpack.i.l.bf16 %v10839_v22  ;;  %v8010_v63 = vunpack.i.h.bf16 %v10888_v35  ;;  %v11855_v22 = vld [vmem:[#allocation39_spill] sm:$0xff] }
 0x3bd   :  { %v5396_v37 = vsel %vm140_vm7, %v8020_v61, %v8024_v11  ;;  %v5397_v34 = vsel %vm140_vm7, %v8024_v11, %v8025_v15  ;;  %v3684_v61 = vadd.f32 %v10782_v43, %v3442_v4  ;;  %v5388_v24 = vsel %vm140_vm7, %v7999_v6, %v8000_v38  ;;  %v11850_v11 = vld [vmem:[#allocation40_spill] sm:$0xff] }
 0x3be   :  { %v10978_v14 = vpop.f32.mrf.mxu3  ;;  %7077 = vmatmul.msk.f32.vlgmr.msra.gmra.mxu1 %vm875_vm13, %v10962_v33  ;;  %v8013_v42 = vpop.permute.xlu1 %8012  ;;  %5475 = vmatpush.msra.mxu2 %v5396_v37  ;;  %v3856_v54 = vadd.f32 %v10884_v32, %v3683_v39  ;;  %v5389_v25 = vsel %vm140_vm7, %v8000_v38, %v8004_v41  ;;  %v3201_v32 = vadd.f32 %v11848_v19, %v2959_v9  ;;  %v11851_v9 = vld [vmem:[#allocation44_spill] sm:$0xff]  ;;  %v11852_v38 = vld [vmem:[#allocation43_spill] sm:$0xff]  ;;  %v8009_v18 = vunpack.i.l.bf16 %v10888_v35 }
 0x3bf   :  { %5495 = vmatpush.msra.mxu3 %v5397_v34  ;;  %v8015_v23 = vunpack.i.h.bf16 %v8013_v42  ;;  %v8014_v30 = vunpack.i.l.bf16 %v8013_v42  ;;  %v3203_v56 = vadd.f32 %v11849_v17, %v2961_v5  ;;  %v3857_v8 = vadd.f32 %v10896_v26, %v3684_v61  ;;  %v11853_v37 = vld [vmem:[#allocation47_spill] sm:$0xff]  ;;  %v11856_v61 = vld [vmem:[#allocation45_spill] sm:$0xff] }
 0x3c0   :  { %5476 = vmatpush.msra.mxu2 %v5388_v24  ;;  %v5401_v59 = vsel %vm140_vm7, %v8034_v10, %v8035_v13  ;;  %v2963_v60 = vadd.f32 %v11850_v11, %v2721_v16  ;;  %v3204_v53 = vadd.f32 %v11851_v9, %v2962_v36  ;;  %v3443_v5 = vadd.f32 %v10715_v50, %v3201_v32  ;;  %v11854_v13 = vld [vmem:[#allocation48_spill] sm:$0xff]  ;;  %v11857_v24 = vld [vmem:[#allocation49_spill] sm:$0xff]  ;;  %v11859_v9 = vld [vmem:[#allocation46_spill] sm:$0xff] }
 0x3c1   :  { %8247 = vrot.lane.b32.xlu0 %v11791_v44, %s8272_s13  ;;  %8227 = vrot.lane.b32.xlu2 %v10572_v52, %s8272_s13  ;;  %v5394_v43 = vsel %vm140_vm7, %v8015_v23, %v8019_v12  ;;  %v11009_v44 = vpop.f32.mrf.mxu2  ;;  %v5393_v2 = vsel %vm140_vm7, %v8010_v63, %v8014_v30  ;;  %v3444_v39 = vadd.f32 %v11852_v38, %v3202_v45  ;;  %v8005_v50 = vunpack.i.h.bf16 %v10780_v51 }
 0x3c2   :  { %5496 = vmatpush.msra.mxu3 %v5389_v25  ;;  %v3990_v52 = vpop.f32.mrf.mxu0  ;;  %7078 = vmatmul.msk.f32.vlgmr.msra.gmra.mxu2 %vm875_vm13, %v10962_v33  ;;  %v11018_v12 = vpop.permute.xlu0 %8037  ;;  %v3445_v34 = vadd.f32 %v11853_v37, %v3203_v56  ;;  %v5386_v16 = vsel %vm140_vm7, %v7994_v55, %v7995_v0  ;;  %v3446_v23 = vadd.f32 %v11854_v13, %v3204_v53  ;;  %v11860_v37 = vld [vmem:[#allocation4_spill] sm:$0xff] }
 0x3c3   :  { %7079 = vmatmul.msk.f32.vlgmr.msra.gmra.mxu3 %vm875_vm13, %v10962_v33  ;;  %v11020_v6 = vpop.permute.xlu2 %8062  ;;  %v11022_v26 = vadd.f32 %v3990_v52, %v3856_v54  ;;  %v4010_v4 = vpop.f32.mrf.mxu1  ;;  %5435 = vmatpush.msra.mxu0 %v5394_v43  ;;  %v3685_v30 = vadd.f32 %v10822_v58, %v3443_v5  ;;  %v3206_v0 = vadd.f32 %v11855_v22, %v10951_v48 }
 0x3c4   :  { %5575 = vmatpush.msrb.mxu3 %v5401_v59  ;;  %v11032_v42 = vadd.f32 %v4010_v4, %v3857_v8  ;;  %8237 = vrot.lane.b32.xlu1 %v10487_v49, %s8272_s13  ;;  %v6796_v49 = vld [vmem:[%s11560_s5] sm:$0x7]  ;;  %v3205_v55 = vadd.f32 %v11856_v61, %v2963_v60  ;;  %v3686_v25 = vadd.f32 %v11857_v24, %v3444_v39  ;;  %v11111_v39 = vld [vmem:[%s11559_s4 + $0x50] sm:$0x7]  ;;  %v8039_v61 = vunpack.i.l.bf16 %v11018_v12 }
 0x3c5   :  { %5436 = vmatpush.msra.mxu0 %v5386_v16  ;;  %v3687_v43 = vadd.f32 %v10833_v62, %v3445_v34  ;;  %v3688_v19 = vadd.f32 %v10845_v47, %v3446_v23  ;;  %v3858_v32 = vadd.f32 %v10945_v27, %v3685_v30  ;;  %v5390_v47 = vsel %vm140_vm7, %v8004_v41, %v8005_v50 }
 0x3c6   :  { %v11043_v45 = vpop.f32.mrf.mxu3  ;;  %5576 = vmatpush.msrb.mxu3 %v5393_v2  ;;  %v8028_v36 = vpop.permute.xlu1 %8027  ;;  %7076 = vmatmul.msk.f32.vlgmr.msra.gmra.mxu0 %vm875_vm13, %v10962_v33  ;;  %v3859_v62 = vadd.f32 %v10855_v31, %v3686_v25  ;;  %v3448_v53 = vadd.f32 %v11859_v9, %v3206_v0  ;;  %v8040_v0 = vunpack.i.h.bf16 %v11018_v12 }
 0x3c7   :  { %v8030_v58 = vunpack.i.h.bf16 %v8028_v36  ;;  %v8029_v54 = vunpack.i.l.bf16 %v8028_v36  ;;  %v3860_v27 = vadd.f32 %v10947_v7, %v3687_v43  ;;  %v3861_v46 = vadd.f32 %v10968_v28, %v3688_v19 }
 0x3c8   :  { %v5392_v28 = vsel %vm140_vm7, %v8009_v18, %v8010_v63  ;;  %v4136_v2 = vadd.f32 %v10978_v14, %v3859_v62  ;;  %v3690_v34 = vadd.f32 %v11860_v37, %v3448_v53  ;;  %v5628_v62 = vsel %vm5627_vm5, %v8039_v61, %v8040_v0 }
 0x3c9   :  { %6799 = vperm.xlu0 %7179, %v6796_v49   ;;  %8242 = vrot.lane.b32.xlu2 %v11795_v29, %s8272_s13  ;;  %v5398_v48 = vsel %vm140_vm7, %v8025_v15, %v8029_v54  ;;  %v5399_v17 = vsel %vm140_vm7, %v8029_v54, %v8030_v58  ;;  %v5400_v56 = vsel %vm140_vm7, %v8030_v58, %v8034_v10  ;;  %v4030_v8 = vpop.f32.mrf.mxu2  ;;  %v11858_v10 = vld [vmem:[#allocation6_spill] sm:$0xff] }
 0x3ca   :  { %5515 = vmatpush.msrb.mxu0 %v5398_v48  ;;  %5535 = vmatpush.msrb.mxu1 %v5399_v17  ;;  %v5391_v29 = vsel %vm140_vm7, %v8005_v50, %v8009_v18  ;;  %v11075_v21 = vpop.permute.xlu0 %8052  ;;  %v11079_v31 = vadd.f32 %v4030_v8, %v3858_v32  ;;  %v3447_v51 = vadd.f32 %v11858_v10, %v3205_v55  ;;  %v4070_v59 = vpop.f32.mrf.mxu0  ;;  %v8064_v55 = vunpack.i.l.bf16 %v11020_v6 }
 0x3cb   :  { %7083 = vmatmul.msk.f32.vlgmr.msrb.gmra.mxu3 %vm875_vm13, %v10962_v33  ;;  %v11077_v15 = vpop.permute.xlu2 %8077  ;;  %5555 = vmatpush.msrb.mxu2 %v5400_v56  ;;  %v8055_v41 = vunpack.i.h.bf16 %v11075_v21  ;;  %v8054_v52 = vunpack.i.l.bf16 %v11075_v21  ;;  %v4090_v7 = vpop.f32.mrf.mxu1  ;;  %v11088_v11 = vadd.f32 %v4070_v59, %v3860_v27  ;;  %vm6864_vm7 = vcmask 1043456  }
 0x3cc   :  { %5516 = vmatpush.msrb.mxu0 %v5390_v47  ;;  %5536 = vmatpush.msrb.mxu1 %v5391_v29  ;;  %v11090_v60 = vadd.f32 %v4090_v7, %v3861_v46  ;;  %v3689_v63 = vadd.f32 %v10870_v1, %v3447_v51  ;;  %v8080_v12 = vunpack.i.h.bf16 %v11077_v15  ;;  %v8050_v47 = vunpack.i.h.bf16 %v10957_v3 }
 0x3cd   :  { %8252 = vrot.lane.b32.xlu1 %v10629_v20, %s8272_s13  ;;  %5556 = vmatpush.msrb.mxu2 %v5392_v28  ;;  %v5639_v35 = vsel %vm5627_vm5, %v8054_v52, %v8055_v41  ;;  %v8049_v20 = vunpack.i.l.bf16 %v10957_v3  ;;  %v8079_v59 = vunpack.i.l.bf16 %v11077_v15 }
 0x3ce   :  { %v4291_v5 = vpop.f32.mrf.mxu3  ;;  %7081 = vmatmul.msk.f32.vlgmr.msrb.gmra.mxu1 %vm875_vm13, %v10962_v33  ;;  %7082 = vmatmul.msk.f32.vlgmr.msrb.gmra.mxu2 %vm875_vm13, %v10962_v33  ;;  %v8043_v14 = vpop.permute.xlu1 %8042  ;;  %v3862_v16 = vadd.f32 %v11009_v44, %v3689_v63  ;;  %v8065_v44 = vunpack.i.h.bf16 %v11020_v6 }
 0x3cf   :  { %v11104_v4 = vadd.f32 %v4291_v5, %v4136_v2  ;;  %5737 = vmatpush.msra.mxu3 %v5639_v35  ;;  %7080 = vmatmul.msk.f32.vlgmr.msrb.gmra.mxu0 %vm875_vm13, %v10962_v33  ;;  %v8045_v38 = vunpack.i.h.bf16 %v8043_v14  ;;  %v3863_v33 = vadd.f32 %v10909_v57, %v3690_v34  ;;  %v8044_v25 = vunpack.i.l.bf16 %v8043_v14 }
 0x3d0   :  { %v5632_v9 = vsel %vm5627_vm5, %v8049_v20, %v8050_v47  ;;  %v5633_v63 = vsel %vm5627_vm5, %v8050_v47, %v8079_v59 }
 0x3d1   :  { %8257 = vrot.lane.b32.xlu2 %v10648_v40, %s8272_s13  ;;  %v5631_v1 = vsel %vm5627_vm5, %v8045_v38, %v8049_v20  ;;  %v4110_v13 = vpop.f32.mrf.mxu2  ;;  %v4140_v49 = vadd.f32 %v11043_v45, %v3863_v33  ;;  %v5629_v8 = vsel %vm5627_vm5, %v8040_v0, %v8044_v25  ;;  %v5630_v46 = vsel %vm5627_vm5, %v8044_v25, %v8045_v38  ;;  %v11227_v0 = vld [vmem:[%s11559_s4 + $0x54] sm:$0x7] }
 0x3d2   :  { %5738 = vmatpush.msra.mxu3 %v5631_v1  ;;  %v11121_v23 = vpop.permute.xlu0 %8067  ;;  %v11125_v30 = vadd.f32 %v4110_v13, %v3862_v16  ;;  %v4231_v18 = vpop.f32.mrf.mxu0 }
 0x3d3   :  { %v11123_v50 = vpop.permute.xlu2 %8092  ;;  %7088 = vmatmul.msk.f32.vlgmr.msra.gmra.mxu3 %vm875_vm13, %v11111_v39  ;;  %v8069_v40 = vunpack.i.l.bf16 %v11121_v23  ;;  %v4251_v36 = vpop.f32.mrf.mxu1  ;;  %v11133_v22 = vadd.f32 %v4231_v18, %v11022_v26  ;;  %v8070_v7 = vunpack.i.h.bf16 %v11121_v23 }
 0x3d4   :  { %v11136_v57 = vadd.f32 %v4251_v36, %v11032_v42  ;;  %v8094_v5 = vunpack.i.l.bf16 %v11123_v50 }
 0x3d5   :  { %v5643_v54 = vsel %vm5627_vm5, %v8065_v44, %v8069_v40  ;;  %v5634_v1 = vsel %vm5627_vm5, %v8079_v59, %v8070_v7 }
 0x3d6   :  { %v4371_v58 = vpop.f32.mrf.mxu3  ;;  %v8058_v24 = vpop.permute.xlu1 %8057  ;;  %5817 = vmatpush.msrb.mxu3 %v5643_v54 }
 0x3d7   :  { %v11142_v43 = vadd.f32 %v4371_v58, %v4140_v49  ;;  %v8060_v45 = vunpack.i.h.bf16 %v8058_v24  ;;  %v8059_v26 = vunpack.i.l.bf16 %v8058_v24 }
 0x3d9   :  { %v5636_v19 = vsel %vm5627_vm5, %v8064_v55, %v8060_v45  ;;  %v5637_v42 = vsel %vm5627_vm5, %v8060_v45, %v8059_v26  ;;  %v5638_v32 = vsel %vm5627_vm5, %v8059_v26, %v8054_v52  ;;  %v4271_v48 = vpop.f32.mrf.mxu2 }
 0x3da   :  { %5677 = vmatpush.msra.mxu0 %v5636_v19  ;;  %5697 = vmatpush.msra.mxu1 %v5637_v42  ;;  %v11148_v6 = vpop.permute.xlu0 %8082  ;;  %v11153_v56 = vadd.f32 %v4271_v48, %v11079_v31  ;;  %v4311_v29 = vpop.f32.mrf.mxu0  ;;  %v5640_v31 = vsel %vm5627_vm5, %v8055_v41, %v8080_v12 }
 0x3db   :  { %v11150_v17 = vpop.permute.xlu2 %8107  ;;  %5717 = vmatpush.msra.mxu2 %v5638_v32  ;;  %v4331_v27 = vpop.f32.mrf.mxu1  ;;  %v11160_v10 = vadd.f32 %v4311_v29, %v11088_v11  ;;  %v8085_v11 = vunpack.i.h.bf16 %v11148_v6 }
 0x3dc   :  { %5678 = vmatpush.msra.mxu0 %v5628_v62  ;;  %5698 = vmatpush.msra.mxu1 %v5629_v8  ;;  %v11163_v51 = vadd.f32 %v4331_v27, %v11090_v60  ;;  %v8084_v60 = vunpack.i.l.bf16 %v11148_v6  ;;  %v8109_v19 = vunpack.i.l.bf16 %v11150_v17  ;;  %v8110_v8 = vunpack.i.h.bf16 %v11150_v17 }
 0x3dd   :  { %5718 = vmatpush.msra.mxu2 %v5630_v46  ;;  %7085 = vmatmul.msk.f32.vlgmr.msra.gmra.mxu0 %vm875_vm13, %v11111_v39 }
 0x3de   :  { %7086 = vmatmul.msk.f32.vlgmr.msra.gmra.mxu1 %vm875_vm13, %v11111_v39  ;;  %7087 = vmatmul.msk.f32.vlgmr.msra.gmra.mxu2 %vm875_vm13, %v11111_v39  ;;  %v8073_v52 = vpop.permute.xlu1 %8072  ;;  %v5881_v16 = vsel %vm5869_vm6, %v8084_v60, %v8085_v11  ;;  %v5880_v36 = vsel %vm5869_vm6, %v8094_v5, %v8084_v60 }
 0x3df   :  { %5757 = vmatpush.msrb.mxu0 %v5640_v31  ;;  %v8075_v28 = vunpack.i.h.bf16 %v8073_v52  ;;  %v8074_v2 = vunpack.i.l.bf16 %v8073_v52 }
 0x3e1   :  { %5758 = vmatpush.msrb.mxu0 %v5632_v9  ;;  %v5641_v21 = vsel %vm5627_vm5, %v8080_v12, %v8075_v28  ;;  %v5642_v41 = vsel %vm5627_vm5, %v8075_v28, %v8065_v44  ;;  %v5635_v15 = vsel %vm5627_vm5, %v8070_v7, %v8074_v2  ;;  %v4351_v53 = vpop.f32.mrf.mxu2 }
 0x3e2   :  { %5777 = vmatpush.msrb.mxu1 %v5641_v21  ;;  %5797 = vmatpush.msrb.mxu2 %v5642_v41  ;;  %v11185_v35 = vpop.permute.xlu0 %8097  ;;  %v11190_v3 = vadd.f32 %v4351_v53, %v11125_v30  ;;  %v4473_v37 = vpop.f32.mrf.mxu0  ;;  %v8095_v30 = vunpack.i.h.bf16 %v11123_v50 }
 0x3e3   :  { %v11187_v14 = vpop.permute.xlu2 %8122  ;;  %5818 = vmatpush.msrb.mxu3 %v5635_v15  ;;  %v8100_v20 = vunpack.i.h.bf16 %v11185_v35  ;;  %v8099_v38 = vunpack.i.l.bf16 %v11185_v35  ;;  %v4493_v34 = vpop.f32.mrf.mxu1  ;;  %v11202_v13 = vadd.f32 %v4473_v37, %v11133_v22 }
 0x3e4   :  { %7092 = vmatmul.msk.f32.vlgmr.msrb.gmra.mxu3 %vm875_vm13, %v11111_v39  ;;  %5778 = vmatpush.msrb.mxu1 %v5633_v63  ;;  %v4617_v33 = vadd.f32 %v4493_v34, %v11136_v57  ;;  %v4533_v23 = vpop.f32.mrf.mxu3  ;;  %v8124_v47 = vunpack.i.l.bf16 %v11187_v14  ;;  %v8125_v28 = vunpack.i.h.bf16 %v11187_v14 }
 0x3e5   :  { %5979 = vmatpush.msra.mxu3 %v5881_v16  ;;  %5798 = vmatpush.msrb.mxu2 %v5634_v1  ;;  %v11207_v44 = vadd.f32 %v4533_v23, %v11104_v4  ;;  %v5879_v40 = vsel %vm5869_vm6, %v8099_v38, %v8094_v5  ;;  %v5871_v49 = vsel %vm5869_vm6, %v8100_v20, %v8095_v30 }
 0x3e6   :  { %7089 = vmatmul.msk.f32.vlgmr.msrb.gmra.mxu0 %vm875_vm13, %v11111_v39  ;;  %7090 = vmatmul.msk.f32.vlgmr.msrb.gmra.mxu1 %vm875_vm13, %v11111_v39  ;;  %v11214_v18 = vpop.permute.xlu1 %8087  ;;  %v5870_v31 = vsel %vm5869_vm6, %v8110_v8, %v8100_v20  ;;  %v5882_v60 = vsel %vm5869_vm6, %v8085_v11, %v8124_v47 }
 0x3e7   :  { %7091 = vmatmul.msk.f32.vlgmr.msrb.gmra.mxu2 %vm875_vm13, %v11111_v39  ;;  %5939 = vmatpush.msra.mxu1 %v5879_v40  ;;  %v8090_v50 = vunpack.i.h.bf16 %v11214_v18  ;;  %v8089_v4 = vunpack.i.l.bf16 %v11214_v18 }
 0x3e8   :  { %5959 = vmatpush.msra.mxu2 %v5880_v36 }
 0x3e9   :  { %5940 = vmatpush.msra.mxu1 %v5871_v49  ;;  %v5872_v22 = vsel %vm5869_vm6, %v8095_v30, %v8089_v4  ;;  %v5873_v57 = vsel %vm5869_vm6, %v8089_v4, %v8090_v50  ;;  %v4513_v39 = vpop.f32.mrf.mxu2  ;;  %v5874_v53 = vsel %vm5869_vm6, %v8090_v50, %v8125_v28  ;;  %v11305_v49 = vld [vmem:[%s11559_s4 + $0x58] sm:$0x7] }
 0x3ea   :  { %5960 = vmatpush.msra.mxu2 %v5872_v22  ;;  %5980 = vmatpush.msra.mxu3 %v5873_v57  ;;  %v8113_v61 = vpop.permute.xlu0 %8112  ;;  %v4618_v58 = vadd.f32 %v4513_v39, %v11153_v56  ;;  %v4553_v54 = vpop.f32.mrf.mxu0 }
 0x3eb   :  { %v11229_v55 = vpop.permute.xlu2 %8137  ;;  %v4573_v24 = vpop.f32.mrf.mxu1  ;;  %v11235_v25 = vadd.f32 %v4553_v54, %v11160_v10  ;;  %v8115_v12 = vunpack.i.h.bf16 %v8113_v61  ;;  %v8114_v48 = vunpack.i.l.bf16 %v8113_v61 }
 0x3ec   :  { %7097 = vmatmul.msk.f32.vlgmr.msra.gmra.mxu3 %vm875_vm13, %v11227_v0  ;;  %v11238_v45 = vadd.f32 %v4573_v24, %v11163_v51  ;;  %v4613_v26 = vpop.f32.mrf.mxu3 }
 0x3ed   :  { %v11242_v42 = vadd.f32 %v4613_v26, %v11142_v43  ;;  %v5877_v17 = vsel %vm5869_vm6, %v8114_v48, %v8115_v12 }
 0x3ee   :  { %7095 = vmatmul.msk.f32.vlgmr.msra.gmra.mxu1 %vm875_vm13, %v11227_v0  ;;  %v8103_v32 = vpop.permute.xlu1 %8102 }
 0x3ef   :  { %7096 = vmatmul.msk.f32.vlgmr.msra.gmra.mxu2 %vm875_vm13, %v11227_v0  ;;  %v8105_v56 = vunpack.i.h.bf16 %v8103_v32  ;;  %v8104_v62 = vunpack.i.l.bf16 %v8103_v32 }
 0x3f1   :  { %v5878_v29 = vsel %vm5869_vm6, %v8104_v62, %v8099_v38  ;;  %v5885_v43 = vsel %vm5869_vm6, %v8105_v56, %v8109_v19  ;;  %v4593_v27 = vpop.f32.mrf.mxu2  ;;  %v8139_v38 = vunpack.i.l.bf16 %v11229_v55 }
 0x3f2   :  { %5919 = vmatpush.msra.mxu0 %v5878_v29  ;;  %6059 = vmatpush.msrb.mxu3 %v5885_v43  ;;  %v11252_v46 = vpop.permute.xlu0 %8127  ;;  %v11257_v51 = vadd.f32 %v4593_v27, %v11190_v3 }
 0x3f3   :  { %v11254_v10 = vpop.permute.xlu2 %8152  ;;  %v8130_v52 = vunpack.i.h.bf16 %v11252_v46  ;;  %v8129_v59 = vunpack.i.l.bf16 %v11252_v46  ;;  %v4735_v7 = vpop.f32.mrf.mxu1 }
 0x3f4   :  { %5920 = vmatpush.msra.mxu0 %v5870_v31  ;;  %6060 = vmatpush.msrb.mxu3 %v5877_v17  ;;  %v11264_v2 = vadd.f32 %v4735_v7, %v4617_v33  ;;  %v8154_v24 = vunpack.i.l.bf16 %v11254_v10 }
 0x3f5   :  { %7094 = vmatmul.msk.f32.vlgmr.msra.gmra.mxu0 %vm875_vm13, %v11227_v0  ;;  %7101 = vmatmul.msk.f32.vlgmr.msrb.gmra.mxu3 %vm875_vm13, %v11227_v0  ;;  %v6122_v9 = vsel %vm191_vm10, %v8129_v59, %v8130_v52  ;;  %v6121_v40 = vsel %vm191_vm10, %v8139_v38, %v8129_v59 }
 0x3f6   :  { %5999 = vmatpush.msrb.mxu0 %v5882_v60  ;;  %v8118_v21 = vpop.permute.xlu1 %8117  ;;  %6220 = vmatpush.msra.mxu3 %v6122_v9 }
 0x3f7   :  { %v8120_v41 = vunpack.i.h.bf16 %v8118_v21  ;;  %v8119_v15 = vunpack.i.l.bf16 %v8118_v21 }
 0x3f8   :  { %6000 = vmatpush.msrb.mxu0 %v5874_v53 }
 0x3f9   :  { %v5883_v5 = vsel %vm5869_vm6, %v8124_v47, %v8119_v15  ;;  %v5884_v6 = vsel %vm5869_vm6, %v8119_v15, %v8105_v56  ;;  %v5875_v63 = vsel %vm5869_vm6, %v8125_v28, %v8120_v41  ;;  %v5876_v20 = vsel %vm5869_vm6, %v8120_v41, %v8114_v48 }
 0x3fa   :  { %v4715_v11 = vpop.f32.mrf.mxu0  ;;  %6019 = vmatpush.msrb.mxu1 %v5883_v5  ;;  %6039 = vmatpush.msrb.mxu2 %v5884_v6  ;;  %v8143_v35 = vpop.permute.xlu0 %8142  ;;  %v8155_v48 = vunpack.i.h.bf16 %v11254_v10 }
 0x3fb   :  { %v11279_v14 = vpop.permute.xlu2 %8167  ;;  %v11282_v3 = vadd.f32 %v4715_v11, %v11202_v13  ;;  %v8145_v37 = vunpack.i.h.bf16 %v8143_v35  ;;  %v8144_v34 = vunpack.i.l.bf16 %v8143_v35  ;;  %v4755_v16 = vpop.f32.mrf.mxu2  ;;  %v8140_v13 = vunpack.i.h.bf16 %v11229_v55 }
 0x3fc   :  { %6020 = vmatpush.msrb.mxu1 %v5875_v63  ;;  %6040 = vmatpush.msrb.mxu2 %v5876_v20  ;;  %v11287_v1 = vadd.f32 %v4755_v16, %v4618_v58  ;;  %v4775_v33 = vpop.f32.mrf.mxu3  ;;  %v8169_v56 = vunpack.i.l.bf16 %v11279_v14  ;;  %v8170_v59 = vunpack.i.h.bf16 %v11279_v14 }
 0x3fd   :  { %7098 = vmatmul.msk.f32.vlgmr.msrb.gmra.mxu0 %vm875_vm13, %v11227_v0  ;;  %7099 = vmatmul.msk.f32.vlgmr.msrb.gmra.mxu1 %vm875_vm13, %v11227_v0  ;;  %v11295_v23 = vadd.f32 %v4775_v33, %v11207_v44  ;;  %v6120_v30 = vsel %vm191_vm10, %v8144_v34, %v8139_v38  ;;  %v6112_v4 = vsel %vm191_vm10, %v8145_v37, %v8140_v13 }
 0x3fe   :  { %7100 = vmatmul.msk.f32.vlgmr.msrb.gmra.mxu2 %vm875_vm13, %v11227_v0  ;;  %v8133_v18 = vpop.permute.xlu1 %8132  ;;  %6180 = vmatpush.msra.mxu1 %v6120_v30  ;;  %v6111_v43 = vsel %vm191_vm10, %v8155_v48, %v8145_v37  ;;  %v6123_v7 = vsel %vm191_vm10, %v8130_v52, %v8169_v56 }
 0x3ff   :  { %6200 = vmatpush.msra.mxu2 %v6121_v40  ;;  %v8135_v36 = vunpack.i.h.bf16 %v8133_v18  ;;  %v8134_v50 = vunpack.i.l.bf16 %v8133_v18 }
 0x400   :  { %6181 = vmatpush.msra.mxu1 %v6112_v4  ;;  %v4815_v0 = vpop.f32.mrf.mxu1 }
 0x401   :  { %v6113_v44 = vsel %vm191_vm10, %v8140_v13, %v8134_v50  ;;  %v6114_v22 = vsel %vm191_vm10, %v8134_v50, %v8135_v36  ;;  %v11313_v55 = vadd.f32 %v4815_v0, %v11238_v45  ;;  %v6115_v41 = vsel %vm191_vm10, %v8135_v36, %v8170_v59 }
 0x402   :  { %v4795_v57 = vpop.f32.mrf.mxu0  ;;  %6201 = vmatpush.msra.mxu2 %v6113_v44  ;;  %6221 = vmatpush.msra.mxu3 %v6114_v22  ;;  %v8158_v39 = vpop.permute.xlu0 %8157 }
 0x403   :  { %v11310_v61 = vadd.f32 %v4795_v57, %v11235_v25  ;;  %7106 = vmatmul.msk.f32.vlgmr.msra.gmra.mxu3 %vm875_vm13, %v11305_v49  ;;  %v11317_v58 = vpop.permute.xlu2 %8182  ;;  %v8160_v45 = vunpack.i.h.bf16 %v8158_v39  ;;  %v8159_v19 = vunpack.i.l.bf16 %v8158_v39 }
 0x404   :  { %v4855_v54 = vpop.f32.mrf.mxu3  ;;  %v8184_v6 = vunpack.i.l.bf16 %v11317_v58 }
 0x405   :  { %7104 = vmatmul.msk.f32.vlgmr.msra.gmra.mxu1 %vm875_vm13, %v11305_v49  ;;  %v11323_v26 = vadd.f32 %v4855_v54, %v11242_v42  ;;  %v6118_v27 = vsel %vm191_vm10, %v8159_v19, %v8160_v45 }
 0x406   :  { %7105 = vmatmul.msk.f32.vlgmr.msra.gmra.mxu2 %vm875_vm13, %v11305_v49  ;;  %v8148_v25 = vpop.permute.xlu1 %8147 }
 0x407   :  { %v8150_v32 = vunpack.i.h.bf16 %v8148_v25  ;;  %v8149_v12 = vunpack.i.l.bf16 %v8148_v25  ;;  %v4835_v62 = vpop.f32.mrf.mxu2 }
 0x408   :  { %v11332_v42 = vadd.f32 %v4835_v62, %v11257_v51  ;;  %v4976_v17 = vpop.f32.mrf.mxu1 }
 0x409   :  { %v6119_v8 = vsel %vm191_vm10, %v8149_v12, %v8144_v34  ;;  %v6126_v47 = vsel %vm191_vm10, %v8150_v32, %v8154_v24  ;;  %v11342_v51 = vadd.f32 %v4976_v17, %v11264_v2  ;;  %v8185_v34 = vunpack.i.h.bf16 %v11317_v58 }
 0x40a   :  { %6160 = vmatpush.msra.mxu0 %v6119_v8  ;;  %6300 = vmatpush.msrb.mxu3 %v6126_v47  ;;  %v11334_v29 = vpop.permute.xlu0 %8172 }
 0x40b   :  { %v8175_v10 = vunpack.i.h.bf16 %v11334_v29  ;;  %v8174_v31 = vunpack.i.l.bf16 %v11334_v29  ;;  %v11351_v28 = vpop.permute.xlu2 %8197 }
 0x40c   :  { %6161 = vmatpush.msra.mxu0 %v6111_v43  ;;  %6301 = vmatpush.msrb.mxu3 %v6118_v27  ;;  %v8199_v39 = vunpack.i.l.bf16 %v11351_v28 }
 0x40d   :  { %7103 = vmatmul.msk.f32.vlgmr.msra.gmra.mxu0 %vm875_vm13, %v11305_v49  ;;  %7110 = vmatmul.msk.f32.vlgmr.msrb.gmra.mxu3 %vm875_vm13, %v11305_v49  ;;  %v6363_v60 = vsel %vm208_vm12, %v8174_v31, %v8175_v10 }
 0x40e   :  { %6240 = vmatpush.msrb.mxu0 %v6123_v7  ;;  %v8163_v9 = vpop.permute.xlu1 %8162  ;;  %6461 = vmatpush.msra.mxu3 %v6363_v60 }
 0x40f   :  { %v8165_v2 = vunpack.i.h.bf16 %v8163_v9  ;;  %v8164_v21 = vunpack.i.l.bf16 %v8163_v9 }
 0x410   :  { %6241 = vmatpush.msrb.mxu0 %v6115_v41 }
 0x411   :  { %v6124_v46 = vsel %vm191_vm10, %v8169_v56, %v8164_v21  ;;  %v6125_v52 = vsel %vm191_vm10, %v8164_v21, %v8150_v32  ;;  %v6116_v53 = vsel %vm191_vm10, %v8170_v59, %v8165_v2  ;;  %v6117_v5 = vsel %vm191_vm10, %v8165_v2, %v8159_v19 }
 0x412   :  { %6260 = vmatpush.msrb.mxu1 %v6124_v46  ;;  %6280 = vmatpush.msrb.mxu2 %v6125_v52  ;;  %v8188_v15 = vpop.permute.xlu0 %8187  ;;  %v4956_v14 = vpop.f32.mrf.mxu0 }
 0x413   :  { %v8190_v11 = vunpack.i.h.bf16 %v8188_v15  ;;  %v8189_v35 = vunpack.i.l.bf16 %v8188_v15  ;;  %v4996_v63 = vpop.f32.mrf.mxu2  ;;  %v11363_v20 = vadd.f32 %v4956_v14, %v11282_v3  ;;  %v5016_v37 = vpop.f32.mrf.mxu3 }
 0x414   :  { %6261 = vmatpush.msrb.mxu1 %v6116_v53  ;;  %6281 = vmatpush.msrb.mxu2 %v6117_v5  ;;  %v11366_v38 = vadd.f32 %v4996_v63, %v11287_v1  ;;  %v11374_v16 = vadd.f32 %v5016_v37, %v11295_v23  ;;  %v6362_v1 = vsel %vm208_vm12, %v8184_v6, %v8174_v31  ;;  %v8213_v40 = vpop.permute.xlu2 %8212  ;;  %v11384_v23 = vld [vmem:[%s11559_s4 + $0x5c] sm:$0x7] }
 0x415   :  { %7107 = vmatmul.msk.f32.vlgmr.msrb.gmra.mxu0 %vm875_vm13, %v11305_v49  ;;  %7108 = vmatmul.msk.f32.vlgmr.msrb.gmra.mxu1 %vm875_vm13, %v11305_v49  ;;  %v6361_v3 = vsel %vm208_vm12, %v8189_v35, %v8184_v6  ;;  %v6353_v18 = vsel %vm208_vm12, %v8190_v11, %v8185_v34  ;;  %v8214_v19 = vunpack.i.l.bf16 %v8213_v40  ;;  %v8215_v17 = vunpack.i.h.bf16 %v8213_v40 }
 0x416   :  { %7109 = vmatmul.msk.f32.vlgmr.msrb.gmra.mxu2 %vm875_vm13, %v11305_v49  ;;  %v8178_v33 = vpop.permute.xlu1 %8177  ;;  %6421 = vmatpush.msra.mxu1 %v6361_v3 }
 0x417   :  { %6441 = vmatpush.msra.mxu2 %v6362_v1  ;;  %v8180_v13 = vunpack.i.h.bf16 %v8178_v33  ;;  %v8179_v30 = vunpack.i.l.bf16 %v8178_v33 }
 0x418   :  { %6422 = vmatpush.msra.mxu1 %v6353_v18 }
 0x419   :  { %v6354_v36 = vsel %vm208_vm12, %v8185_v34, %v8179_v30  ;;  %v6355_v50 = vsel %vm208_vm12, %v8179_v30, %v8180_v13  ;;  %v6356_v9 = vsel %vm208_vm12, %v8180_v13, %v8215_v17 }
 0x41a   :  { %6442 = vmatpush.msra.mxu2 %v6354_v36  ;;  %6462 = vmatpush.msra.mxu3 %v6355_v50  ;;  %v5036_v49 = vpop.f32.mrf.mxu0 }
 0x41b   :  { %v8203_v4 = vpop.permute.xlu0 %8202  ;;  %7115 = vmatmul.msk.f32.vlgmr.msra.gmra.mxu3 %vm875_vm13, %v11384_v23  ;;  %v5056_v44 = vpop.f32.mrf.mxu1  ;;  %v11391_v22 = vadd.f32 %v5036_v49, %v11310_v61 }
 0x41c   :  { %v11394_v57 = vadd.f32 %v5056_v44, %v11313_v55  ;;  %v5096_v0 = vpop.f32.mrf.mxu3  ;;  %v8205_v24 = vunpack.i.h.bf16 %v8203_v4  ;;  %v8204_v25 = vunpack.i.l.bf16 %v8203_v4  ;;  %v8200_v55 = vunpack.i.h.bf16 %v11351_v28  ;;  %v8228_v48 = vpop.permute.xlu2 %8227 }
 0x41d   :  { %7113 = vmatmul.msk.f32.vlgmr.msra.gmra.mxu1 %vm875_vm13, %v11384_v23  ;;  %v11400_v58 = vadd.f32 %v5096_v0, %v11323_v26  ;;  %v8229_v46 = vunpack.i.l.bf16 %v8228_v48  ;;  %v8230_v6 = vunpack.i.h.bf16 %v8228_v48 }
 0x41e   :  { %7114 = vmatmul.msk.f32.vlgmr.msra.gmra.mxu2 %vm875_vm13, %v11384_v23  ;;  %v8193_v54 = vpop.permute.xlu1 %8192  ;;  %v6352_v8 = vsel %vm208_vm12, %v8200_v55, %v8190_v11  ;;  %v6359_v47 = vsel %vm208_vm12, %v8204_v25, %v8205_v24 }
 0x41f   :  { %v8195_v61 = vunpack.i.h.bf16 %v8193_v54  ;;  %v8194_v45 = vunpack.i.l.bf16 %v8193_v54 }
 0x421   :  { %v6360_v32 = vsel %vm208_vm12, %v8194_v45, %v8189_v35  ;;  %v6367_v12 = vsel %vm208_vm12, %v8195_v61, %v8199_v39  ;;  %v5076_v56 = vpop.f32.mrf.mxu2 }
 0x422   :  { %6401 = vmatpush.msra.mxu0 %v6360_v32  ;;  %6541 = vmatpush.msrb.mxu3 %v6367_v12  ;;  %v11410_v62 = vadd.f32 %v5076_v56, %v11332_v42  ;;  %v6364_v42 = vsel %vm208_vm12, %v8175_v10, %v8214_v19 }
 0x423   :  { %v11407_v26 = vpop.permute.xlu0 %8217 }
 0x424   :  { %v8220_v43 = vunpack.i.h.bf16 %v11407_v26  ;;  %v8219_v27 = vunpack.i.l.bf16 %v11407_v26  ;;  %v5217_v31 = vpop.f32.mrf.mxu1  ;;  %6402 = vmatpush.msra.mxu0 %v6352_v8  ;;  %6542 = vmatpush.msrb.mxu3 %v6359_v47  ;;  %v8243_v52 = vpop.permute.xlu2 %8242 }
 0x425   :  { %v11417_v59 = vadd.f32 %v5217_v31, %v11342_v51  ;;  %7112 = vmatmul.msk.f32.vlgmr.msra.gmra.mxu0 %vm875_vm13, %v11384_v23  ;;  %7119 = vmatmul.msk.f32.vlgmr.msrb.gmra.mxu3 %vm875_vm13, %v11384_v23  ;;  %v8244_v44 = vunpack.i.l.bf16 %v8243_v52 }
 0x426   :  { %6481 = vmatpush.msrb.mxu0 %v6364_v42  ;;  %v6604_v7 = vsel %vm225_vm11, %v8219_v27, %v8220_v43  ;;  %v8208_v28 = vpop.permute.xlu1 %8207  ;;  %v6603_v34 = vsel %vm225_vm11, %v8229_v46, %v8219_v27 }
 0x427   :  { %6702 = vmatpush.msra.mxu3 %v6604_v7  ;;  %v8210_v60 = vunpack.i.h.bf16 %v8208_v28  ;;  %v8209_v51 = vunpack.i.l.bf16 %v8208_v28 }
 0x428   :  { %6482 = vmatpush.msrb.mxu0 %v6356_v9 }
 0x429   :  { %v6365_v2 = vsel %vm208_vm12, %v8214_v19, %v8209_v51  ;;  %v6366_v29 = vsel %vm208_vm12, %v8209_v51, %v8195_v61  ;;  %v6357_v21 = vsel %vm208_vm12, %v8215_v17, %v8210_v60  ;;  %v6358_v41 = vsel %vm208_vm12, %v8210_v60, %v8204_v25 }
 0x42a   :  { %6501 = vmatpush.msrb.mxu1 %v6365_v2  ;;  %6521 = vmatpush.msrb.mxu2 %v6366_v29 }
 0x42b   :  { %v8233_v10 = vpop.permute.xlu0 %8232  ;;  %v5197_v5 = vpop.f32.mrf.mxu0 }
 0x42c   :  { %v8235_v15 = vunpack.i.h.bf16 %v8233_v10  ;;  %v8234_v53 = vunpack.i.l.bf16 %v8233_v10  ;;  %6502 = vmatpush.msrb.mxu1 %v6357_v21  ;;  %6522 = vmatpush.msrb.mxu2 %v6358_v41  ;;  %v11435_v11 = vadd.f32 %v5197_v5, %v11363_v20  ;;  %v8258_v0 = vpop.permute.xlu2 %8257 }
 0x42d   :  { %v5237_v35 = vpop.f32.mrf.mxu2  ;;  %v5257_v14 = vpop.f32.mrf.mxu3  ;;  %7116 = vmatmul.msk.f32.vlgmr.msrb.gmra.mxu0 %vm875_vm13, %v11384_v23  ;;  %7117 = vmatmul.msk.f32.vlgmr.msrb.gmra.mxu1 %vm875_vm13, %v11384_v23  ;;  %v8259_v45 = vunpack.i.l.bf16 %v8258_v0  ;;  %v8260_v8 = vunpack.i.h.bf16 %v8258_v0 }
 0x42e   :  { %v11442_v63 = vadd.f32 %v5237_v35, %v11366_v38  ;;  %v11445_v37 = vadd.f32 %v5257_v14, %v11374_v16  ;;  %7118 = vmatmul.msk.f32.vlgmr.msrb.gmra.mxu2 %vm875_vm13, %v11384_v23  ;;  %v6602_v20 = vsel %vm225_vm11, %v8234_v53, %v8229_v46  ;;  %v8223_v3 = vpop.permute.xlu1 %8222  ;;  %v6594_v13 = vsel %vm225_vm11, %v8235_v15, %v8230_v6  ;;  %v11455_v38 = vld [vmem:[%s11559_s4 + $0x60] sm:$0x7] }
 0x42f   :  { %6662 = vmatpush.msra.mxu1 %v6602_v20  ;;  %6682 = vmatpush.msra.mxu2 %v6603_v34  ;;  %v8225_v1 = vunpack.i.h.bf16 %v8223_v3  ;;  %v8224_v33 = vunpack.i.l.bf16 %v8223_v3 }
 0x431   :  { %6663 = vmatpush.msra.mxu1 %v6594_v13  ;;  %v6595_v16 = vsel %vm225_vm11, %v8230_v6, %v8224_v33  ;;  %v6596_v30 = vsel %vm225_vm11, %v8224_v33, %v8225_v1  ;;  %v6597_v17 = vsel %vm225_vm11, %v8225_v1, %v8260_v8 }
 0x432   :  { %6683 = vmatpush.msra.mxu2 %v6595_v16  ;;  %6703 = vmatpush.msra.mxu3 %v6596_v30 }
 0x433   :  { %v5297_v40 = vpop.f32.mrf.mxu1  ;;  %7124 = vmatmul.msk.f32.vlgmr.msra.gmra.mxu3 %vm875_vm13, %v11455_v38  ;;  %v5277_v18 = vpop.f32.mrf.mxu0 }
 0x434   :  { %v5345_v23 = vadd.f32 %v5297_v40, %v11394_v57  ;;  %v8248_v36 = vpop.permute.xlu0 %8247  ;;  %v5344_v50 = vadd.f32 %v5277_v18, %v11391_v22  ;;  %v8245_v57 = vunpack.i.h.bf16 %v8243_v52 }
 0x435   :  { %v5337_v4 = vpop.f32.mrf.mxu3  ;;  %7122 = vmatmul.msk.f32.vlgmr.msra.gmra.mxu1 %vm875_vm13, %v11455_v38  ;;  %v8250_v54 = vunpack.i.h.bf16 %v8248_v36  ;;  %v8249_v24 = vunpack.i.l.bf16 %v8248_v36 }
 0x436   :  { %v5347_v49 = vadd.f32 %v5337_v4, %v11400_v58  ;;  %7123 = vmatmul.msk.f32.vlgmr.msra.gmra.mxu2 %vm875_vm13, %v11455_v38  ;;  %v8238_v39 = vpop.permute.xlu1 %8237  ;;  %v6593_v48 = vsel %vm225_vm11, %v8245_v57, %v8235_v15 }
 0x437   :  { %v8240_v25 = vunpack.i.h.bf16 %v8238_v39  ;;  %v8239_v61 = vunpack.i.l.bf16 %v8238_v39  ;;  %v6600_v56 = vsel %vm225_vm11, %v8249_v24, %v8250_v54 }
 0x439   :  { %v6601_v22 = vsel %vm225_vm11, %v8239_v61, %v8234_v53  ;;  %v6608_v19 = vsel %vm225_vm11, %v8240_v25, %v8244_v44 }
 0x43a   :  { %v5317_v55 = vpop.f32.mrf.mxu2  ;;  %6642 = vmatpush.msra.mxu0 %v6601_v22  ;;  %6782 = vmatpush.msrb.mxu3 %v6608_v19 }
 0x43b   :  { %v5346_v32 = vadd.f32 %v5317_v55, %v11410_v62  ;;  %v5458_v58 = vpop.f32.mrf.mxu1  ;;  %v6605_v62 = vsel %vm225_vm11, %v8220_v43, %v8259_v45 }
 0x43c   :  { %v11472_v12 = vadd.f32 %v5458_v58, %v11417_v59  ;;  %6643 = vmatpush.msra.mxu0 %v6593_v48  ;;  %6783 = vmatpush.msrb.mxu3 %v6600_v56 }
 0x43d   :  { %7121 = vmatmul.msk.f32.vlgmr.msra.gmra.mxu0 %vm875_vm13, %v11455_v38  ;;  %7128 = vmatmul.msk.f32.vlgmr.msrb.gmra.mxu3 %vm875_vm13, %v11455_v38 }
 0x43e   :  { %6722 = vmatpush.msrb.mxu0 %v6605_v62 }
 0x43f   :  { %v8253_v47 = vpop.permute.xlu1 %8252 }
 0x440   :  { %v8255_v27 = vunpack.i.h.bf16 %v8253_v47  ;;  %v8254_v31 = vunpack.i.l.bf16 %v8253_v47  ;;  %6723 = vmatpush.msrb.mxu0 %v6597_v17 }
 0x442   :  { %v6606_v59 = vsel %vm225_vm11, %v8259_v45, %v8254_v31  ;;  %v6607_v42 = vsel %vm225_vm11, %v8254_v31, %v8240_v25  ;;  %v6598_v26 = vsel %vm225_vm11, %v8260_v8, %v8255_v27  ;;  %v6599_v43 = vsel %vm225_vm11, %v8255_v27, %v8249_v24 }
 0x443   :  { %6742 = vmatpush.msrb.mxu1 %v6606_v59  ;;  %6762 = vmatpush.msrb.mxu2 %v6607_v42  ;;  %v5438_v7 = vpop.f32.mrf.mxu0  ;;  %v11510_v42 = vpop.permute.xlu0 %6799 }
 0x444   :  { %v5581_v28 = vadd.f32 %v5438_v7, %v11435_v11 }
 0x445   :  { %6743 = vmatpush.msrb.mxu1 %v6598_v26  ;;  %6763 = vmatpush.msrb.mxu2 %v6599_v43  ;;  %v5478_v60 = vpop.f32.mrf.mxu2 }
 0x446   :  { %v5498_v51 = vpop.f32.mrf.mxu3  ;;  %7125 = vmatmul.msk.f32.vlgmr.msrb.gmra.mxu0 %vm875_vm13, %v11455_v38  ;;  %7126 = vmatmul.msk.f32.vlgmr.msrb.gmra.mxu1 %vm875_vm13, %v11455_v38  ;;  %v5583_v9 = vadd.f32 %v5478_v60, %v11442_v63 }
 0x447   :  { %v5584_v2 = vadd.f32 %v5498_v51, %v11445_v37  ;;  %7127 = vmatmul.msk.f32.vlgmr.msrb.gmra.mxu2 %vm875_vm13, %v11455_v38  ;;  %v11516_v51 = vld [vmem:[%s11558_s1] sm:$0xff] }
 0x44b   :  { %v5538_v29 = vpop.f32.mrf.mxu1 }
 0x44c   :  { %v5518_v10 = vpop.f32.mrf.mxu0  ;;  %v11497_v21 = vadd.f32 %v5538_v29, %v5345_v23 }
 0x44d   :  { %v11499_v41 = vadd.f32 %v5518_v10, %v5344_v50 }
 0x44e   :  { %v5578_v46 = vpop.f32.mrf.mxu3 }
 0x44f   :  { %v5588_v52 = vadd.f32 %v5578_v46, %v5347_v49 }
 0x451   :  { %v5558_v15 = vpop.f32.mrf.mxu2 }
 0x452   :  { %v5587_v53 = vadd.f32 %v5558_v15, %v5346_v32 }
 0x456   :  { %v5740_v5 = vpop.f32.mrf.mxu3 }
 0x457   :  { %v5826_v19 = vadd.f32 %v5740_v5, %v5584_v2 }
 0x45a   :  { %v5680_v20 = vpop.f32.mrf.mxu0 }
 0x45b   :  { %v5700_v14 = vpop.f32.mrf.mxu1  ;;  %v5823_v17 = vadd.f32 %v5680_v20, %v5581_v28  ;;  %v6831_v28 = vperm.slane %v11516_v51, 3 }
 0x45c   :  { %v5824_v45 = vadd.f32 %v5700_v14, %v11472_v12 }
 0x461   :  { %v5720_v6 = vpop.f32.mrf.mxu2 }
 0x462   :  { %v5825_v8 = vadd.f32 %v5720_v6, %v5583_v9 }
 0x463   :  { %v5780_v34 = vpop.f32.mrf.mxu1  ;;  %v5760_v3 = vpop.f32.mrf.mxu0 }
 0x464   :  { %v5827_v6 = vadd.f32 %v5760_v3, %v11499_v41  ;;  %v6828_v41 = vperm.slane %v11516_v51, 0 }
 0x467   :  { %v5820_v11 = vpop.f32.mrf.mxu3 }
 0x468   :  { %v5830_v35 = vadd.f32 %v5820_v11, %v5588_v52  ;;  %v5828_v11 = vadd.f32 %v5780_v34, %v11497_v21 }
 0x46a   :  { %v5800_v63 = vpop.f32.mrf.mxu2 }
 0x46b   :  { %v11501_v37 = vadd.f32 %v5800_v63, %v5587_v53  ;;  %v5942_v1 = vpop.f32.mrf.mxu1  ;;  %v6829_v53 = vperm.slane %v11516_v51, 1 }
 0x46c   :  { %v6066_v55 = vadd.f32 %v5942_v1, %v5824_v45 }
 0x46f   :  { %v5982_v38 = vpop.f32.mrf.mxu3 }
 0x470   :  { %v6068_v58 = vadd.f32 %v5982_v38, %v5826_v19 }
 0x472   :  { %v5962_v33 = vpop.f32.mrf.mxu2  ;;  %v5922_v13 = vpop.f32.mrf.mxu0 }
 0x473   :  { %v6067_v59 = vadd.f32 %v5962_v33, %v5825_v8  ;;  %v6065_v26 = vadd.f32 %v5922_v13, %v5823_v17  ;;  %v6830_v33 = vperm.slane %v11516_v51, 2  ;;  %v6832_v17 = vperm.slane %v11516_v51, 4 }
 0x478   :  { %v6062_v40 = vpop.f32.mrf.mxu3 }
 0x479   :  { %v6072_v14 = vadd.f32 %v6062_v40, %v5830_v35 }
 0x47a   :  { %v6022_v16 = vpop.f32.mrf.mxu1  ;;  %v6002_v18 = vpop.f32.mrf.mxu0 }
 0x47b   :  { %v6069_v38 = vadd.f32 %v6002_v18, %v5827_v6 }
 0x481   :  { %v11503_v30 = vpop.f32.mrf.mxu2 }
 0x482   :  { %v6183_v23 = vpop.f32.mrf.mxu1 }
 0x483   :  { %v6307_v32 = vadd.f32 %v6183_v23, %v6066_v55  ;;  %v6070_v23 = vadd.f32 %v6022_v16, %v5828_v11 }
 0x486   :  { %v6223_v36 = vpop.f32.mrf.mxu3 }
 0x487   :  { %v6309_v47 = vadd.f32 %v6223_v36, %v6068_v58 }
 0x489   :  { %v6203_v50 = vpop.f32.mrf.mxu2 }
 0x48a   :  { %v6163_v4 = vpop.f32.mrf.mxu0  ;;  %v6308_v12 = vadd.f32 %v6203_v50, %v6067_v59 }
 0x48b   :  { %v6306_v2 = vadd.f32 %v6163_v4, %v6065_v26 }
 0x490   :  { %v6303_v44 = vpop.f32.mrf.mxu3 }
 0x491   :  { %v6313_v36 = vadd.f32 %v6303_v44, %v6072_v14 }
 0x492   :  { %v6263_v49 = vpop.f32.mrf.mxu1  ;;  %v6243_v39 = vpop.f32.mrf.mxu0 }
 0x493   :  { %v6310_v3 = vadd.f32 %v6243_v39, %v6069_v38  ;;  %v6311_v21 = vadd.f32 %v6263_v49, %v6070_v23 }
 0x499   :  { %v11505_v0 = vpop.f32.mrf.mxu2 }
 0x49a   :  { %v6424_v54 = vpop.f32.mrf.mxu1 }
 0x49b   :  { %v6548_v48 = vadd.f32 %v6424_v54, %v6307_v32 }
 0x49e   :  { %v6464_v24 = vpop.f32.mrf.mxu3 }
 0x49f   :  { %v6550_v7 = vadd.f32 %v6464_v24, %v6309_v47  ;;  %v6833_v47 = vperm.slane %v11516_v51, 5 }
 0x4a1   :  { %v6444_v25 = vpop.f32.mrf.mxu2 }
 0x4a2   :  { %v6404_v61 = vpop.f32.mrf.mxu0  ;;  %v6549_v29 = vadd.f32 %v6444_v25, %v6308_v12 }
 0x4a3   :  { %v6547_v52 = vadd.f32 %v6404_v61, %v6306_v2 }
 0x4a8   :  { %v6544_v22 = vpop.f32.mrf.mxu3 }
 0x4a9   :  { %v6554_v34 = vadd.f32 %v6544_v22, %v6313_v36 }
 0x4aa   :  { %v6504_v57 = vpop.f32.mrf.mxu1  ;;  %v6484_v27 = vpop.f32.mrf.mxu0 }
 0x4ab   :  { %v6551_v61 = vadd.f32 %v6484_v27, %v6310_v3  ;;  %v6552_v45 = vadd.f32 %v6504_v57, %v6311_v21 }
 0x4b1   :  { %v11508_v56 = vpop.f32.mrf.mxu2 }
 0x4b2   :  { %v6665_v62 = vpop.f32.mrf.mxu1 }
 0x4b3   :  { %v6789_v31 = vadd.f32 %v6665_v62, %v6548_v48  ;;  %v6071_v48 = vadd.f32 %v11503_v30, %v11501_v37 }
 0x4b5   :  { %v6803_v43 = vadd.f32 %v11510_v42, %v6789_v31  ;;  %v6312_v27 = vadd.f32 %v11505_v0, %v6071_v48 }
 0x4b6   :  { %v6705_v60 = vpop.f32.mrf.mxu3 }
 0x4b7   :  { %v6791_v9 = vadd.f32 %v6705_v60, %v6550_v7  ;;  %v7130_v15 = vclamps-f32 %v6803_v43, 1.0  ;;  %v6553_v37 = vadd.f32 %v11508_v56, %v6312_v27  ;;  %v6835_v7 = vperm.slane %v11516_v51, 7 }
 0x4b9   :  { %v6805_v10 = vadd.f32 %v11510_v42, %v6791_v9  ;;  %v6685_v46 = vpop.f32.mrf.mxu2  ;;  %v6845_v4 = vmul.f32 %v7130_v15, %v6829_v53 }
 0x4ba   :  { %v6790_v5 = vadd.f32 %v6685_v46, %v6549_v29  ;;  %v6645_v20 = vpop.f32.mrf.mxu0 }
 0x4bb   :  { %v7132_v63 = vclamps-f32 %v6805_v10, 1.0  ;;  %v6788_v13 = vadd.f32 %v6645_v20, %v6547_v52  ;;  %v6860_v18 = vrot.slane %v6845_v4, 4  ;;  %v6834_v10 = vperm.slane %v11516_v51, 6 }
 0x4bc   :  { %v6804_v1 = vadd.f32 %v11510_v42, %v6790_v5 }
 0x4bd   :  { %v6847_v50 = vmul.f32 %v7132_v63, %v6831_v28  ;;  %v6802_v24 = vadd.f32 %v11510_v42, %v6788_v13 }
 0x4be   :  { %v7131_v54 = vclamps-f32 %v6804_v1, 1.0 }
 0x4bf   :  { %v6861_v35 = vrot.slane %v6847_v50, 4  ;;  %v7129_v25 = vclamps-f32 %v6802_v24, 1.0 }
 0x4c0   :  { %v6846_v40 = vmul.f32 %v7131_v54, %v6830_v33  ;;  %v6785_v55 = vpop.f32.mrf.mxu3 }
 0x4c1   :  { %v6844_v44 = vmul.f32 %v7129_v25, %v6828_v41  ;;  %v6795_v19 = vadd.f32 %v6785_v55, %v6554_v34 }
 0x4c2   :  { %v6866_v16 = vsel %vm6864_vm7, %v6846_v40, %v6861_v35 }
 0x4c3   :  { %6874 = vst [vmem:[%s11561_s6 + $0x8] sm:$0x77] %v6866_v16  ;;  %v6725_v32 = vpop.f32.mrf.mxu0  ;;  %v6745_v39 = vpop.f32.mrf.mxu1  ;;  %v6865_v49 = vsel %vm6864_vm7, %v6844_v44, %v6860_v18  ;;  %v6809_v57 = vadd.f32 %v11510_v42, %v6795_v19 }
 0x4c4   :  { %v6792_v58 = vadd.f32 %v6725_v32, %v6551_v61  ;;  %v6793_v22 = vadd.f32 %v6745_v39, %v6552_v45  ;;  %6873 = vst [vmem:[%s11561_s6] sm:$0x77] %v6865_v49 }
 0x4c5   :  { %v7136_v30 = vclamps-f32 %v6809_v57, 1.0 }
 0x4c6   :  { %v6806_v8 = vadd.f32 %v11510_v42, %v6792_v58  ;;  %v6807_v62 = vadd.f32 %v11510_v42, %v6793_v22 }
 0x4c7   :  { %v6851_v2 = vmul.f32 %v7136_v30, %v6835_v7 }
 0x4c8   :  { %v7133_v31 = vclamps-f32 %v6806_v8, 1.0  ;;  %v7134_v59 = vclamps-f32 %v6807_v62, 1.0 }
 0x4c9   :  { %v6863_v28 = vrot.slane %v6851_v2, 4 }
 0x4ca   :  { %v6849_v26 = vmul.f32 %v7134_v59, %v6833_v47  ;;  %v6765_v12 = vpop.f32.mrf.mxu2  ;;  %v6848_v60 = vmul.f32 %v7133_v31, %v6832_v17 }
 0x4cb   :  { %v6794_v43 = vadd.f32 %v6765_v12, %v6553_v37 }
 0x4cc   :  { %v6862_v9 = vrot.slane %v6849_v26, 4 }
 0x4cd   :  { %v6808_v29 = vadd.f32 %v11510_v42, %v6794_v43 }
 0x4ce   :  { %v6867_v0 = vsel %vm6864_vm7, %v6848_v60, %v6862_v9 }
 0x4cf   :  { %6875 = vst [vmem:[%s11561_s6 + $0x10] sm:$0x77] %v6867_v0  ;;  %v7135_v56 = vclamps-f32 %v6808_v29, 1.0 }
 0x4d1   :  { %v6850_v46 = vmul.f32 %v7135_v56, %v6834_v10 }
 0x4d3   :  { %v6868_v52 = vsel %vm6864_vm7, %v6850_v46, %v6863_v28 }
 0x4d4   :  { %6876 = vst [vmem:[%s11561_s6 + $0x18] sm:$0x77] %v6868_v52 }

</bundles_post_ra>
